<compile_context>
chip_gen: v7x
topology: tpu7x:2x2x1
jax: 0.10.0
libtpu: 0.0.40
codegen_flags: <defaults>
</compile_context>

<pallas_src>
import functools

import jax
import jax.numpy as jnp
from jax.experimental import pallas as pl
from jax.experimental.pallas import tpu as pltpu


_HEAD_KEYS = ("head_tu", "head_tv", "head_lu", "head_lv", "head_le")
_HP = 128     # padded hidden size per gate (one full vreg lane width)
_PACK = 128   # lane width of the packed heads / packed misc outputs


# ----------------------------------------------------------------------------
# Fused forward kernel
# ----------------------------------------------------------------------------
def _fused_forward_kernel(
        # --- inputs ---
        x_ref, cond_ref, eps_ref,
        w_enc_ref, b_enc_ref, w_enc_hh_ref,
        w_misc_enc_ref, b_misc_ref,
        w_dec_z_ref, w_dec_c_ref, b_dec_ref, w_dec_hh_ref,
        w_heads_ref, b_heads_ref,
        w_re_in_ref, b_re_ref, w_re_hh_ref,
        w_misc_re_ref,
        # --- outputs ---
        misc_ref, probs_ref,
        *, seq, batch_pad, hp, rep, head_sizes, pack_width):
    f32 = jnp.float32

    def lstm(step_input_fn, w_hh_ref, collect):
        """Unrolled LSTM over `seq` steps (T is small -> trace-time unroll).

        Every gate occupies its own 128-lane segment, so all slices below are
        vreg-aligned and all elementwise ops are full-vreg.
        """
        w_hh = w_hh_ref[...]
        h = jnp.zeros((batch_pad, hp), f32)
        c = jnp.zeros((batch_pad, hp), f32)
        hs = []
        # TODO(synk): if T grows beyond ~16-32, switch to lax.fori_loop with
        # the recurrent state in VMEM scratch to bound vreg live ranges.
        for t in range(seq):
            gates = step_input_fn(t) + jnp.dot(
                h, w_hh, preferred_element_type=f32)          # (B_pad, 4*hp)
            i_g = jax.nn.sigmoid(gates[:, 0 * hp:1 * hp])
            f_g = jax.nn.sigmoid(gates[:, 1 * hp:2 * hp])
            g_g = jnp.tanh(gates[:, 2 * hp:3 * hp])
            o_g = jax.nn.sigmoid(gates[:, 3 * hp:4 * hp])
            c = f_g * c + i_g * g_g
            h = o_g * jnp.tanh(c)
            if collect:
                hs.append(h)
        return h, hs

    # ---------------- CVAE encoder (embedding folded into W_ih) -------------
    x = x_ref[...]                                            # (T*B_pad, D)
    enc_xp = (jnp.dot(x, w_enc_ref[...], preferred_element_type=f32)
              + b_enc_ref[...])                               # (T*B_pad, 4*hp)
    h_enc, _ = lstm(lambda t: enc_xp[t * batch_pad:(t + 1) * batch_pad, :],
                    w_enc_hh_ref, collect=False)

    # mu | logvar (and later the graph property) share one lane-dense slab.
    acc_misc = (jnp.dot(h_enc, w_misc_enc_ref[...], preferred_element_type=f32)
                + b_misc_ref[...])                            # (B_pad, 128)
    mu = acc_misc[:, 0:rep]
    logvar = acc_misc[:, rep:2 * rep]

    # ---------------- reparameterization ----------------
    z = mu + eps_ref[...] * jnp.exp(0.5 * logvar)             # (B_pad, rep)

    # ---------------- CVAE decoder (embedding folded, constant input) -------
    dec_xp = (jnp.dot(z, w_dec_z_ref[...], preferred_element_type=f32)
              + jnp.dot(cond_ref[...], w_dec_c_ref[...],
                        preferred_element_type=f32)
              + b_dec_ref[...])                               # (B_pad, 4*hp)
    _, dec_hs = lstm(lambda t: dec_xp, w_dec_hh_ref, collect=True)
    dec_h = jnp.concatenate(dec_hs, axis=0)                   # (T*B_pad, hp)

    # ------ 5 output heads: one packed-lane matmul + exact softmaxes --------
    logits = (jnp.dot(dec_h, w_heads_ref[...], preferred_element_type=f32)
              + b_heads_ref[...])                             # (T*B_pad, 128)
    probs_parts = []
    off = 0
    for sz in head_sizes:
        seg = logits[:, off:off + sz]
        m = jnp.max(seg, axis=-1, keepdims=True)
        e = jnp.exp(seg - m)
        probs_parts.append(e / jnp.sum(e, axis=-1, keepdims=True))  # exact
        off += sz
    probs_parts.append(jnp.zeros((seq * batch_pad, pack_width - off), f32))
    probs_packed = jnp.concatenate(probs_parts, axis=1)       # (T*B_pad, 128)
    probs_ref[...] = probs_packed                             # lane-dense store

    # ---------------- ReEncoder (concat + embedding folded into one matmul) -
    re_xp = (jnp.dot(probs_packed, w_re_in_ref[...], preferred_element_type=f32)
             + b_re_ref[...])                                 # (T*B_pad, 4*hp)
    h_re, _ = lstm(lambda t: re_xp[t * batch_pad:(t + 1) * batch_pad, :],
                   w_re_hh_ref, collect=False)

    # TODO(synk): the exact ReEncoder readout head (MLP depth / activation) is
    # not visible in the reference snippet; a single linear readout on the
    # last hidden state is used (its weight lives in column 2*rep of w_misc_re).
    misc_ref[...] = acc_misc + jnp.dot(h_re, w_misc_re_ref[...],
                                       preferred_element_type=f32)


# ----------------------------------------------------------------------------
# Parameter construction (deterministic, synthetic, PyTorch-shaped)
# ----------------------------------------------------------------------------
def _dense_params(key, in_dim, out_dim, scale=0.1):
    kw, kb = jax.random.split(key)
    w = scale * jax.random.normal(kw, (in_dim, out_dim), jnp.float32)
    b = scale * jax.random.normal(kb, (out_dim,), jnp.float32)
    return w, b


def _lstm_params(key, in_dim, hid, scale=0.1):
    k1, k2, k3 = jax.random.split(key, 3)
    w_ih = scale * jax.random.normal(k1, (in_dim, 4 * hid), jnp.float32)
    w_hh = scale * jax.random.normal(k2, (hid, 4 * hid), jnp.float32)
    bias = scale * jax.random.normal(k3, (4 * hid,), jnp.float32)  # b_ih + b_hh
    return w_ih, w_hh, bias


def init_params(key, cfg):
    keys = jax.random.split(key, 16)
    p = {}
    # CVAE encoder
    p["enc_emb"] = _dense_params(keys[0], cfg["dfs_size"], cfg["emb_size"])
    p["enc_lstm"] = _lstm_params(keys[1], cfg["emb_size"], cfg["en_hidden"])
    p["enc_mu"] = _dense_params(keys[2], cfg["en_hidden"], cfg["rep_size"])
    p["enc_sigma"] = _dense_params(keys[3], cfg["en_hidden"], cfg["rep_size"])
    # CVAE decoder
    dec_in = cfg["rep_size"] + cfg["condition_size"]
    p["dec_emb"] = _dense_params(keys[4], dec_in, cfg["emb_size"])
    p["dec_lstm"] = _lstm_params(keys[5], cfg["emb_size"], cfg["de_hidden"])
    p["head_tu"] = _dense_params(keys[6], cfg["de_hidden"], cfg["time_size"])
    p["head_tv"] = _dense_params(keys[7], cfg["de_hidden"], cfg["time_size"])
    p["head_lu"] = _dense_params(keys[8], cfg["de_hidden"], cfg["node_size"])
    p["head_lv"] = _dense_params(keys[9], cfg["de_hidden"], cfg["node_size"])
    p["head_le"] = _dense_params(keys[10], cfg["de_hidden"], cfg["edge_size"])
    # ReEncoder (input size = dfs_size - condition_size == dfs_size - 1)
    re_in = 2 * cfg["time_size"] + 2 * cfg["node_size"] + cfg["edge_size"]
    p["re_emb"] = _dense_params(keys[11], re_in, cfg["emb_size"])
    p["re_lstm"] = _lstm_params(keys[12], cfg["emb_size"], cfg["re_hidden"])
    p["re_out"] = _dense_params(keys[13], cfg["re_hidden"], 1)
    return p


# ----------------------------------------------------------------------------
# Weight packing: fold linear layers, pad gates to 128-lane segments,
# pack head / misc weights into lane-dense blocks.  Runs once, outside jit.
# ----------------------------------------------------------------------------
def pack_params(p, cfg):
    rep = cfg["rep_size"]
    he, hd, hr = cfg["en_hidden"], cfg["de_hidden"], cfg["re_hidden"]
    ts, ns, es = cfg["time_size"], cfg["node_size"], cfg["edge_size"]
    head_sizes = (ts, ts, ns, ns, es)
    tot = sum(head_sizes)
    assert max(he, hd, hr) <= _HP and tot <= _PACK and 2 * rep + 1 <= _PACK

    def gate_pad(w, h):
        """(..., 4*h) -> (..., 4*_HP): zero-pad each gate to its own 128 lanes."""
        chunks = [w[..., g * h:(g + 1) * h] for g in range(4)]
        pads = [(0, 0)] * (w.ndim - 1) + [(0, _HP - h)]
        return jnp.concatenate([jnp.pad(c, pads) for c in chunks], axis=-1)

    def pad_hh(w_hh, h):
        return gate_pad(jnp.pad(w_hh, ((0, _HP - h), (0, 0))), h)

    pk = {}
    # --- Encoder: fold embedding into the LSTM input projection (exact,
    # TODO(synk): assumes no activation between embedding and LSTM) ---
    w_emb, b_emb = p["enc_emb"]
    w_ih, w_hh, b_lstm = p["enc_lstm"]
    pk["w_enc"] = gate_pad(w_emb @ w_ih, he)                        # (D, 4HP)
    pk["b_enc"] = gate_pad((b_emb @ w_ih + b_lstm).reshape(1, -1), he)
    pk["w_enc_hh"] = pad_hh(w_hh, he)                               # (HP, 4HP)

    # --- mu | logvar | graph-property readout share one lane-dense slab ---
    w_mu, b_mu = p["enc_mu"]
    w_sg, b_sg = p["enc_sigma"]
    w_ro, b_ro = p["re_out"]
    pk["w_misc_enc"] = jnp.pad(jnp.concatenate([w_mu, w_sg], axis=1),
                               ((0, _HP - he), (0, _PACK - 2 * rep)))
    pk["b_misc"] = jnp.pad(jnp.concatenate([b_mu, b_sg, b_ro]),
                           (0, _PACK - (2 * rep + 1))).reshape(1, -1)
    pk["w_misc_re"] = jnp.pad(w_ro, ((0, _HP - hr),
                                     (2 * rep, _PACK - 2 * rep - 1)))

    # --- Decoder: split [z | condition] rows, fold embedding ---
    w_de, b_de = p["dec_emb"]
    w_ih, w_hh, b_lstm = p["dec_lstm"]
    pk["w_dec_z"] = gate_pad(w_de[:rep] @ w_ih, hd)
    pk["w_dec_c"] = gate_pad(w_de[rep:] @ w_ih, hd)
    pk["b_dec"] = gate_pad((b_de @ w_ih + b_lstm).reshape(1, -1), hd)
    pk["w_dec_hh"] = pad_hh(w_hh, hd)

    # --- 5 heads packed into ONE 128-lane block (lanes 0..25) ---
    ws = [p[k][0] for k in _HEAD_KEYS]
    bs = [p[k][1] for k in _HEAD_KEYS]
    pk["w_heads"] = jnp.pad(jnp.concatenate(ws, axis=1),
                            ((0, _HP - hd), (0, _PACK - tot)))      # (HP, 128)
    pk["b_heads"] = jnp.pad(jnp.concatenate(bs),
                            (0, _PACK - tot)).reshape(1, -1)

    # --- ReEncoder: embedding folded, rows padded to the packed-prob lanes ---
    w_re_emb, b_re_emb = p["re_emb"]
    w_ih, w_hh, b_lstm = p["re_lstm"]
    pk["w_re_in"] = jnp.pad(gate_pad(w_re_emb @ w_ih, hr),
                            ((0, _PACK - tot), (0, 0)))             # (128, 4HP)
    pk["b_re"] = gate_pad((b_re_emb @ w_ih + b_lstm).reshape(1, -1), hr)
    pk["w_re_hh"] = pad_hh(w_hh, hr)
    return pk


_PACKED_ORDER = ("w_enc", "b_enc", "w_enc_hh",
                 "w_misc_enc", "b_misc",
                 "w_dec_z", "w_dec_c", "b_dec", "w_dec_hh",
                 "w_heads", "b_heads",
                 "w_re_in", "b_re", "w_re_hh",
                 "w_misc_re")


# ----------------------------------------------------------------------------
# Forward pass (single fused pallas_call)
# ----------------------------------------------------------------------------
def cvae_with_re_encoder_forward(packed, x, eps, cfg):
    """x: (B, T, dfs_size) batch-first, matching the PyTorch input convention."""
    B, T, D = x.shape
    ts, ns, es = cfg["time_size"], cfg["node_size"], cfg["edge_size"]
    rep, cond_size = cfg["rep_size"], cfg["condition_size"]
    head_sizes = (ts, ts, ns, ns, es)

    # Pad the batch to a full sublane tile so every activation row-tile is full.
    b_pad = ((B + 7) // 8) * 8
    x_p = jnp.pad(x, ((0, b_pad - B), (0, 0), (0, 0)))
    eps_p = jnp.pad(eps, ((0, b_pad - B), (0, 0)))
    # Time-major flattened rows (row = t*b_pad + b): one lane-dense slab for the
    # hoisted whole-sequence input-projection matmul inside the kernel.
    x_tm = jnp.transpose(x_p, (1, 0, 2)).reshape(T * b_pad, D)
    # TODO(synk): the conditional label is assumed to be the last
    # `condition_size` features of the first timestep, as in the prior version.
    cond = x_p[:, 0, D - cond_size:]                          # (b_pad, cond)

    kernel = functools.partial(
        _fused_forward_kernel, seq=T, batch_pad=b_pad, hp=_HP, rep=rep,
        head_sizes=head_sizes, pack_width=_PACK)

    out_shape = (
        jax.ShapeDtypeStruct((b_pad, _PACK), jnp.float32),     # [mu|logvar|gp|0]
        jax.ShapeDtypeStruct((T * b_pad, _PACK), jnp.float32),  # packed probs
    )

    misc, probs_tm = pl.pallas_call(
        kernel,
        out_shape=out_shape,
        compiler_params=pltpu.CompilerParams(
            vmem_limit_bytes=32 * 1024 * 1024),
    )(x_tm, cond, eps_p, *[packed[k] for k in _PACKED_ORDER])

    mu = misc[:B, 0:rep]
    sigma = misc[:B, rep:2 * rep]          # log-variance, named sigma as in ref
    gp = misc[:B, 2 * rep:2 * rep + 1]

    probs = jnp.transpose(probs_tm.reshape(T, b_pad, _PACK), (1, 0, 2))[:B]
    heads, off = [], 0
    for sz in head_sizes:
        heads.append(probs[:, :, off:off + sz])
        off += sz
    tu, tv, lu, lv, le = heads
    return mu, sigma, tu, tv, lu, lv, le, gp


# ----------------------------------------------------------------------------
# Demo
# ----------------------------------------------------------------------------
if __name__ == "__main__":
    cfg = dict(
        time_size=6,
        node_size=5,
        edge_size=4,
        condition_size=1,
        emb_size=16,
        en_hidden=32,
        de_hidden=32,
        re_hidden=32,
        rep_size=8,
    )
    cfg["dfs_size"] = (2 * cfg["time_size"] + 2 * cfg["node_size"]
                       + cfg["edge_size"] + cfg["condition_size"])  # 27

    B, T = 2, 8
    key = jax.random.PRNGKey(0)
    k_param, k_x, k_eps = jax.random.split(key, 3)

    params = init_params(k_param, cfg)
    packed = pack_params(params, cfg)
    x = jax.random.normal(k_x, (B, T, cfg["dfs_size"]), jnp.float32)
    eps = jax.random.normal(k_eps, (B, cfg["rep_size"]), jnp.float32)

    fwd = jax.jit(functools.partial(cvae_with_re_encoder_forward, cfg=cfg))
    out = jax.block_until_ready(fwd(packed, x, eps))

    mu, sigma, tu, tv, lu, lv, le, gp = out
    assert mu.shape == (B, cfg["rep_size"])
    assert sigma.shape == (B, cfg["rep_size"])
    assert tu.shape == (B, T, cfg["time_size"])
    assert tv.shape == (B, T, cfg["time_size"])
    assert lu.shape == (B, T, cfg["node_size"])
    assert lv.shape == (B, T, cfg["node_size"])
    assert le.shape == (B, T, cfg["edge_size"])
    assert gp.shape == (B, 1)
    # softmax heads must be valid distributions over dim=2 (exact division).
    for dist in (tu, tv, lu, lv, le):
        assert bool(jnp.allclose(jnp.sum(dist, axis=2), 1.0, atol=1e-4))
        assert bool(jnp.all(dist >= 0.0))
    assert bool(jnp.all(jnp.isfinite(mu))) and bool(jnp.all(jnp.isfinite(sigma)))
    assert bool(jnp.all(jnp.isfinite(gp)))
    print("KERNEL_OK")
</pallas_src>

<mosaic_0001>
module attributes {stable_mosaic.version = 11 : i64} {
  func.func @_fused_forward_kernel(%arg0: memref<64x27xf32, #tpu.memory_space<vmem>>, %arg1: memref<8x1xf32, #tpu.memory_space<vmem>>, %arg2: memref<8x8xf32, #tpu.memory_space<vmem>>, %arg3: memref<27x512xf32, #tpu.memory_space<vmem>>, %arg4: memref<1x512xf32, #tpu.memory_space<vmem>>, %arg5: memref<128x512xf32, #tpu.memory_space<vmem>>, %arg6: memref<128x128xf32, #tpu.memory_space<vmem>>, %arg7: memref<1x128xf32, #tpu.memory_space<vmem>>, %arg8: memref<8x512xf32, #tpu.memory_space<vmem>>, %arg9: memref<1x512xf32, #tpu.memory_space<vmem>>, %arg10: memref<1x512xf32, #tpu.memory_space<vmem>>, %arg11: memref<128x512xf32, #tpu.memory_space<vmem>>, %arg12: memref<128x128xf32, #tpu.memory_space<vmem>>, %arg13: memref<1x128xf32, #tpu.memory_space<vmem>>, %arg14: memref<128x512xf32, #tpu.memory_space<vmem>>, %arg15: memref<1x512xf32, #tpu.memory_space<vmem>>, %arg16: memref<128x512xf32, #tpu.memory_space<vmem>>, %arg17: memref<128x128xf32, #tpu.memory_space<vmem>>, %arg18: memref<8x128xf32, #tpu.memory_space<vmem>>, %arg19: memref<64x128xf32, #tpu.memory_space<vmem>>) attributes {dimension_semantics = [], scalar_prefetch = 0 : i64, scratch_operands = 0 : i64, tpu.core_type = #tpu.core_type<tc>} {
    %c0 = arith.constant 0 : index
    %c0_0 = arith.constant 0 : index
    %0 = vector.load %arg0[%c0, %c0_0] : memref<64x27xf32, #tpu.memory_space<vmem>>, vector<64x27xf32>
    %c0_1 = arith.constant 0 : index
    %c0_2 = arith.constant 0 : index
    %1 = vector.load %arg3[%c0_1, %c0_2] : memref<27x512xf32, #tpu.memory_space<vmem>>, vector<27x512xf32>
    %cst = arith.constant dense<0.000000e+00> : vector<64x512xf32>
    %2 = tpu.matmul %0, %1, %cst {dimension_numbers = #tpu.dot_dimension_numbers<[1], [0], [0], [1], [0, 0, 1, 1], [], []>} : vector<64x27xf32>, vector<27x512xf32>, vector<64x512xf32> -> vector<64x512xf32>
    %c0_3 = arith.constant 0 : index
    %c0_4 = arith.constant 0 : index
    %3 = vector.load %arg4[%c0_3, %c0_4] : memref<1x512xf32, #tpu.memory_space<vmem>>, vector<1x512xf32>
    %4 = vector.broadcast %3 : vector<1x512xf32> to vector<64x512xf32>
    %5 = arith.addf %2, %4 : vector<64x512xf32>
    %c0_5 = arith.constant 0 : index
    %c0_6 = arith.constant 0 : index
    %6 = vector.load %arg5[%c0_5, %c0_6] : memref<128x512xf32, #tpu.memory_space<vmem>>, vector<128x512xf32>
    %cst_7 = arith.constant 0.000000e+00 : f32
    %7 = vector.broadcast %cst_7 : f32 to vector<8x128xf32>
    %cst_8 = arith.constant 0.000000e+00 : f32
    %8 = vector.broadcast %cst_8 : f32 to vector<8x128xf32>
    %9 = vector.extract_strided_slice %5 {offsets = [0, 0], sizes = [8, 512], strides = [1, 1]} : vector<64x512xf32> to vector<8x512xf32>
    %cst_9 = arith.constant dense<0.000000e+00> : vector<8x512xf32>
    %10 = tpu.matmul %7, %6, %cst_9 {dimension_numbers = #tpu.dot_dimension_numbers<[1], [0], [0], [1], [0, 0, 1, 1], [], []>} : vector<8x128xf32>, vector<128x512xf32>, vector<8x512xf32> -> vector<8x512xf32>
    %11 = arith.addf %9, %10 : vector<8x512xf32>
    %12 = vector.extract_strided_slice %11 {offsets = [0, 0], sizes = [8, 128], strides = [1, 1]} : vector<8x512xf32> to vector<8x128xf32>
    %13 = arith.negf %12 : vector<8x128xf32>
    %14 = math.exp %13 : vector<8x128xf32>
    %cst_10 = arith.constant 1.000000e+00 : f32
    %15 = vector.broadcast %cst_10 : f32 to vector<8x128xf32>
    %16 = arith.addf %15, %14 : vector<8x128xf32>
    %17 = arith.divf %15, %16 : vector<8x128xf32>
    %18 = vector.extract_strided_slice %11 {offsets = [0, 128], sizes = [8, 128], strides = [1, 1]} : vector<8x512xf32> to vector<8x128xf32>
    %19 = arith.negf %18 : vector<8x128xf32>
    %20 = math.exp %19 : vector<8x128xf32>
    %cst_11 = arith.constant 1.000000e+00 : f32
    %21 = vector.broadcast %cst_11 : f32 to vector<8x128xf32>
    %22 = arith.addf %21, %20 : vector<8x128xf32>
    %23 = arith.divf %21, %22 : vector<8x128xf32>
    %24 = vector.extract_strided_slice %11 {offsets = [0, 256], sizes = [8, 128], strides = [1, 1]} : vector<8x512xf32> to vector<8x128xf32>
    %25 = math.tanh %24 : vector<8x128xf32>
    %26 = vector.extract_strided_slice %11 {offsets = [0, 384], sizes = [8, 128], strides = [1, 1]} : vector<8x512xf32> to vector<8x128xf32>
    %27 = arith.negf %26 : vector<8x128xf32>
    %28 = math.exp %27 : vector<8x128xf32>
    %cst_12 = arith.constant 1.000000e+00 : f32
    %29 = vector.broadcast %cst_12 : f32 to vector<8x128xf32>
    %30 = arith.addf %29, %28 : vector<8x128xf32>
    %31 = arith.divf %29, %30 : vector<8x128xf32>
    %32 = arith.mulf %23, %8 : vector<8x128xf32>
    %33 = arith.mulf %17, %25 : vector<8x128xf32>
    %34 = arith.addf %32, %33 : vector<8x128xf32>
    %35 = math.tanh %34 : vector<8x128xf32>
    %36 = arith.mulf %31, %35 : vector<8x128xf32>
    %37 = vector.extract_strided_slice %5 {offsets = [8, 0], sizes = [8, 512], strides = [1, 1]} : vector<64x512xf32> to vector<8x512xf32>
    %cst_13 = arith.constant dense<0.000000e+00> : vector<8x512xf32>
    %38 = tpu.matmul %36, %6, %cst_13 {dimension_numbers = #tpu.dot_dimension_numbers<[1], [0], [0], [1], [0, 0, 1, 1], [], []>} : vector<8x128xf32>, vector<128x512xf32>, vector<8x512xf32> -> vector<8x512xf32>
    %39 = arith.addf %37, %38 : vector<8x512xf32>
    %40 = vector.extract_strided_slice %39 {offsets = [0, 0], sizes = [8, 128], strides = [1, 1]} : vector<8x512xf32> to vector<8x128xf32>
    %41 = arith.negf %40 : vector<8x128xf32>
    %42 = math.exp %41 : vector<8x128xf32>
    %cst_14 = arith.constant 1.000000e+00 : f32
    %43 = vector.broadcast %cst_14 : f32 to vector<8x128xf32>
    %44 = arith.addf %43, %42 : vector<8x128xf32>
    %45 = arith.divf %43, %44 : vector<8x128xf32>
    %46 = vector.extract_strided_slice %39 {offsets = [0, 128], sizes = [8, 128], strides = [1, 1]} : vector<8x512xf32> to vector<8x128xf32>
    %47 = arith.negf %46 : vector<8x128xf32>
    %48 = math.exp %47 : vector<8x128xf32>
    %cst_15 = arith.constant 1.000000e+00 : f32
    %49 = vector.broadcast %cst_15 : f32 to vector<8x128xf32>
    %50 = arith.addf %49, %48 : vector<8x128xf32>
    %51 = arith.divf %49, %50 : vector<8x128xf32>
    %52 = vector.extract_strided_slice %39 {offsets = [0, 256], sizes = [8, 128], strides = [1, 1]} : vector<8x512xf32> to vector<8x128xf32>
    %53 = math.tanh %52 : vector<8x128xf32>
    %54 = vector.extract_strided_slice %39 {offsets = [0, 384], sizes = [8, 128], strides = [1, 1]} : vector<8x512xf32> to vector<8x128xf32>
    %55 = arith.negf %54 : vector<8x128xf32>
    %56 = math.exp %55 : vector<8x128xf32>
    %cst_16 = arith.constant 1.000000e+00 : f32
    %57 = vector.broadcast %cst_16 : f32 to vector<8x128xf32>
    %58 = arith.addf %57, %56 : vector<8x128xf32>
    %59 = arith.divf %57, %58 : vector<8x128xf32>
    %60 = arith.mulf %51, %34 : vector<8x128xf32>
    %61 = arith.mulf %45, %53 : vector<8x128xf32>
    %62 = arith.addf %60, %61 : vector<8x128xf32>
    %63 = math.tanh %62 : vector<8x128xf32>
    %64 = arith.mulf %59, %63 : vector<8x128xf32>
    %65 = vector.extract_strided_slice %5 {offsets = [16, 0], sizes = [8, 512], strides = [1, 1]} : vector<64x512xf32> to vector<8x512xf32>
    %cst_17 = arith.constant dense<0.000000e+00> : vector<8x512xf32>
    %66 = tpu.matmul %64, %6, %cst_17 {dimension_numbers = #tpu.dot_dimension_numbers<[1], [0], [0], [1], [0, 0, 1, 1], [], []>} : vector<8x128xf32>, vector<128x512xf32>, vector<8x512xf32> -> vector<8x512xf32>
    %67 = arith.addf %65, %66 : vector<8x512xf32>
    %68 = vector.extract_strided_slice %67 {offsets = [0, 0], sizes = [8, 128], strides = [1, 1]} : vector<8x512xf32> to vector<8x128xf32>
    %69 = arith.negf %68 : vector<8x128xf32>
    %70 = math.exp %69 : vector<8x128xf32>
    %cst_18 = arith.constant 1.000000e+00 : f32
    %71 = vector.broadcast %cst_18 : f32 to vector<8x128xf32>
    %72 = arith.addf %71, %70 : vector<8x128xf32>
    %73 = arith.divf %71, %72 : vector<8x128xf32>
    %74 = vector.extract_strided_slice %67 {offsets = [0, 128], sizes = [8, 128], strides = [1, 1]} : vector<8x512xf32> to vector<8x128xf32>
    %75 = arith.negf %74 : vector<8x128xf32>
    %76 = math.exp %75 : vector<8x128xf32>
    %cst_19 = arith.constant 1.000000e+00 : f32
    %77 = vector.broadcast %cst_19 : f32 to vector<8x128xf32>
    %78 = arith.addf %77, %76 : vector<8x128xf32>
    %79 = arith.divf %77, %78 : vector<8x128xf32>
    %80 = vector.extract_strided_slice %67 {offsets = [0, 256], sizes = [8, 128], strides = [1, 1]} : vector<8x512xf32> to vector<8x128xf32>
    %81 = math.tanh %80 : vector<8x128xf32>
    %82 = vector.extract_strided_slice %67 {offsets = [0, 384], sizes = [8, 128], strides = [1, 1]} : vector<8x512xf32> to vector<8x128xf32>
    %83 = arith.negf %82 : vector<8x128xf32>
    %84 = math.exp %83 : vector<8x128xf32>
    %cst_20 = arith.constant 1.000000e+00 : f32
    %85 = vector.broadcast %cst_20 : f32 to vector<8x128xf32>
    %86 = arith.addf %85, %84 : vector<8x128xf32>
    %87 = arith.divf %85, %86 : vector<8x128xf32>
    %88 = arith.mulf %79, %62 : vector<8x128xf32>
    %89 = arith.mulf %73, %81 : vector<8x128xf32>
    %90 = arith.addf %88, %89 : vector<8x128xf32>
    %91 = math.tanh %90 : vector<8x128xf32>
    %92 = arith.mulf %87, %91 : vector<8x128xf32>
    %93 = vector.extract_strided_slice %5 {offsets = [24, 0], sizes = [8, 512], strides = [1, 1]} : vector<64x512xf32> to vector<8x512xf32>
    %cst_21 = arith.constant dense<0.000000e+00> : vector<8x512xf32>
    %94 = tpu.matmul %92, %6, %cst_21 {dimension_numbers = #tpu.dot_dimension_numbers<[1], [0], [0], [1], [0, 0, 1, 1], [], []>} : vector<8x128xf32>, vector<128x512xf32>, vector<8x512xf32> -> vector<8x512xf32>
    %95 = arith.addf %93, %94 : vector<8x512xf32>
    %96 = vector.extract_strided_slice %95 {offsets = [0, 0], sizes = [8, 128], strides = [1, 1]} : vector<8x512xf32> to vector<8x128xf32>
    %97 = arith.negf %96 : vector<8x128xf32>
    %98 = math.exp %97 : vector<8x128xf32>
    %cst_22 = arith.constant 1.000000e+00 : f32
    %99 = vector.broadcast %cst_22 : f32 to vector<8x128xf32>
    %100 = arith.addf %99, %98 : vector<8x128xf32>
    %101 = arith.divf %99, %100 : vector<8x128xf32>
    %102 = vector.extract_strided_slice %95 {offsets = [0, 128], sizes = [8, 128], strides = [1, 1]} : vector<8x512xf32> to vector<8x128xf32>
    %103 = arith.negf %102 : vector<8x128xf32>
    %104 = math.exp %103 : vector<8x128xf32>
    %cst_23 = arith.constant 1.000000e+00 : f32
    %105 = vector.broadcast %cst_23 : f32 to vector<8x128xf32>
    %106 = arith.addf %105, %104 : vector<8x128xf32>
    %107 = arith.divf %105, %106 : vector<8x128xf32>
    %108 = vector.extract_strided_slice %95 {offsets = [0, 256], sizes = [8, 128], strides = [1, 1]} : vector<8x512xf32> to vector<8x128xf32>
    %109 = math.tanh %108 : vector<8x128xf32>
    %110 = vector.extract_strided_slice %95 {offsets = [0, 384], sizes = [8, 128], strides = [1, 1]} : vector<8x512xf32> to vector<8x128xf32>
    %111 = arith.negf %110 : vector<8x128xf32>
    %112 = math.exp %111 : vector<8x128xf32>
    %cst_24 = arith.constant 1.000000e+00 : f32
    %113 = vector.broadcast %cst_24 : f32 to vector<8x128xf32>
    %114 = arith.addf %113, %112 : vector<8x128xf32>
    %115 = arith.divf %113, %114 : vector<8x128xf32>
    %116 = arith.mulf %107, %90 : vector<8x128xf32>
    %117 = arith.mulf %101, %109 : vector<8x128xf32>
    %118 = arith.addf %116, %117 : vector<8x128xf32>
    %119 = math.tanh %118 : vector<8x128xf32>
    %120 = arith.mulf %115, %119 : vector<8x128xf32>
    %121 = vector.extract_strided_slice %5 {offsets = [32, 0], sizes = [8, 512], strides = [1, 1]} : vector<64x512xf32> to vector<8x512xf32>
    %cst_25 = arith.constant dense<0.000000e+00> : vector<8x512xf32>
    %122 = tpu.matmul %120, %6, %cst_25 {dimension_numbers = #tpu.dot_dimension_numbers<[1], [0], [0], [1], [0, 0, 1, 1], [], []>} : vector<8x128xf32>, vector<128x512xf32>, vector<8x512xf32> -> vector<8x512xf32>
    %123 = arith.addf %121, %122 : vector<8x512xf32>
    %124 = vector.extract_strided_slice %123 {offsets = [0, 0], sizes = [8, 128], strides = [1, 1]} : vector<8x512xf32> to vector<8x128xf32>
    %125 = arith.negf %124 : vector<8x128xf32>
    %126 = math.exp %125 : vector<8x128xf32>
    %cst_26 = arith.constant 1.000000e+00 : f32
    %127 = vector.broadcast %cst_26 : f32 to vector<8x128xf32>
    %128 = arith.addf %127, %126 : vector<8x128xf32>
    %129 = arith.divf %127, %128 : vector<8x128xf32>
    %130 = vector.extract_strided_slice %123 {offsets = [0, 128], sizes = [8, 128], strides = [1, 1]} : vector<8x512xf32> to vector<8x128xf32>
    %131 = arith.negf %130 : vector<8x128xf32>
    %132 = math.exp %131 : vector<8x128xf32>
    %cst_27 = arith.constant 1.000000e+00 : f32
    %133 = vector.broadcast %cst_27 : f32 to vector<8x128xf32>
    %134 = arith.addf %133, %132 : vector<8x128xf32>
    %135 = arith.divf %133, %134 : vector<8x128xf32>
    %136 = vector.extract_strided_slice %123 {offsets = [0, 256], sizes = [8, 128], strides = [1, 1]} : vector<8x512xf32> to vector<8x128xf32>
    %137 = math.tanh %136 : vector<8x128xf32>
    %138 = vector.extract_strided_slice %123 {offsets = [0, 384], sizes = [8, 128], strides = [1, 1]} : vector<8x512xf32> to vector<8x128xf32>
    %139 = arith.negf %138 : vector<8x128xf32>
    %140 = math.exp %139 : vector<8x128xf32>
    %cst_28 = arith.constant 1.000000e+00 : f32
    %141 = vector.broadcast %cst_28 : f32 to vector<8x128xf32>
    %142 = arith.addf %141, %140 : vector<8x128xf32>
    %143 = arith.divf %141, %142 : vector<8x128xf32>
    %144 = arith.mulf %135, %118 : vector<8x128xf32>
    %145 = arith.mulf %129, %137 : vector<8x128xf32>
    %146 = arith.addf %144, %145 : vector<8x128xf32>
    %147 = math.tanh %146 : vector<8x128xf32>
    %148 = arith.mulf %143, %147 : vector<8x128xf32>
    %149 = vector.extract_strided_slice %5 {offsets = [40, 0], sizes = [8, 512], strides = [1, 1]} : vector<64x512xf32> to vector<8x512xf32>
    %cst_29 = arith.constant dense<0.000000e+00> : vector<8x512xf32>
    %150 = tpu.matmul %148, %6, %cst_29 {dimension_numbers = #tpu.dot_dimension_numbers<[1], [0], [0], [1], [0, 0, 1, 1], [], []>} : vector<8x128xf32>, vector<128x512xf32>, vector<8x512xf32> -> vector<8x512xf32>
    %151 = arith.addf %149, %150 : vector<8x512xf32>
    %152 = vector.extract_strided_slice %151 {offsets = [0, 0], sizes = [8, 128], strides = [1, 1]} : vector<8x512xf32> to vector<8x128xf32>
    %153 = arith.negf %152 : vector<8x128xf32>
    %154 = math.exp %153 : vector<8x128xf32>
    %cst_30 = arith.constant 1.000000e+00 : f32
    %155 = vector.broadcast %cst_30 : f32 to vector<8x128xf32>
    %156 = arith.addf %155, %154 : vector<8x128xf32>
    %157 = arith.divf %155, %156 : vector<8x128xf32>
    %158 = vector.extract_strided_slice %151 {offsets = [0, 128], sizes = [8, 128], strides = [1, 1]} : vector<8x512xf32> to vector<8x128xf32>
    %159 = arith.negf %158 : vector<8x128xf32>
    %160 = math.exp %159 : vector<8x128xf32>
    %cst_31 = arith.constant 1.000000e+00 : f32
    %161 = vector.broadcast %cst_31 : f32 to vector<8x128xf32>
    %162 = arith.addf %161, %160 : vector<8x128xf32>
    %163 = arith.divf %161, %162 : vector<8x128xf32>
    %164 = vector.extract_strided_slice %151 {offsets = [0, 256], sizes = [8, 128], strides = [1, 1]} : vector<8x512xf32> to vector<8x128xf32>
    %165 = math.tanh %164 : vector<8x128xf32>
    %166 = vector.extract_strided_slice %151 {offsets = [0, 384], sizes = [8, 128], strides = [1, 1]} : vector<8x512xf32> to vector<8x128xf32>
    %167 = arith.negf %166 : vector<8x128xf32>
    %168 = math.exp %167 : vector<8x128xf32>
    %cst_32 = arith.constant 1.000000e+00 : f32
    %169 = vector.broadcast %cst_32 : f32 to vector<8x128xf32>
    %170 = arith.addf %169, %168 : vector<8x128xf32>
    %171 = arith.divf %169, %170 : vector<8x128xf32>
    %172 = arith.mulf %163, %146 : vector<8x128xf32>
    %173 = arith.mulf %157, %165 : vector<8x128xf32>
    %174 = arith.addf %172, %173 : vector<8x128xf32>
    %175 = math.tanh %174 : vector<8x128xf32>
    %176 = arith.mulf %171, %175 : vector<8x128xf32>
    %177 = vector.extract_strided_slice %5 {offsets = [48, 0], sizes = [8, 512], strides = [1, 1]} : vector<64x512xf32> to vector<8x512xf32>
    %cst_33 = arith.constant dense<0.000000e+00> : vector<8x512xf32>
    %178 = tpu.matmul %176, %6, %cst_33 {dimension_numbers = #tpu.dot_dimension_numbers<[1], [0], [0], [1], [0, 0, 1, 1], [], []>} : vector<8x128xf32>, vector<128x512xf32>, vector<8x512xf32> -> vector<8x512xf32>
    %179 = arith.addf %177, %178 : vector<8x512xf32>
    %180 = vector.extract_strided_slice %179 {offsets = [0, 0], sizes = [8, 128], strides = [1, 1]} : vector<8x512xf32> to vector<8x128xf32>
    %181 = arith.negf %180 : vector<8x128xf32>
    %182 = math.exp %181 : vector<8x128xf32>
    %cst_34 = arith.constant 1.000000e+00 : f32
    %183 = vector.broadcast %cst_34 : f32 to vector<8x128xf32>
    %184 = arith.addf %183, %182 : vector<8x128xf32>
    %185 = arith.divf %183, %184 : vector<8x128xf32>
    %186 = vector.extract_strided_slice %179 {offsets = [0, 128], sizes = [8, 128], strides = [1, 1]} : vector<8x512xf32> to vector<8x128xf32>
    %187 = arith.negf %186 : vector<8x128xf32>
    %188 = math.exp %187 : vector<8x128xf32>
    %cst_35 = arith.constant 1.000000e+00 : f32
    %189 = vector.broadcast %cst_35 : f32 to vector<8x128xf32>
    %190 = arith.addf %189, %188 : vector<8x128xf32>
    %191 = arith.divf %189, %190 : vector<8x128xf32>
    %192 = vector.extract_strided_slice %179 {offsets = [0, 256], sizes = [8, 128], strides = [1, 1]} : vector<8x512xf32> to vector<8x128xf32>
    %193 = math.tanh %192 : vector<8x128xf32>
    %194 = vector.extract_strided_slice %179 {offsets = [0, 384], sizes = [8, 128], strides = [1, 1]} : vector<8x512xf32> to vector<8x128xf32>
    %195 = arith.negf %194 : vector<8x128xf32>
    %196 = math.exp %195 : vector<8x128xf32>
    %cst_36 = arith.constant 1.000000e+00 : f32
    %197 = vector.broadcast %cst_36 : f32 to vector<8x128xf32>
    %198 = arith.addf %197, %196 : vector<8x128xf32>
    %199 = arith.divf %197, %198 : vector<8x128xf32>
    %200 = arith.mulf %191, %174 : vector<8x128xf32>
    %201 = arith.mulf %185, %193 : vector<8x128xf32>
    %202 = arith.addf %200, %201 : vector<8x128xf32>
    %203 = math.tanh %202 : vector<8x128xf32>
    %204 = arith.mulf %199, %203 : vector<8x128xf32>
    %205 = vector.extract_strided_slice %5 {offsets = [56, 0], sizes = [8, 512], strides = [1, 1]} : vector<64x512xf32> to vector<8x512xf32>
    %cst_37 = arith.constant dense<0.000000e+00> : vector<8x512xf32>
    %206 = tpu.matmul %204, %6, %cst_37 {dimension_numbers = #tpu.dot_dimension_numbers<[1], [0], [0], [1], [0, 0, 1, 1], [], []>} : vector<8x128xf32>, vector<128x512xf32>, vector<8x512xf32> -> vector<8x512xf32>
    %207 = arith.addf %205, %206 : vector<8x512xf32>
    %208 = vector.extract_strided_slice %207 {offsets = [0, 0], sizes = [8, 128], strides = [1, 1]} : vector<8x512xf32> to vector<8x128xf32>
    %209 = arith.negf %208 : vector<8x128xf32>
    %210 = math.exp %209 : vector<8x128xf32>
    %cst_38 = arith.constant 1.000000e+00 : f32
    %211 = vector.broadcast %cst_38 : f32 to vector<8x128xf32>
    %212 = arith.addf %211, %210 : vector<8x128xf32>
    %213 = arith.divf %211, %212 : vector<8x128xf32>
    %214 = vector.extract_strided_slice %207 {offsets = [0, 128], sizes = [8, 128], strides = [1, 1]} : vector<8x512xf32> to vector<8x128xf32>
    %215 = arith.negf %214 : vector<8x128xf32>
    %216 = math.exp %215 : vector<8x128xf32>
    %cst_39 = arith.constant 1.000000e+00 : f32
    %217 = vector.broadcast %cst_39 : f32 to vector<8x128xf32>
    %218 = arith.addf %217, %216 : vector<8x128xf32>
    %219 = arith.divf %217, %218 : vector<8x128xf32>
    %220 = vector.extract_strided_slice %207 {offsets = [0, 256], sizes = [8, 128], strides = [1, 1]} : vector<8x512xf32> to vector<8x128xf32>
    %221 = math.tanh %220 : vector<8x128xf32>
    %222 = vector.extract_strided_slice %207 {offsets = [0, 384], sizes = [8, 128], strides = [1, 1]} : vector<8x512xf32> to vector<8x128xf32>
    %223 = arith.negf %222 : vector<8x128xf32>
    %224 = math.exp %223 : vector<8x128xf32>
    %cst_40 = arith.constant 1.000000e+00 : f32
    %225 = vector.broadcast %cst_40 : f32 to vector<8x128xf32>
    %226 = arith.addf %225, %224 : vector<8x128xf32>
    %227 = arith.divf %225, %226 : vector<8x128xf32>
    %228 = arith.mulf %219, %202 : vector<8x128xf32>
    %229 = arith.mulf %213, %221 : vector<8x128xf32>
    %230 = arith.addf %228, %229 : vector<8x128xf32>
    %231 = math.tanh %230 : vector<8x128xf32>
    %232 = arith.mulf %227, %231 : vector<8x128xf32>
    %c0_41 = arith.constant 0 : index
    %c0_42 = arith.constant 0 : index
    %233 = vector.load %arg6[%c0_41, %c0_42] : memref<128x128xf32, #tpu.memory_space<vmem>>, vector<128x128xf32>
    %cst_43 = arith.constant dense<0.000000e+00> : vector<8x128xf32>
    %234 = tpu.matmul %232, %233, %cst_43 {dimension_numbers = #tpu.dot_dimension_numbers<[1], [0], [0], [1], [0, 0, 1, 1], [], []>} : vector<8x128xf32>, vector<128x128xf32>, vector<8x128xf32> -> vector<8x128xf32>
    %c0_44 = arith.constant 0 : index
    %c0_45 = arith.constant 0 : index
    %235 = vector.load %arg7[%c0_44, %c0_45] : memref<1x128xf32, #tpu.memory_space<vmem>>, vector<1x128xf32>
    %236 = vector.broadcast %235 : vector<1x128xf32> to vector<8x128xf32>
    %237 = arith.addf %234, %236 : vector<8x128xf32>
    %238 = vector.extract_strided_slice %237 {offsets = [0, 0], sizes = [8, 8], strides = [1, 1]} : vector<8x128xf32> to vector<8x8xf32>
    %239 = vector.extract_strided_slice %237 {offsets = [0, 8], sizes = [8, 8], strides = [1, 1]} : vector<8x128xf32> to vector<8x8xf32>
    %c0_46 = arith.constant 0 : index
    %c0_47 = arith.constant 0 : index
    %240 = vector.load %arg2[%c0_46, %c0_47] : memref<8x8xf32, #tpu.memory_space<vmem>>, vector<8x8xf32>
    %cst_48 = arith.constant 5.000000e-01 : f32
    %241 = vector.broadcast %cst_48 : f32 to vector<8x8xf32>
    %242 = arith.mulf %241, %239 : vector<8x8xf32>
    %243 = math.exp %242 : vector<8x8xf32>
    %244 = arith.mulf %240, %243 : vector<8x8xf32>
    %245 = arith.addf %238, %244 : vector<8x8xf32>
    %c0_49 = arith.constant 0 : index
    %c0_50 = arith.constant 0 : index
    %246 = vector.load %arg8[%c0_49, %c0_50] : memref<8x512xf32, #tpu.memory_space<vmem>>, vector<8x512xf32>
    %cst_51 = arith.constant dense<0.000000e+00> : vector<8x512xf32>
    %247 = tpu.matmul %245, %246, %cst_51 {dimension_numbers = #tpu.dot_dimension_numbers<[1], [0], [0], [1], [0, 0, 1, 1], [], []>} : vector<8x8xf32>, vector<8x512xf32>, vector<8x512xf32> -> vector<8x512xf32>
    %c0_52 = arith.constant 0 : index
    %c0_53 = arith.constant 0 : index
    %248 = vector.load %arg1[%c0_52, %c0_53] : memref<8x1xf32, #tpu.memory_space<vmem>>, vector<8x1xf32>
    %c0_54 = arith.constant 0 : index
    %c0_55 = arith.constant 0 : index
    %249 = vector.load %arg9[%c0_54, %c0_55] : memref<1x512xf32, #tpu.memory_space<vmem>>, vector<1x512xf32>
    %cst_56 = arith.constant dense<0.000000e+00> : vector<8x512xf32>
    %250 = tpu.matmul %248, %249, %cst_56 {dimension_numbers = #tpu.dot_dimension_numbers<[1], [0], [0], [1], [0, 0, 1, 1], [], []>} : vector<8x1xf32>, vector<1x512xf32>, vector<8x512xf32> -> vector<8x512xf32>
    %251 = arith.addf %247, %250 : vector<8x512xf32>
    %c0_57 = arith.constant 0 : index
    %c0_58 = arith.constant 0 : index
    %252 = vector.load %arg10[%c0_57, %c0_58] : memref<1x512xf32, #tpu.memory_space<vmem>>, vector<1x512xf32>
    %253 = vector.broadcast %252 : vector<1x512xf32> to vector<8x512xf32>
    %254 = arith.addf %251, %253 : vector<8x512xf32>
    %c0_59 = arith.constant 0 : index
    %c0_60 = arith.constant 0 : index
    %255 = vector.load %arg11[%c0_59, %c0_60] : memref<128x512xf32, #tpu.memory_space<vmem>>, vector<128x512xf32>
    %cst_61 = arith.constant 0.000000e+00 : f32
    %256 = vector.broadcast %cst_61 : f32 to vector<8x128xf32>
    %cst_62 = arith.constant 0.000000e+00 : f32
    %257 = vector.broadcast %cst_62 : f32 to vector<8x128xf32>
    %cst_63 = arith.constant dense<0.000000e+00> : vector<8x512xf32>
    %258 = tpu.matmul %256, %255, %cst_63 {dimension_numbers = #tpu.dot_dimension_numbers<[1], [0], [0], [1], [0, 0, 1, 1], [], []>} : vector<8x128xf32>, vector<128x512xf32>, vector<8x512xf32> -> vector<8x512xf32>
    %259 = arith.addf %254, %258 : vector<8x512xf32>
    %260 = vector.extract_strided_slice %259 {offsets = [0, 0], sizes = [8, 128], strides = [1, 1]} : vector<8x512xf32> to vector<8x128xf32>
    %261 = arith.negf %260 : vector<8x128xf32>
    %262 = math.exp %261 : vector<8x128xf32>
    %cst_64 = arith.constant 1.000000e+00 : f32
    %263 = vector.broadcast %cst_64 : f32 to vector<8x128xf32>
    %264 = arith.addf %263, %262 : vector<8x128xf32>
    %265 = arith.divf %263, %264 : vector<8x128xf32>
    %266 = vector.extract_strided_slice %259 {offsets = [0, 128], sizes = [8, 128], strides = [1, 1]} : vector<8x512xf32> to vector<8x128xf32>
    %267 = arith.negf %266 : vector<8x128xf32>
    %268 = math.exp %267 : vector<8x128xf32>
    %cst_65 = arith.constant 1.000000e+00 : f32
    %269 = vector.broadcast %cst_65 : f32 to vector<8x128xf32>
    %270 = arith.addf %269, %268 : vector<8x128xf32>
    %271 = arith.divf %269, %270 : vector<8x128xf32>
    %272 = vector.extract_strided_slice %259 {offsets = [0, 256], sizes = [8, 128], strides = [1, 1]} : vector<8x512xf32> to vector<8x128xf32>
    %273 = math.tanh %272 : vector<8x128xf32>
    %274 = vector.extract_strided_slice %259 {offsets = [0, 384], sizes = [8, 128], strides = [1, 1]} : vector<8x512xf32> to vector<8x128xf32>
    %275 = arith.negf %274 : vector<8x128xf32>
    %276 = math.exp %275 : vector<8x128xf32>
    %cst_66 = arith.constant 1.000000e+00 : f32
    %277 = vector.broadcast %cst_66 : f32 to vector<8x128xf32>
    %278 = arith.addf %277, %276 : vector<8x128xf32>
    %279 = arith.divf %277, %278 : vector<8x128xf32>
    %280 = arith.mulf %271, %257 : vector<8x128xf32>
    %281 = arith.mulf %265, %273 : vector<8x128xf32>
    %282 = arith.addf %280, %281 : vector<8x128xf32>
    %283 = math.tanh %282 : vector<8x128xf32>
    %284 = arith.mulf %279, %283 : vector<8x128xf32>
    %cst_67 = arith.constant dense<0.000000e+00> : vector<8x512xf32>
    %285 = tpu.matmul %284, %255, %cst_67 {dimension_numbers = #tpu.dot_dimension_numbers<[1], [0], [0], [1], [0, 0, 1, 1], [], []>} : vector<8x128xf32>, vector<128x512xf32>, vector<8x512xf32> -> vector<8x512xf32>
    %286 = arith.addf %254, %285 : vector<8x512xf32>
    %287 = vector.extract_strided_slice %286 {offsets = [0, 0], sizes = [8, 128], strides = [1, 1]} : vector<8x512xf32> to vector<8x128xf32>
    %288 = arith.negf %287 : vector<8x128xf32>
    %289 = math.exp %288 : vector<8x128xf32>
    %cst_68 = arith.constant 1.000000e+00 : f32
    %290 = vector.broadcast %cst_68 : f32 to vector<8x128xf32>
    %291 = arith.addf %290, %289 : vector<8x128xf32>
    %292 = arith.divf %290, %291 : vector<8x128xf32>
    %293 = vector.extract_strided_slice %286 {offsets = [0, 128], sizes = [8, 128], strides = [1, 1]} : vector<8x512xf32> to vector<8x128xf32>
    %294 = arith.negf %293 : vector<8x128xf32>
    %295 = math.exp %294 : vector<8x128xf32>
    %cst_69 = arith.constant 1.000000e+00 : f32
    %296 = vector.broadcast %cst_69 : f32 to vector<8x128xf32>
    %297 = arith.addf %296, %295 : vector<8x128xf32>
    %298 = arith.divf %296, %297 : vector<8x128xf32>
    %299 = vector.extract_strided_slice %286 {offsets = [0, 256], sizes = [8, 128], strides = [1, 1]} : vector<8x512xf32> to vector<8x128xf32>
    %300 = math.tanh %299 : vector<8x128xf32>
    %301 = vector.extract_strided_slice %286 {offsets = [0, 384], sizes = [8, 128], strides = [1, 1]} : vector<8x512xf32> to vector<8x128xf32>
    %302 = arith.negf %301 : vector<8x128xf32>
    %303 = math.exp %302 : vector<8x128xf32>
    %cst_70 = arith.constant 1.000000e+00 : f32
    %304 = vector.broadcast %cst_70 : f32 to vector<8x128xf32>
    %305 = arith.addf %304, %303 : vector<8x128xf32>
    %306 = arith.divf %304, %305 : vector<8x128xf32>
    %307 = arith.mulf %298, %282 : vector<8x128xf32>
    %308 = arith.mulf %292, %300 : vector<8x128xf32>
    %309 = arith.addf %307, %308 : vector<8x128xf32>
    %310 = math.tanh %309 : vector<8x128xf32>
    %311 = arith.mulf %306, %310 : vector<8x128xf32>
    %cst_71 = arith.constant dense<0.000000e+00> : vector<8x512xf32>
    %312 = tpu.matmul %311, %255, %cst_71 {dimension_numbers = #tpu.dot_dimension_numbers<[1], [0], [0], [1], [0, 0, 1, 1], [], []>} : vector<8x128xf32>, vector<128x512xf32>, vector<8x512xf32> -> vector<8x512xf32>
    %313 = arith.addf %254, %312 : vector<8x512xf32>
    %314 = vector.extract_strided_slice %313 {offsets = [0, 0], sizes = [8, 128], strides = [1, 1]} : vector<8x512xf32> to vector<8x128xf32>
    %315 = arith.negf %314 : vector<8x128xf32>
    %316 = math.exp %315 : vector<8x128xf32>
    %cst_72 = arith.constant 1.000000e+00 : f32
    %317 = vector.broadcast %cst_72 : f32 to vector<8x128xf32>
    %318 = arith.addf %317, %316 : vector<8x128xf32>
    %319 = arith.divf %317, %318 : vector<8x128xf32>
    %320 = vector.extract_strided_slice %313 {offsets = [0, 128], sizes = [8, 128], strides = [1, 1]} : vector<8x512xf32> to vector<8x128xf32>
    %321 = arith.negf %320 : vector<8x128xf32>
    %322 = math.exp %321 : vector<8x128xf32>
    %cst_73 = arith.constant 1.000000e+00 : f32
    %323 = vector.broadcast %cst_73 : f32 to vector<8x128xf32>
    %324 = arith.addf %323, %322 : vector<8x128xf32>
    %325 = arith.divf %323, %324 : vector<8x128xf32>
    %326 = vector.extract_strided_slice %313 {offsets = [0, 256], sizes = [8, 128], strides = [1, 1]} : vector<8x512xf32> to vector<8x128xf32>
    %327 = math.tanh %326 : vector<8x128xf32>
    %328 = vector.extract_strided_slice %313 {offsets = [0, 384], sizes = [8, 128], strides = [1, 1]} : vector<8x512xf32> to vector<8x128xf32>
    %329 = arith.negf %328 : vector<8x128xf32>
    %330 = math.exp %329 : vector<8x128xf32>
    %cst_74 = arith.constant 1.000000e+00 : f32
    %331 = vector.broadcast %cst_74 : f32 to vector<8x128xf32>
    %332 = arith.addf %331, %330 : vector<8x128xf32>
    %333 = arith.divf %331, %332 : vector<8x128xf32>
    %334 = arith.mulf %325, %309 : vector<8x128xf32>
    %335 = arith.mulf %319, %327 : vector<8x128xf32>
    %336 = arith.addf %334, %335 : vector<8x128xf32>
    %337 = math.tanh %336 : vector<8x128xf32>
    %338 = arith.mulf %333, %337 : vector<8x128xf32>
    %cst_75 = arith.constant dense<0.000000e+00> : vector<8x512xf32>
    %339 = tpu.matmul %338, %255, %cst_75 {dimension_numbers = #tpu.dot_dimension_numbers<[1], [0], [0], [1], [0, 0, 1, 1], [], []>} : vector<8x128xf32>, vector<128x512xf32>, vector<8x512xf32> -> vector<8x512xf32>
    %340 = arith.addf %254, %339 : vector<8x512xf32>
    %341 = vector.extract_strided_slice %340 {offsets = [0, 0], sizes = [8, 128], strides = [1, 1]} : vector<8x512xf32> to vector<8x128xf32>
    %342 = arith.negf %341 : vector<8x128xf32>
    %343 = math.exp %342 : vector<8x128xf32>
    %cst_76 = arith.constant 1.000000e+00 : f32
    %344 = vector.broadcast %cst_76 : f32 to vector<8x128xf32>
    %345 = arith.addf %344, %343 : vector<8x128xf32>
    %346 = arith.divf %344, %345 : vector<8x128xf32>
    %347 = vector.extract_strided_slice %340 {offsets = [0, 128], sizes = [8, 128], strides = [1, 1]} : vector<8x512xf32> to vector<8x128xf32>
    %348 = arith.negf %347 : vector<8x128xf32>
    %349 = math.exp %348 : vector<8x128xf32>
    %cst_77 = arith.constant 1.000000e+00 : f32
    %350 = vector.broadcast %cst_77 : f32 to vector<8x128xf32>
    %351 = arith.addf %350, %349 : vector<8x128xf32>
    %352 = arith.divf %350, %351 : vector<8x128xf32>
    %353 = vector.extract_strided_slice %340 {offsets = [0, 256], sizes = [8, 128], strides = [1, 1]} : vector<8x512xf32> to vector<8x128xf32>
    %354 = math.tanh %353 : vector<8x128xf32>
    %355 = vector.extract_strided_slice %340 {offsets = [0, 384], sizes = [8, 128], strides = [1, 1]} : vector<8x512xf32> to vector<8x128xf32>
    %356 = arith.negf %355 : vector<8x128xf32>
    %357 = math.exp %356 : vector<8x128xf32>
    %cst_78 = arith.constant 1.000000e+00 : f32
    %358 = vector.broadcast %cst_78 : f32 to vector<8x128xf32>
    %359 = arith.addf %358, %357 : vector<8x128xf32>
    %360 = arith.divf %358, %359 : vector<8x128xf32>
    %361 = arith.mulf %352, %336 : vector<8x128xf32>
    %362 = arith.mulf %346, %354 : vector<8x128xf32>
    %363 = arith.addf %361, %362 : vector<8x128xf32>
    %364 = math.tanh %363 : vector<8x128xf32>
    %365 = arith.mulf %360, %364 : vector<8x128xf32>
    %cst_79 = arith.constant dense<0.000000e+00> : vector<8x512xf32>
    %366 = tpu.matmul %365, %255, %cst_79 {dimension_numbers = #tpu.dot_dimension_numbers<[1], [0], [0], [1], [0, 0, 1, 1], [], []>} : vector<8x128xf32>, vector<128x512xf32>, vector<8x512xf32> -> vector<8x512xf32>
    %367 = arith.addf %254, %366 : vector<8x512xf32>
    %368 = vector.extract_strided_slice %367 {offsets = [0, 0], sizes = [8, 128], strides = [1, 1]} : vector<8x512xf32> to vector<8x128xf32>
    %369 = arith.negf %368 : vector<8x128xf32>
    %370 = math.exp %369 : vector<8x128xf32>
    %cst_80 = arith.constant 1.000000e+00 : f32
    %371 = vector.broadcast %cst_80 : f32 to vector<8x128xf32>
    %372 = arith.addf %371, %370 : vector<8x128xf32>
    %373 = arith.divf %371, %372 : vector<8x128xf32>
    %374 = vector.extract_strided_slice %367 {offsets = [0, 128], sizes = [8, 128], strides = [1, 1]} : vector<8x512xf32> to vector<8x128xf32>
    %375 = arith.negf %374 : vector<8x128xf32>
    %376 = math.exp %375 : vector<8x128xf32>
    %cst_81 = arith.constant 1.000000e+00 : f32
    %377 = vector.broadcast %cst_81 : f32 to vector<8x128xf32>
    %378 = arith.addf %377, %376 : vector<8x128xf32>
    %379 = arith.divf %377, %378 : vector<8x128xf32>
    %380 = vector.extract_strided_slice %367 {offsets = [0, 256], sizes = [8, 128], strides = [1, 1]} : vector<8x512xf32> to vector<8x128xf32>
    %381 = math.tanh %380 : vector<8x128xf32>
    %382 = vector.extract_strided_slice %367 {offsets = [0, 384], sizes = [8, 128], strides = [1, 1]} : vector<8x512xf32> to vector<8x128xf32>
    %383 = arith.negf %382 : vector<8x128xf32>
    %384 = math.exp %383 : vector<8x128xf32>
    %cst_82 = arith.constant 1.000000e+00 : f32
    %385 = vector.broadcast %cst_82 : f32 to vector<8x128xf32>
    %386 = arith.addf %385, %384 : vector<8x128xf32>
    %387 = arith.divf %385, %386 : vector<8x128xf32>
    %388 = arith.mulf %379, %363 : vector<8x128xf32>
    %389 = arith.mulf %373, %381 : vector<8x128xf32>
    %390 = arith.addf %388, %389 : vector<8x128xf32>
    %391 = math.tanh %390 : vector<8x128xf32>
    %392 = arith.mulf %387, %391 : vector<8x128xf32>
    %cst_83 = arith.constant dense<0.000000e+00> : vector<8x512xf32>
    %393 = tpu.matmul %392, %255, %cst_83 {dimension_numbers = #tpu.dot_dimension_numbers<[1], [0], [0], [1], [0, 0, 1, 1], [], []>} : vector<8x128xf32>, vector<128x512xf32>, vector<8x512xf32> -> vector<8x512xf32>
    %394 = arith.addf %254, %393 : vector<8x512xf32>
    %395 = vector.extract_strided_slice %394 {offsets = [0, 0], sizes = [8, 128], strides = [1, 1]} : vector<8x512xf32> to vector<8x128xf32>
    %396 = arith.negf %395 : vector<8x128xf32>
    %397 = math.exp %396 : vector<8x128xf32>
    %cst_84 = arith.constant 1.000000e+00 : f32
    %398 = vector.broadcast %cst_84 : f32 to vector<8x128xf32>
    %399 = arith.addf %398, %397 : vector<8x128xf32>
    %400 = arith.divf %398, %399 : vector<8x128xf32>
    %401 = vector.extract_strided_slice %394 {offsets = [0, 128], sizes = [8, 128], strides = [1, 1]} : vector<8x512xf32> to vector<8x128xf32>
    %402 = arith.negf %401 : vector<8x128xf32>
    %403 = math.exp %402 : vector<8x128xf32>
    %cst_85 = arith.constant 1.000000e+00 : f32
    %404 = vector.broadcast %cst_85 : f32 to vector<8x128xf32>
    %405 = arith.addf %404, %403 : vector<8x128xf32>
    %406 = arith.divf %404, %405 : vector<8x128xf32>
    %407 = vector.extract_strided_slice %394 {offsets = [0, 256], sizes = [8, 128], strides = [1, 1]} : vector<8x512xf32> to vector<8x128xf32>
    %408 = math.tanh %407 : vector<8x128xf32>
    %409 = vector.extract_strided_slice %394 {offsets = [0, 384], sizes = [8, 128], strides = [1, 1]} : vector<8x512xf32> to vector<8x128xf32>
    %410 = arith.negf %409 : vector<8x128xf32>
    %411 = math.exp %410 : vector<8x128xf32>
    %cst_86 = arith.constant 1.000000e+00 : f32
    %412 = vector.broadcast %cst_86 : f32 to vector<8x128xf32>
    %413 = arith.addf %412, %411 : vector<8x128xf32>
    %414 = arith.divf %412, %413 : vector<8x128xf32>
    %415 = arith.mulf %406, %390 : vector<8x128xf32>
    %416 = arith.mulf %400, %408 : vector<8x128xf32>
    %417 = arith.addf %415, %416 : vector<8x128xf32>
    %418 = math.tanh %417 : vector<8x128xf32>
    %419 = arith.mulf %414, %418 : vector<8x128xf32>
    %cst_87 = arith.constant dense<0.000000e+00> : vector<8x512xf32>
    %420 = tpu.matmul %419, %255, %cst_87 {dimension_numbers = #tpu.dot_dimension_numbers<[1], [0], [0], [1], [0, 0, 1, 1], [], []>} : vector<8x128xf32>, vector<128x512xf32>, vector<8x512xf32> -> vector<8x512xf32>
    %421 = arith.addf %254, %420 : vector<8x512xf32>
    %422 = vector.extract_strided_slice %421 {offsets = [0, 0], sizes = [8, 128], strides = [1, 1]} : vector<8x512xf32> to vector<8x128xf32>
    %423 = arith.negf %422 : vector<8x128xf32>
    %424 = math.exp %423 : vector<8x128xf32>
    %cst_88 = arith.constant 1.000000e+00 : f32
    %425 = vector.broadcast %cst_88 : f32 to vector<8x128xf32>
    %426 = arith.addf %425, %424 : vector<8x128xf32>
    %427 = arith.divf %425, %426 : vector<8x128xf32>
    %428 = vector.extract_strided_slice %421 {offsets = [0, 128], sizes = [8, 128], strides = [1, 1]} : vector<8x512xf32> to vector<8x128xf32>
    %429 = arith.negf %428 : vector<8x128xf32>
    %430 = math.exp %429 : vector<8x128xf32>
    %cst_89 = arith.constant 1.000000e+00 : f32
    %431 = vector.broadcast %cst_89 : f32 to vector<8x128xf32>
    %432 = arith.addf %431, %430 : vector<8x128xf32>
    %433 = arith.divf %431, %432 : vector<8x128xf32>
    %434 = vector.extract_strided_slice %421 {offsets = [0, 256], sizes = [8, 128], strides = [1, 1]} : vector<8x512xf32> to vector<8x128xf32>
    %435 = math.tanh %434 : vector<8x128xf32>
    %436 = vector.extract_strided_slice %421 {offsets = [0, 384], sizes = [8, 128], strides = [1, 1]} : vector<8x512xf32> to vector<8x128xf32>
    %437 = arith.negf %436 : vector<8x128xf32>
    %438 = math.exp %437 : vector<8x128xf32>
    %cst_90 = arith.constant 1.000000e+00 : f32
    %439 = vector.broadcast %cst_90 : f32 to vector<8x128xf32>
    %440 = arith.addf %439, %438 : vector<8x128xf32>
    %441 = arith.divf %439, %440 : vector<8x128xf32>
    %442 = arith.mulf %433, %417 : vector<8x128xf32>
    %443 = arith.mulf %427, %435 : vector<8x128xf32>
    %444 = arith.addf %442, %443 : vector<8x128xf32>
    %445 = math.tanh %444 : vector<8x128xf32>
    %446 = arith.mulf %441, %445 : vector<8x128xf32>
    %cst_91 = arith.constant dense<0.000000e+00> : vector<8x512xf32>
    %447 = tpu.matmul %446, %255, %cst_91 {dimension_numbers = #tpu.dot_dimension_numbers<[1], [0], [0], [1], [0, 0, 1, 1], [], []>} : vector<8x128xf32>, vector<128x512xf32>, vector<8x512xf32> -> vector<8x512xf32>
    %448 = arith.addf %254, %447 : vector<8x512xf32>
    %449 = vector.extract_strided_slice %448 {offsets = [0, 0], sizes = [8, 128], strides = [1, 1]} : vector<8x512xf32> to vector<8x128xf32>
    %450 = arith.negf %449 : vector<8x128xf32>
    %451 = math.exp %450 : vector<8x128xf32>
    %cst_92 = arith.constant 1.000000e+00 : f32
    %452 = vector.broadcast %cst_92 : f32 to vector<8x128xf32>
    %453 = arith.addf %452, %451 : vector<8x128xf32>
    %454 = arith.divf %452, %453 : vector<8x128xf32>
    %455 = vector.extract_strided_slice %448 {offsets = [0, 128], sizes = [8, 128], strides = [1, 1]} : vector<8x512xf32> to vector<8x128xf32>
    %456 = arith.negf %455 : vector<8x128xf32>
    %457 = math.exp %456 : vector<8x128xf32>
    %cst_93 = arith.constant 1.000000e+00 : f32
    %458 = vector.broadcast %cst_93 : f32 to vector<8x128xf32>
    %459 = arith.addf %458, %457 : vector<8x128xf32>
    %460 = arith.divf %458, %459 : vector<8x128xf32>
    %461 = vector.extract_strided_slice %448 {offsets = [0, 256], sizes = [8, 128], strides = [1, 1]} : vector<8x512xf32> to vector<8x128xf32>
    %462 = math.tanh %461 : vector<8x128xf32>
    %463 = vector.extract_strided_slice %448 {offsets = [0, 384], sizes = [8, 128], strides = [1, 1]} : vector<8x512xf32> to vector<8x128xf32>
    %464 = arith.negf %463 : vector<8x128xf32>
    %465 = math.exp %464 : vector<8x128xf32>
    %cst_94 = arith.constant 1.000000e+00 : f32
    %466 = vector.broadcast %cst_94 : f32 to vector<8x128xf32>
    %467 = arith.addf %466, %465 : vector<8x128xf32>
    %468 = arith.divf %466, %467 : vector<8x128xf32>
    %469 = arith.mulf %460, %444 : vector<8x128xf32>
    %470 = arith.mulf %454, %462 : vector<8x128xf32>
    %471 = arith.addf %469, %470 : vector<8x128xf32>
    %472 = math.tanh %471 : vector<8x128xf32>
    %473 = arith.mulf %468, %472 : vector<8x128xf32>
    %474 = tpu.concatenate %284, %311, %338, %365, %392, %419, %446, %473 in 0 : vector<8x128xf32>, vector<8x128xf32>, vector<8x128xf32>, vector<8x128xf32>, vector<8x128xf32>, vector<8x128xf32>, vector<8x128xf32>, vector<8x128xf32> -> vector<64x128xf32>
    %c0_95 = arith.constant 0 : index
    %c0_96 = arith.constant 0 : index
    %475 = vector.load %arg12[%c0_95, %c0_96] : memref<128x128xf32, #tpu.memory_space<vmem>>, vector<128x128xf32>
    %cst_97 = arith.constant dense<0.000000e+00> : vector<64x128xf32>
    %476 = tpu.matmul %474, %475, %cst_97 {dimension_numbers = #tpu.dot_dimension_numbers<[1], [0], [0], [1], [0, 0, 1, 1], [], []>} : vector<64x128xf32>, vector<128x128xf32>, vector<64x128xf32> -> vector<64x128xf32>
    %c0_98 = arith.constant 0 : index
    %c0_99 = arith.constant 0 : index
    %477 = vector.load %arg13[%c0_98, %c0_99] : memref<1x128xf32, #tpu.memory_space<vmem>>, vector<1x128xf32>
    %478 = vector.broadcast %477 : vector<1x128xf32> to vector<64x128xf32>
    %479 = arith.addf %476, %478 : vector<64x128xf32>
    %480 = vector.extract_strided_slice %479 {offsets = [0, 0], sizes = [64, 6], strides = [1, 1]} : vector<64x128xf32> to vector<64x6xf32>
    %cst_100 = arith.constant dense<0xFF800000> : vector<64xf32>
    %481 = vector.multi_reduction <maximumf>, %480, %cst_100 [1] : vector<64x6xf32> to vector<64xf32>
    %482 = vector.shape_cast %481 : vector<64xf32> to vector<64x1xf32>
    %483 = vector.broadcast %482 : vector<64x1xf32> to vector<64x6xf32>
    %484 = arith.subf %480, %483 : vector<64x6xf32>
    %485 = math.exp %484 : vector<64x6xf32>
    %cst_101 = arith.constant dense<0.000000e+00> : vector<64xf32>
    %486 = vector.multi_reduction <add>, %485, %cst_101 [1] : vector<64x6xf32> to vector<64xf32>
    %487 = vector.shape_cast %486 : vector<64xf32> to vector<64x1xf32>
    %488 = vector.broadcast %487 : vector<64x1xf32> to vector<64x6xf32>
    %489 = arith.divf %485, %488 : vector<64x6xf32>
    %490 = vector.extract_strided_slice %479 {offsets = [0, 6], sizes = [64, 6], strides = [1, 1]} : vector<64x128xf32> to vector<64x6xf32>
    %cst_102 = arith.constant dense<0xFF800000> : vector<64xf32>
    %491 = vector.multi_reduction <maximumf>, %490, %cst_102 [1] : vector<64x6xf32> to vector<64xf32>
    %492 = vector.shape_cast %491 : vector<64xf32> to vector<64x1xf32>
    %493 = vector.broadcast %492 : vector<64x1xf32> to vector<64x6xf32>
    %494 = arith.subf %490, %493 : vector<64x6xf32>
    %495 = math.exp %494 : vector<64x6xf32>
    %cst_103 = arith.constant dense<0.000000e+00> : vector<64xf32>
    %496 = vector.multi_reduction <add>, %495, %cst_103 [1] : vector<64x6xf32> to vector<64xf32>
    %497 = vector.shape_cast %496 : vector<64xf32> to vector<64x1xf32>
    %498 = vector.broadcast %497 : vector<64x1xf32> to vector<64x6xf32>
    %499 = arith.divf %495, %498 : vector<64x6xf32>
    %500 = vector.extract_strided_slice %479 {offsets = [0, 12], sizes = [64, 5], strides = [1, 1]} : vector<64x128xf32> to vector<64x5xf32>
    %cst_104 = arith.constant dense<0xFF800000> : vector<64xf32>
    %501 = vector.multi_reduction <maximumf>, %500, %cst_104 [1] : vector<64x5xf32> to vector<64xf32>
    %502 = vector.shape_cast %501 : vector<64xf32> to vector<64x1xf32>
    %503 = vector.broadcast %502 : vector<64x1xf32> to vector<64x5xf32>
    %504 = arith.subf %500, %503 : vector<64x5xf32>
    %505 = math.exp %504 : vector<64x5xf32>
    %cst_105 = arith.constant dense<0.000000e+00> : vector<64xf32>
    %506 = vector.multi_reduction <add>, %505, %cst_105 [1] : vector<64x5xf32> to vector<64xf32>
    %507 = vector.shape_cast %506 : vector<64xf32> to vector<64x1xf32>
    %508 = vector.broadcast %507 : vector<64x1xf32> to vector<64x5xf32>
    %509 = arith.divf %505, %508 : vector<64x5xf32>
    %510 = vector.extract_strided_slice %479 {offsets = [0, 17], sizes = [64, 5], strides = [1, 1]} : vector<64x128xf32> to vector<64x5xf32>
    %cst_106 = arith.constant dense<0xFF800000> : vector<64xf32>
    %511 = vector.multi_reduction <maximumf>, %510, %cst_106 [1] : vector<64x5xf32> to vector<64xf32>
    %512 = vector.shape_cast %511 : vector<64xf32> to vector<64x1xf32>
    %513 = vector.broadcast %512 : vector<64x1xf32> to vector<64x5xf32>
    %514 = arith.subf %510, %513 : vector<64x5xf32>
    %515 = math.exp %514 : vector<64x5xf32>
    %cst_107 = arith.constant dense<0.000000e+00> : vector<64xf32>
    %516 = vector.multi_reduction <add>, %515, %cst_107 [1] : vector<64x5xf32> to vector<64xf32>
    %517 = vector.shape_cast %516 : vector<64xf32> to vector<64x1xf32>
    %518 = vector.broadcast %517 : vector<64x1xf32> to vector<64x5xf32>
    %519 = arith.divf %515, %518 : vector<64x5xf32>
    %520 = vector.extract_strided_slice %479 {offsets = [0, 22], sizes = [64, 4], strides = [1, 1]} : vector<64x128xf32> to vector<64x4xf32>
    %cst_108 = arith.constant dense<0xFF800000> : vector<64xf32>
    %521 = vector.multi_reduction <maximumf>, %520, %cst_108 [1] : vector<64x4xf32> to vector<64xf32>
    %522 = vector.shape_cast %521 : vector<64xf32> to vector<64x1xf32>
    %523 = vector.broadcast %522 : vector<64x1xf32> to vector<64x4xf32>
    %524 = arith.subf %520, %523 : vector<64x4xf32>
    %525 = math.exp %524 : vector<64x4xf32>
    %cst_109 = arith.constant dense<0.000000e+00> : vector<64xf32>
    %526 = vector.multi_reduction <add>, %525, %cst_109 [1] : vector<64x4xf32> to vector<64xf32>
    %527 = vector.shape_cast %526 : vector<64xf32> to vector<64x1xf32>
    %528 = vector.broadcast %527 : vector<64x1xf32> to vector<64x4xf32>
    %529 = arith.divf %525, %528 : vector<64x4xf32>
    %cst_110 = arith.constant 0.000000e+00 : f32
    %530 = vector.broadcast %cst_110 : f32 to vector<64x102xf32>
    %531 = tpu.concatenate %489, %499, %509, %519, %529, %530 in 1 : vector<64x6xf32>, vector<64x6xf32>, vector<64x5xf32>, vector<64x5xf32>, vector<64x4xf32>, vector<64x102xf32> -> vector<64x128xf32>
    %c0_111 = arith.constant 0 : index
    %c0_112 = arith.constant 0 : index
    %532 = vector.load %arg19[%c0_111, %c0_112] : memref<64x128xf32, #tpu.memory_space<vmem>>, vector<64x128xf32>
    tpu.vector_store %arg19[%c0_111, %c0_112], %531 {strides = array<i32>} : memref<64x128xf32, #tpu.memory_space<vmem>>, vector<64x128xf32>,
    %c0_113 = arith.constant 0 : index
    %c0_114 = arith.constant 0 : index
    %533 = vector.load %arg14[%c0_113, %c0_114] : memref<128x512xf32, #tpu.memory_space<vmem>>, vector<128x512xf32>
    %cst_115 = arith.constant dense<0.000000e+00> : vector<64x512xf32>
    %534 = tpu.matmul %531, %533, %cst_115 {dimension_numbers = #tpu.dot_dimension_numbers<[1], [0], [0], [1], [0, 0, 1, 1], [], []>} : vector<64x128xf32>, vector<128x512xf32>, vector<64x512xf32> -> vector<64x512xf32>
    %c0_116 = arith.constant 0 : index
    %c0_117 = arith.constant 0 : index
    %535 = vector.load %arg15[%c0_116, %c0_117] : memref<1x512xf32, #tpu.memory_space<vmem>>, vector<1x512xf32>
    %536 = vector.broadcast %535 : vector<1x512xf32> to vector<64x512xf32>
    %537 = arith.addf %534, %536 : vector<64x512xf32>
    %c0_118 = arith.constant 0 : index
    %c0_119 = arith.constant 0 : index
    %538 = vector.load %arg16[%c0_118, %c0_119] : memref<128x512xf32, #tpu.memory_space<vmem>>, vector<128x512xf32>
    %cst_120 = arith.constant 0.000000e+00 : f32
    %539 = vector.broadcast %cst_120 : f32 to vector<8x128xf32>
    %cst_121 = arith.constant 0.000000e+00 : f32
    %540 = vector.broadcast %cst_121 : f32 to vector<8x128xf32>
    %541 = vector.extract_strided_slice %537 {offsets = [0, 0], sizes = [8, 512], strides = [1, 1]} : vector<64x512xf32> to vector<8x512xf32>
    %cst_122 = arith.constant dense<0.000000e+00> : vector<8x512xf32>
    %542 = tpu.matmul %539, %538, %cst_122 {dimension_numbers = #tpu.dot_dimension_numbers<[1], [0], [0], [1], [0, 0, 1, 1], [], []>} : vector<8x128xf32>, vector<128x512xf32>, vector<8x512xf32> -> vector<8x512xf32>
    %543 = arith.addf %541, %542 : vector<8x512xf32>
    %544 = vector.extract_strided_slice %543 {offsets = [0, 0], sizes = [8, 128], strides = [1, 1]} : vector<8x512xf32> to vector<8x128xf32>
    %545 = arith.negf %544 : vector<8x128xf32>
    %546 = math.exp %545 : vector<8x128xf32>
    %cst_123 = arith.constant 1.000000e+00 : f32
    %547 = vector.broadcast %cst_123 : f32 to vector<8x128xf32>
    %548 = arith.addf %547, %546 : vector<8x128xf32>
    %549 = arith.divf %547, %548 : vector<8x128xf32>
    %550 = vector.extract_strided_slice %543 {offsets = [0, 128], sizes = [8, 128], strides = [1, 1]} : vector<8x512xf32> to vector<8x128xf32>
    %551 = arith.negf %550 : vector<8x128xf32>
    %552 = math.exp %551 : vector<8x128xf32>
    %cst_124 = arith.constant 1.000000e+00 : f32
    %553 = vector.broadcast %cst_124 : f32 to vector<8x128xf32>
    %554 = arith.addf %553, %552 : vector<8x128xf32>
    %555 = arith.divf %553, %554 : vector<8x128xf32>
    %556 = vector.extract_strided_slice %543 {offsets = [0, 256], sizes = [8, 128], strides = [1, 1]} : vector<8x512xf32> to vector<8x128xf32>
    %557 = math.tanh %556 : vector<8x128xf32>
    %558 = vector.extract_strided_slice %543 {offsets = [0, 384], sizes = [8, 128], strides = [1, 1]} : vector<8x512xf32> to vector<8x128xf32>
    %559 = arith.negf %558 : vector<8x128xf32>
    %560 = math.exp %559 : vector<8x128xf32>
    %cst_125 = arith.constant 1.000000e+00 : f32
    %561 = vector.broadcast %cst_125 : f32 to vector<8x128xf32>
    %562 = arith.addf %561, %560 : vector<8x128xf32>
    %563 = arith.divf %561, %562 : vector<8x128xf32>
    %564 = arith.mulf %555, %540 : vector<8x128xf32>
    %565 = arith.mulf %549, %557 : vector<8x128xf32>
    %566 = arith.addf %564, %565 : vector<8x128xf32>
    %567 = math.tanh %566 : vector<8x128xf32>
    %568 = arith.mulf %563, %567 : vector<8x128xf32>
    %569 = vector.extract_strided_slice %537 {offsets = [8, 0], sizes = [8, 512], strides = [1, 1]} : vector<64x512xf32> to vector<8x512xf32>
    %cst_126 = arith.constant dense<0.000000e+00> : vector<8x512xf32>
    %570 = tpu.matmul %568, %538, %cst_126 {dimension_numbers = #tpu.dot_dimension_numbers<[1], [0], [0], [1], [0, 0, 1, 1], [], []>} : vector<8x128xf32>, vector<128x512xf32>, vector<8x512xf32> -> vector<8x512xf32>
    %571 = arith.addf %569, %570 : vector<8x512xf32>
    %572 = vector.extract_strided_slice %571 {offsets = [0, 0], sizes = [8, 128], strides = [1, 1]} : vector<8x512xf32> to vector<8x128xf32>
    %573 = arith.negf %572 : vector<8x128xf32>
    %574 = math.exp %573 : vector<8x128xf32>
    %cst_127 = arith.constant 1.000000e+00 : f32
    %575 = vector.broadcast %cst_127 : f32 to vector<8x128xf32>
    %576 = arith.addf %575, %574 : vector<8x128xf32>
    %577 = arith.divf %575, %576 : vector<8x128xf32>
    %578 = vector.extract_strided_slice %571 {offsets = [0, 128], sizes = [8, 128], strides = [1, 1]} : vector<8x512xf32> to vector<8x128xf32>
    %579 = arith.negf %578 : vector<8x128xf32>
    %580 = math.exp %579 : vector<8x128xf32>
    %cst_128 = arith.constant 1.000000e+00 : f32
    %581 = vector.broadcast %cst_128 : f32 to vector<8x128xf32>
    %582 = arith.addf %581, %580 : vector<8x128xf32>
    %583 = arith.divf %581, %582 : vector<8x128xf32>
    %584 = vector.extract_strided_slice %571 {offsets = [0, 256], sizes = [8, 128], strides = [1, 1]} : vector<8x512xf32> to vector<8x128xf32>
    %585 = math.tanh %584 : vector<8x128xf32>
    %586 = vector.extract_strided_slice %571 {offsets = [0, 384], sizes = [8, 128], strides = [1, 1]} : vector<8x512xf32> to vector<8x128xf32>
    %587 = arith.negf %586 : vector<8x128xf32>
    %588 = math.exp %587 : vector<8x128xf32>
    %cst_129 = arith.constant 1.000000e+00 : f32
    %589 = vector.broadcast %cst_129 : f32 to vector<8x128xf32>
    %590 = arith.addf %589, %588 : vector<8x128xf32>
    %591 = arith.divf %589, %590 : vector<8x128xf32>
    %592 = arith.mulf %583, %566 : vector<8x128xf32>
    %593 = arith.mulf %577, %585 : vector<8x128xf32>
    %594 = arith.addf %592, %593 : vector<8x128xf32>
    %595 = math.tanh %594 : vector<8x128xf32>
    %596 = arith.mulf %591, %595 : vector<8x128xf32>
    %597 = vector.extract_strided_slice %537 {offsets = [16, 0], sizes = [8, 512], strides = [1, 1]} : vector<64x512xf32> to vector<8x512xf32>
    %cst_130 = arith.constant dense<0.000000e+00> : vector<8x512xf32>
    %598 = tpu.matmul %596, %538, %cst_130 {dimension_numbers = #tpu.dot_dimension_numbers<[1], [0], [0], [1], [0, 0, 1, 1], [], []>} : vector<8x128xf32>, vector<128x512xf32>, vector<8x512xf32> -> vector<8x512xf32>
    %599 = arith.addf %597, %598 : vector<8x512xf32>
    %600 = vector.extract_strided_slice %599 {offsets = [0, 0], sizes = [8, 128], strides = [1, 1]} : vector<8x512xf32> to vector<8x128xf32>
    %601 = arith.negf %600 : vector<8x128xf32>
    %602 = math.exp %601 : vector<8x128xf32>
    %cst_131 = arith.constant 1.000000e+00 : f32
    %603 = vector.broadcast %cst_131 : f32 to vector<8x128xf32>
    %604 = arith.addf %603, %602 : vector<8x128xf32>
    %605 = arith.divf %603, %604 : vector<8x128xf32>
    %606 = vector.extract_strided_slice %599 {offsets = [0, 128], sizes = [8, 128], strides = [1, 1]} : vector<8x512xf32> to vector<8x128xf32>
    %607 = arith.negf %606 : vector<8x128xf32>
    %608 = math.exp %607 : vector<8x128xf32>
    %cst_132 = arith.constant 1.000000e+00 : f32
    %609 = vector.broadcast %cst_132 : f32 to vector<8x128xf32>
    %610 = arith.addf %609, %608 : vector<8x128xf32>
    %611 = arith.divf %609, %610 : vector<8x128xf32>
    %612 = vector.extract_strided_slice %599 {offsets = [0, 256], sizes = [8, 128], strides = [1, 1]} : vector<8x512xf32> to vector<8x128xf32>
    %613 = math.tanh %612 : vector<8x128xf32>
    %614 = vector.extract_strided_slice %599 {offsets = [0, 384], sizes = [8, 128], strides = [1, 1]} : vector<8x512xf32> to vector<8x128xf32>
    %615 = arith.negf %614 : vector<8x128xf32>
    %616 = math.exp %615 : vector<8x128xf32>
    %cst_133 = arith.constant 1.000000e+00 : f32
    %617 = vector.broadcast %cst_133 : f32 to vector<8x128xf32>
    %618 = arith.addf %617, %616 : vector<8x128xf32>
    %619 = arith.divf %617, %618 : vector<8x128xf32>
    %620 = arith.mulf %611, %594 : vector<8x128xf32>
    %621 = arith.mulf %605, %613 : vector<8x128xf32>
    %622 = arith.addf %620, %621 : vector<8x128xf32>
    %623 = math.tanh %622 : vector<8x128xf32>
    %624 = arith.mulf %619, %623 : vector<8x128xf32>
    %625 = vector.extract_strided_slice %537 {offsets = [24, 0], sizes = [8, 512], strides = [1, 1]} : vector<64x512xf32> to vector<8x512xf32>
    %cst_134 = arith.constant dense<0.000000e+00> : vector<8x512xf32>
    %626 = tpu.matmul %624, %538, %cst_134 {dimension_numbers = #tpu.dot_dimension_numbers<[1], [0], [0], [1], [0, 0, 1, 1], [], []>} : vector<8x128xf32>, vector<128x512xf32>, vector<8x512xf32> -> vector<8x512xf32>
    %627 = arith.addf %625, %626 : vector<8x512xf32>
    %628 = vector.extract_strided_slice %627 {offsets = [0, 0], sizes = [8, 128], strides = [1, 1]} : vector<8x512xf32> to vector<8x128xf32>
    %629 = arith.negf %628 : vector<8x128xf32>
    %630 = math.exp %629 : vector<8x128xf32>
    %cst_135 = arith.constant 1.000000e+00 : f32
    %631 = vector.broadcast %cst_135 : f32 to vector<8x128xf32>
    %632 = arith.addf %631, %630 : vector<8x128xf32>
    %633 = arith.divf %631, %632 : vector<8x128xf32>
    %634 = vector.extract_strided_slice %627 {offsets = [0, 128], sizes = [8, 128], strides = [1, 1]} : vector<8x512xf32> to vector<8x128xf32>
    %635 = arith.negf %634 : vector<8x128xf32>
    %636 = math.exp %635 : vector<8x128xf32>
    %cst_136 = arith.constant 1.000000e+00 : f32
    %637 = vector.broadcast %cst_136 : f32 to vector<8x128xf32>
    %638 = arith.addf %637, %636 : vector<8x128xf32>
    %639 = arith.divf %637, %638 : vector<8x128xf32>
    %640 = vector.extract_strided_slice %627 {offsets = [0, 256], sizes = [8, 128], strides = [1, 1]} : vector<8x512xf32> to vector<8x128xf32>
    %641 = math.tanh %640 : vector<8x128xf32>
    %642 = vector.extract_strided_slice %627 {offsets = [0, 384], sizes = [8, 128], strides = [1, 1]} : vector<8x512xf32> to vector<8x128xf32>
    %643 = arith.negf %642 : vector<8x128xf32>
    %644 = math.exp %643 : vector<8x128xf32>
    %cst_137 = arith.constant 1.000000e+00 : f32
    %645 = vector.broadcast %cst_137 : f32 to vector<8x128xf32>
    %646 = arith.addf %645, %644 : vector<8x128xf32>
    %647 = arith.divf %645, %646 : vector<8x128xf32>
    %648 = arith.mulf %639, %622 : vector<8x128xf32>
    %649 = arith.mulf %633, %641 : vector<8x128xf32>
    %650 = arith.addf %648, %649 : vector<8x128xf32>
    %651 = math.tanh %650 : vector<8x128xf32>
    %652 = arith.mulf %647, %651 : vector<8x128xf32>
    %653 = vector.extract_strided_slice %537 {offsets = [32, 0], sizes = [8, 512], strides = [1, 1]} : vector<64x512xf32> to vector<8x512xf32>
    %cst_138 = arith.constant dense<0.000000e+00> : vector<8x512xf32>
    %654 = tpu.matmul %652, %538, %cst_138 {dimension_numbers = #tpu.dot_dimension_numbers<[1], [0], [0], [1], [0, 0, 1, 1], [], []>} : vector<8x128xf32>, vector<128x512xf32>, vector<8x512xf32> -> vector<8x512xf32>
    %655 = arith.addf %653, %654 : vector<8x512xf32>
    %656 = vector.extract_strided_slice %655 {offsets = [0, 0], sizes = [8, 128], strides = [1, 1]} : vector<8x512xf32> to vector<8x128xf32>
    %657 = arith.negf %656 : vector<8x128xf32>
    %658 = math.exp %657 : vector<8x128xf32>
    %cst_139 = arith.constant 1.000000e+00 : f32
    %659 = vector.broadcast %cst_139 : f32 to vector<8x128xf32>
    %660 = arith.addf %659, %658 : vector<8x128xf32>
    %661 = arith.divf %659, %660 : vector<8x128xf32>
    %662 = vector.extract_strided_slice %655 {offsets = [0, 128], sizes = [8, 128], strides = [1, 1]} : vector<8x512xf32> to vector<8x128xf32>
    %663 = arith.negf %662 : vector<8x128xf32>
    %664 = math.exp %663 : vector<8x128xf32>
    %cst_140 = arith.constant 1.000000e+00 : f32
    %665 = vector.broadcast %cst_140 : f32 to vector<8x128xf32>
    %666 = arith.addf %665, %664 : vector<8x128xf32>
    %667 = arith.divf %665, %666 : vector<8x128xf32>
    %668 = vector.extract_strided_slice %655 {offsets = [0, 256], sizes = [8, 128], strides = [1, 1]} : vector<8x512xf32> to vector<8x128xf32>
    %669 = math.tanh %668 : vector<8x128xf32>
    %670 = vector.extract_strided_slice %655 {offsets = [0, 384], sizes = [8, 128], strides = [1, 1]} : vector<8x512xf32> to vector<8x128xf32>
    %671 = arith.negf %670 : vector<8x128xf32>
    %672 = math.exp %671 : vector<8x128xf32>
    %cst_141 = arith.constant 1.000000e+00 : f32
    %673 = vector.broadcast %cst_141 : f32 to vector<8x128xf32>
    %674 = arith.addf %673, %672 : vector<8x128xf32>
    %675 = arith.divf %673, %674 : vector<8x128xf32>
    %676 = arith.mulf %667, %650 : vector<8x128xf32>
    %677 = arith.mulf %661, %669 : vector<8x128xf32>
    %678 = arith.addf %676, %677 : vector<8x128xf32>
    %679 = math.tanh %678 : vector<8x128xf32>
    %680 = arith.mulf %675, %679 : vector<8x128xf32>
    %681 = vector.extract_strided_slice %537 {offsets = [40, 0], sizes = [8, 512], strides = [1, 1]} : vector<64x512xf32> to vector<8x512xf32>
    %cst_142 = arith.constant dense<0.000000e+00> : vector<8x512xf32>
    %682 = tpu.matmul %680, %538, %cst_142 {dimension_numbers = #tpu.dot_dimension_numbers<[1], [0], [0], [1], [0, 0, 1, 1], [], []>} : vector<8x128xf32>, vector<128x512xf32>, vector<8x512xf32> -> vector<8x512xf32>
    %683 = arith.addf %681, %682 : vector<8x512xf32>
    %684 = vector.extract_strided_slice %683 {offsets = [0, 0], sizes = [8, 128], strides = [1, 1]} : vector<8x512xf32> to vector<8x128xf32>
    %685 = arith.negf %684 : vector<8x128xf32>
    %686 = math.exp %685 : vector<8x128xf32>
    %cst_143 = arith.constant 1.000000e+00 : f32
    %687 = vector.broadcast %cst_143 : f32 to vector<8x128xf32>
    %688 = arith.addf %687, %686 : vector<8x128xf32>
    %689 = arith.divf %687, %688 : vector<8x128xf32>
    %690 = vector.extract_strided_slice %683 {offsets = [0, 128], sizes = [8, 128], strides = [1, 1]} : vector<8x512xf32> to vector<8x128xf32>
    %691 = arith.negf %690 : vector<8x128xf32>
    %692 = math.exp %691 : vector<8x128xf32>
    %cst_144 = arith.constant 1.000000e+00 : f32
    %693 = vector.broadcast %cst_144 : f32 to vector<8x128xf32>
    %694 = arith.addf %693, %692 : vector<8x128xf32>
    %695 = arith.divf %693, %694 : vector<8x128xf32>
    %696 = vector.extract_strided_slice %683 {offsets = [0, 256], sizes = [8, 128], strides = [1, 1]} : vector<8x512xf32> to vector<8x128xf32>
    %697 = math.tanh %696 : vector<8x128xf32>
    %698 = vector.extract_strided_slice %683 {offsets = [0, 384], sizes = [8, 128], strides = [1, 1]} : vector<8x512xf32> to vector<8x128xf32>
    %699 = arith.negf %698 : vector<8x128xf32>
    %700 = math.exp %699 : vector<8x128xf32>
    %cst_145 = arith.constant 1.000000e+00 : f32
    %701 = vector.broadcast %cst_145 : f32 to vector<8x128xf32>
    %702 = arith.addf %701, %700 : vector<8x128xf32>
    %703 = arith.divf %701, %702 : vector<8x128xf32>
    %704 = arith.mulf %695, %678 : vector<8x128xf32>
    %705 = arith.mulf %689, %697 : vector<8x128xf32>
    %706 = arith.addf %704, %705 : vector<8x128xf32>
    %707 = math.tanh %706 : vector<8x128xf32>
    %708 = arith.mulf %703, %707 : vector<8x128xf32>
    %709 = vector.extract_strided_slice %537 {offsets = [48, 0], sizes = [8, 512], strides = [1, 1]} : vector<64x512xf32> to vector<8x512xf32>
    %cst_146 = arith.constant dense<0.000000e+00> : vector<8x512xf32>
    %710 = tpu.matmul %708, %538, %cst_146 {dimension_numbers = #tpu.dot_dimension_numbers<[1], [0], [0], [1], [0, 0, 1, 1], [], []>} : vector<8x128xf32>, vector<128x512xf32>, vector<8x512xf32> -> vector<8x512xf32>
    %711 = arith.addf %709, %710 : vector<8x512xf32>
    %712 = vector.extract_strided_slice %711 {offsets = [0, 0], sizes = [8, 128], strides = [1, 1]} : vector<8x512xf32> to vector<8x128xf32>
    %713 = arith.negf %712 : vector<8x128xf32>
    %714 = math.exp %713 : vector<8x128xf32>
    %cst_147 = arith.constant 1.000000e+00 : f32
    %715 = vector.broadcast %cst_147 : f32 to vector<8x128xf32>
    %716 = arith.addf %715, %714 : vector<8x128xf32>
    %717 = arith.divf %715, %716 : vector<8x128xf32>
    %718 = vector.extract_strided_slice %711 {offsets = [0, 128], sizes = [8, 128], strides = [1, 1]} : vector<8x512xf32> to vector<8x128xf32>
    %719 = arith.negf %718 : vector<8x128xf32>
    %720 = math.exp %719 : vector<8x128xf32>
    %cst_148 = arith.constant 1.000000e+00 : f32
    %721 = vector.broadcast %cst_148 : f32 to vector<8x128xf32>
    %722 = arith.addf %721, %720 : vector<8x128xf32>
    %723 = arith.divf %721, %722 : vector<8x128xf32>
    %724 = vector.extract_strided_slice %711 {offsets = [0, 256], sizes = [8, 128], strides = [1, 1]} : vector<8x512xf32> to vector<8x128xf32>
    %725 = math.tanh %724 : vector<8x128xf32>
    %726 = vector.extract_strided_slice %711 {offsets = [0, 384], sizes = [8, 128], strides = [1, 1]} : vector<8x512xf32> to vector<8x128xf32>
    %727 = arith.negf %726 : vector<8x128xf32>
    %728 = math.exp %727 : vector<8x128xf32>
    %cst_149 = arith.constant 1.000000e+00 : f32
    %729 = vector.broadcast %cst_149 : f32 to vector<8x128xf32>
    %730 = arith.addf %729, %728 : vector<8x128xf32>
    %731 = arith.divf %729, %730 : vector<8x128xf32>
    %732 = arith.mulf %723, %706 : vector<8x128xf32>
    %733 = arith.mulf %717, %725 : vector<8x128xf32>
    %734 = arith.addf %732, %733 : vector<8x128xf32>
    %735 = math.tanh %734 : vector<8x128xf32>
    %736 = arith.mulf %731, %735 : vector<8x128xf32>
    %737 = vector.extract_strided_slice %537 {offsets = [56, 0], sizes = [8, 512], strides = [1, 1]} : vector<64x512xf32> to vector<8x512xf32>
    %cst_150 = arith.constant dense<0.000000e+00> : vector<8x512xf32>
    %738 = tpu.matmul %736, %538, %cst_150 {dimension_numbers = #tpu.dot_dimension_numbers<[1], [0], [0], [1], [0, 0, 1, 1], [], []>} : vector<8x128xf32>, vector<128x512xf32>, vector<8x512xf32> -> vector<8x512xf32>
    %739 = arith.addf %737, %738 : vector<8x512xf32>
    %740 = vector.extract_strided_slice %739 {offsets = [0, 0], sizes = [8, 128], strides = [1, 1]} : vector<8x512xf32> to vector<8x128xf32>
    %741 = arith.negf %740 : vector<8x128xf32>
    %742 = math.exp %741 : vector<8x128xf32>
    %cst_151 = arith.constant 1.000000e+00 : f32
    %743 = vector.broadcast %cst_151 : f32 to vector<8x128xf32>
    %744 = arith.addf %743, %742 : vector<8x128xf32>
    %745 = arith.divf %743, %744 : vector<8x128xf32>
    %746 = vector.extract_strided_slice %739 {offsets = [0, 128], sizes = [8, 128], strides = [1, 1]} : vector<8x512xf32> to vector<8x128xf32>
    %747 = arith.negf %746 : vector<8x128xf32>
    %748 = math.exp %747 : vector<8x128xf32>
    %cst_152 = arith.constant 1.000000e+00 : f32
    %749 = vector.broadcast %cst_152 : f32 to vector<8x128xf32>
    %750 = arith.addf %749, %748 : vector<8x128xf32>
    %751 = arith.divf %749, %750 : vector<8x128xf32>
    %752 = vector.extract_strided_slice %739 {offsets = [0, 256], sizes = [8, 128], strides = [1, 1]} : vector<8x512xf32> to vector<8x128xf32>
    %753 = math.tanh %752 : vector<8x128xf32>
    %754 = vector.extract_strided_slice %739 {offsets = [0, 384], sizes = [8, 128], strides = [1, 1]} : vector<8x512xf32> to vector<8x128xf32>
    %755 = arith.negf %754 : vector<8x128xf32>
    %756 = math.exp %755 : vector<8x128xf32>
    %cst_153 = arith.constant 1.000000e+00 : f32
    %757 = vector.broadcast %cst_153 : f32 to vector<8x128xf32>
    %758 = arith.addf %757, %756 : vector<8x128xf32>
    %759 = arith.divf %757, %758 : vector<8x128xf32>
    %760 = arith.mulf %751, %734 : vector<8x128xf32>
    %761 = arith.mulf %745, %753 : vector<8x128xf32>
    %762 = arith.addf %760, %761 : vector<8x128xf32>
    %763 = math.tanh %762 : vector<8x128xf32>
    %764 = arith.mulf %759, %763 : vector<8x128xf32>
    %c0_154 = arith.constant 0 : index
    %c0_155 = arith.constant 0 : index
    %765 = vector.load %arg17[%c0_154, %c0_155] : memref<128x128xf32, #tpu.memory_space<vmem>>, vector<128x128xf32>
    %cst_156 = arith.constant dense<0.000000e+00> : vector<8x128xf32>
    %766 = tpu.matmul %764, %765, %cst_156 {dimension_numbers = #tpu.dot_dimension_numbers<[1], [0], [0], [1], [0, 0, 1, 1], [], []>} : vector<8x128xf32>, vector<128x128xf32>, vector<8x128xf32> -> vector<8x128xf32>
    %767 = arith.addf %237, %766 : vector<8x128xf32>
    %c0_157 = arith.constant 0 : index
    %c0_158 = arith.constant 0 : index
    %768 = vector.load %arg18[%c0_157, %c0_158] : memref<8x128xf32, #tpu.memory_space<vmem>>, vector<8x128xf32>
    tpu.vector_store %arg18[%c0_157, %c0_158], %767 {strides = array<i32>} : memref<8x128xf32, #tpu.memory_space<vmem>>, vector<8x128xf32>,
    return
  }
}

</mosaic_0001>

<bundles_post_ra>
// kernel: cvae_with_re_encoder_forward.1
= control target key start
LH: loop header
LB: loop body
LE: loop exit
PB: predicated region body
PF: predicated region fallthrough
CT: control target
= control target key end

     0   :  { %s11547_s0 = inlined_call_operand.vmem [shape: f32[64,27], index: 0, kind: input, shape index: {}]   ;;  %s11548_s1 = inlined_call_operand.vmem [shape: f32[8,1], index: 1, kind: input, shape index: {}]   ;;  %s11549_s2 = inlined_call_operand.vmem [shape: f32[8,8], index: 2, kind: input, shape index: {}]   ;;  %s11550_s3 = inlined_call_operand.vmem [shape: f32[27,512], index: 3, kind: input, shape index: {}]   ;;  %s11551_s4 = inlined_call_operand.vmem [shape: f32[1,512], index: 4, kind: input, shape index: {}]   ;;  %s11552_s5 = inlined_call_operand.hbm [shape: f32[128,512], index: 5, kind: input, shape index: {}]   ;;  %s11553_s6 = inlined_call_operand.vmem [shape: f32[128,128], index: 6, kind: input, shape index: {}]   ;;  %s11554_s7 = inlined_call_operand.vmem [shape: f32[1,128], index: 7, kind: input, shape index: {}]   ;;  %s11555_s8 = inlined_call_operand.hbm [shape: f32[8,512], index: 8, kind: input, shape index: {}]   ;;  %s11556_s9 = inlined_call_operand.vmem [shape: f32[1,512], index: 9, kind: input, shape index: {}]   ;;  %s11557_s10 = inlined_call_operand.vmem [shape: f32[1,512], index: 10, kind: input, shape index: {}]   ;;  %s11558_s11 = inlined_call_operand.hbm [shape: f32[128,512], index: 11, kind: input, shape index: {}]   ;;  %s11559_s12 = inlined_call_operand.hbm [shape: f32[128,128], index: 12, kind: input, shape index: {}]   ;;  %s11560_s13 = inlined_call_operand.vmem [shape: f32[1,128], index: 13, kind: input, shape index: {}]   ;;  %s11561_s14 = inlined_call_operand.hbm [shape: f32[128,512], index: 14, kind: input, shape index: {}]   ;;  %s11562_s15 = inlined_call_operand.hbm [shape: f32[1,512], index: 15, kind: input, shape index: {}]   ;;  %s11563_s16 = inlined_call_operand.hbm [shape: f32[128,512], index: 16, kind: input, shape index: {}]   ;;  %s11564_s17 = inlined_call_operand.hbm [shape: f32[128,128], index: 17, kind: input, shape index: {}]   ;;  %s11565_s18 = inlined_call_operand.vmem [shape: f32[8,128], index: 18, kind: output, shape index: {0}]   ;;  %s11566_s19 = inlined_call_operand.vmem [shape: f32[64,128], index: 19, kind: output, shape index: {1}]  }
   0x1   :  { %11598 = sst [smem:[#allocation35_spill]] %s11547_s0 }
   0x2   :  { %11599 = sst [smem:[#allocation36_spill]] %s11548_s1 }
   0x3   :  { %11600 = sst [smem:[#allocation37_spill]] %s11549_s2 }
   0x4   :  { %11601 = sst [smem:[#allocation38_spill]] %s11550_s3 }
   0x5   :  { %25 = vsyncpa [#allocation3], 0 }
   0x6   :  { %26 = vsyncpa [#allocation5], 0 }
   0x7   :  { %27 = vsyncpa [#allocation8], 0 }
   0x8   :  { %28 = vsyncpa [#allocation11], 0 }
   0x9   :  { %29 = vsyncpa [#allocation14], 0  ;;  %s9244_s0 = smov [#allocation4]   ;;  %s9245_s20 = smov [#allocation7]  }
   0xa   :  { %s62_s30 = sshll.u32 %s9244_s0, 4  ;;  %s87_s21 = sshll.u32 %s9245_s20, 4  ;;  %s63_s30 = int_to_ptr.vmem [resolvable:$true] %s62_s30  ;;  %s9365_s21 = int_to_ptr.vmem [resolvable:$true] %s87_s21 }
   0xb   :  { %s9058_s2 = scalar_lea.hbm %s11555_s8, 512 }
   0xc   :  { %p9059_p0 = scmp.ne.s32.totalorder %s11555_s8, %s9058_s2  ;;  %p9062_p1 = scmp.lt.u32.totalorder %s9058_s2, %s11555_s8 }
   0xe   :  { %p9064_p2 = pnand %p9062_p1, %p9059_p0 }
  0x10   :  { %9067 = shalt.err (!%p9064_p2)
}
  0x11   :  { %s9068_s26 = scalar_lea.vmem %s63_s30, 512  ;;  %p9073_p4 = scmp.lt.s32.totalorder %s63_s30, %s63_s30 }
  0x12   :  { %p9069_p3 = scmp.ne.s32.totalorder %s63_s30, %s9068_s26  ;;  %p9074_p5 = scmp.lt.s32.totalorder %s9068_s26, %s9068_s26 }
  0x14   :  { %p9075_p6 = por %p9074_p5, %p9073_p4 }
  0x16   :  { %p9076_p7 = pnand %p9075_p6, %p9069_p3 }
  0x18   :  { %9079 = shalt.err (!%p9076_p7)
}
  0x19   :  { %65 = dma.hbm_to_vmem [thread:$0]  %s11555_s8, 512, %s63_s30, [#allocation5]  }
  0x1a   :  { %s9080_s20 = scalar_lea.hbm %s11559_s12, 2048 }
  0x1b   :  { %p9081_p8 = scmp.ne.s32.totalorder %s11559_s12, %s9080_s20  ;;  %p9084_p9 = scmp.lt.u32.totalorder %s9080_s20, %s11559_s12 }
  0x1d   :  { %p9086_p10 = pnand %p9084_p9, %p9081_p8 }
  0x1f   :  { %9089 = shalt.err (!%p9086_p10)
}
  0x20   :  { %s9090_s24 = scalar_lea.vmem %s9365_s21, 2048  ;;  %p9095_p12 = scmp.lt.s32.totalorder %s9365_s21, %s9365_s21 }
  0x21   :  { %p9091_p11 = scmp.ne.s32.totalorder %s9365_s21, %s9090_s24  ;;  %p9096_p13 = scmp.lt.s32.totalorder %s9090_s24, %s9090_s24 }
  0x23   :  { %p9097_p0 = por %p9096_p13, %p9095_p12 }
  0x25   :  { %p9098_p1 = pnand %p9097_p0, %p9091_p11 }
  0x27   :  { %9101 = shalt.err (!%p9098_p1)
}
  0x28   :  { %s9246_s8 = smov 128   ;;  %s9247_s30 = smov 8  }
  0x29   :  { %93 = dma.hbm_to_vmem [thread:$0]  %s11559_s12, 2048, %s9365_s21, [#allocation8], %s9246_s8, %s9246_s8, %s9247_s30  }
  0x2a   :  { %s9248_s26 = smov [#allocation10]   ;;  %s9249_s28 = smov [#allocation2]  }
  0x2b   :  { %s114_s27 = sshll.u32 %s9248_s26, 4  ;;  %s45_s29 = sshll.u32 %s9249_s28, 4  ;;  %s115_s27 = int_to_ptr.vmem [resolvable:$true] %s114_s27  ;;  %s9399_s29 = int_to_ptr.vmem [resolvable:$true] %s45_s29 }
  0x2c   :  { %s9102_s1 = scalar_lea.hbm %s11562_s15, 64 }
  0x2d   :  { %p9103_p2 = scmp.ne.s32.totalorder %s11562_s15, %s9102_s1  ;;  %p9106_p3 = scmp.lt.u32.totalorder %s9102_s1, %s11562_s15 }
  0x2f   :  { %p9108_p4 = pnand %p9106_p3, %p9103_p2 }
  0x31   :  { %9111 = shalt.err (!%p9108_p4)
}
  0x32   :  { %s9112_s12 = scalar_lea.vmem %s115_s27, 64  ;;  %p9117_p6 = scmp.lt.s32.totalorder %s115_s27, %s115_s27 }
  0x33   :  { %p9113_p5 = scmp.ne.s32.totalorder %s115_s27, %s9112_s12  ;;  %p9118_p7 = scmp.lt.s32.totalorder %s9112_s12, %s9112_s12 }
  0x35   :  { %p9119_p8 = por %p9118_p7, %p9117_p6 }
  0x37   :  { %p9120_p9 = pnand %p9119_p8, %p9113_p5 }
  0x39   :  { %9123 = shalt.err (!%p9120_p9)
}
  0x3a   :  { %117 = dma.hbm_to_vmem [thread:$0]  %s11562_s15, 64, %s115_s27, [#allocation11]  }
  0x3b   :  { %s9124_s28 = scalar_lea.hbm %s11552_s5, 8192 }
  0x3c   :  { %p9125_p10 = scmp.ne.s32.totalorder %s11552_s5, %s9124_s28  ;;  %p9128_p11 = scmp.lt.u32.totalorder %s9124_s28, %s11552_s5 }
  0x3e   :  { %p9130_p12 = pnand %p9128_p11, %p9125_p10 }
  0x40   :  { %9133 = shalt.err (!%p9130_p12)
}
  0x41   :  { %s9134_s2 = scalar_lea.vmem %s9399_s29, 8192  ;;  %p9139_p0 = scmp.lt.s32.totalorder %s9399_s29, %s9399_s29 }
  0x42   :  { %p9135_p13 = scmp.ne.s32.totalorder %s9399_s29, %s9134_s2  ;;  %p9140_p1 = scmp.lt.s32.totalorder %s9134_s2, %s9134_s2 }
  0x44   :  { %p9141_p2 = por %p9140_p1, %p9139_p0 }
  0x46   :  { %p9142_p3 = pnand %p9141_p2, %p9135_p13 }
  0x48   :  { %9145 = shalt.err (!%p9142_p3)
}
  0x49   :  { %s9250_s15 = smov 512   ;;  %s9251_s27 = smov 32  }
  0x4a   :  { %51 = dma.hbm_to_vmem [thread:$0]  %s11552_s5, 8192, %s9399_s29, [#allocation3], %s9250_s15, %s9250_s15, %s9251_s27  }
  0x4b   :  { %s9252_s12 = smov [#allocation6]   ;;  %s9253_s25 = smov [#allocation9]  }
  0x4c   :  { %s75_s21 = sshll.u32 %s9252_s12, 4  ;;  %s101_s3 = sshll.u32 %s9253_s25, 4  ;;  %s76_s21 = int_to_ptr.vmem [resolvable:$true] %s75_s21  ;;  %s9433_s3 = int_to_ptr.vmem [resolvable:$true] %s101_s3 }
  0x4d   :  { %s9146_s0 = scalar_lea.hbm %s11558_s11, 8192 }
  0x4e   :  { %p9147_p4 = scmp.ne.s32.totalorder %s11558_s11, %s9146_s0  ;;  %p9150_p5 = scmp.lt.u32.totalorder %s9146_s0, %s11558_s11 }
  0x50   :  { %p9152_p6 = pnand %p9150_p5, %p9147_p4 }
  0x52   :  { %9155 = shalt.err (!%p9152_p6)
}
  0x53   :  { %s9156_s5 = scalar_lea.vmem %s76_s21, 8192  ;;  %p9161_p8 = scmp.lt.s32.totalorder %s76_s21, %s76_s21 }
  0x54   :  { %p9157_p7 = scmp.ne.s32.totalorder %s76_s21, %s9156_s5  ;;  %p9162_p9 = scmp.lt.s32.totalorder %s9156_s5, %s9156_s5 }
  0x56   :  { %p9163_p10 = por %p9162_p9, %p9161_p8 }
  0x58   :  { %p9164_p11 = pnand %p9163_p10, %p9157_p7 }
  0x5a   :  { %9167 = shalt.err (!%p9164_p11)
}
  0x5b   :  { %81 = dma.hbm_to_vmem [thread:$0]  %s11558_s11, 8192, %s76_s21, [#allocation5], %s9250_s15, %s9250_s15, %s9251_s27  }
  0x5c   :  { %s9168_s25 = scalar_lea.hbm %s11561_s14, 8192 }
  0x5d   :  { %p9169_p12 = scmp.ne.s32.totalorder %s11561_s14, %s9168_s25  ;;  %p9172_p13 = scmp.lt.u32.totalorder %s9168_s25, %s11561_s14 }
  0x5f   :  { %p9174_p0 = pnand %p9172_p13, %p9169_p12 }
  0x61   :  { %9177 = shalt.err (!%p9174_p0)
}
  0x62   :  { %s9178_s1 = scalar_lea.vmem %s9433_s3, 8192  ;;  %p9183_p2 = scmp.lt.s32.totalorder %s9433_s3, %s9433_s3 }
  0x63   :  { %p9179_p1 = scmp.ne.s32.totalorder %s9433_s3, %s9178_s1  ;;  %p9184_p3 = scmp.lt.s32.totalorder %s9178_s1, %s9178_s1 }
  0x65   :  { %p9185_p4 = por %p9184_p3, %p9183_p2 }
  0x67   :  { %p9186_p5 = pnand %p9185_p4, %p9179_p1 }
  0x69   :  { %9189 = shalt.err (!%p9186_p5)
}
  0x6a   :  { %107 = dma.hbm_to_vmem [thread:$0]  %s11561_s14, 8192, %s9433_s3, [#allocation8], %s9250_s15, %s9250_s15, %s9251_s27  }
  0x6b   :  { %s9254_s22 = smov [#allocation12]   ;;  %s9255_s5 = smov [#allocation13]  }
  0x6c   :  { %s123_s2 = sshll.u32 %s9254_s22, 4  ;;  %s135_s29 = sshll.u32 %s9255_s5, 4  ;;  %s124_s2 = int_to_ptr.vmem [resolvable:$true] %s123_s2  ;;  %s9470_s29 = int_to_ptr.vmem [resolvable:$true] %s135_s29 }
  0x6d   :  { %s9190_s12 = scalar_lea.hbm %s11563_s16, 8192 }
  0x6e   :  { %p9191_p6 = scmp.ne.s32.totalorder %s11563_s16, %s9190_s12  ;;  %p9194_p7 = scmp.lt.u32.totalorder %s9190_s12, %s11563_s16 }
  0x70   :  { %p9196_p8 = pnand %p9194_p7, %p9191_p6 }
  0x72   :  { %9199 = shalt.err (!%p9196_p8)
}
  0x73   :  { %s9200_s14 = scalar_lea.vmem %s124_s2, 8192  ;;  %p9205_p10 = scmp.lt.s32.totalorder %s124_s2, %s124_s2 }
  0x74   :  { %p9201_p9 = scmp.ne.s32.totalorder %s124_s2, %s9200_s14  ;;  %p9206_p11 = scmp.lt.s32.totalorder %s9200_s14, %s9200_s14 }
  0x76   :  { %p9207_p12 = por %p9206_p11, %p9205_p10 }
  0x78   :  { %p9208_p13 = pnand %p9207_p12, %p9201_p9 }
  0x7a   :  { %9211 = shalt.err (!%p9208_p13)
}
  0x7b   :  { %129 = dma.hbm_to_vmem [thread:$0]  %s11563_s16, 8192, %s124_s2, [#allocation11], %s9250_s15, %s9250_s15, %s9251_s27  }
  0x7c   :  { %s9212_s21 = scalar_lea.hbm %s11564_s17, 2048 }
  0x7d   :  { %p9213_p0 = scmp.ne.s32.totalorder %s11564_s17, %s9212_s21  ;;  %p9216_p1 = scmp.lt.u32.totalorder %s9212_s21, %s11564_s17 }
  0x7f   :  { %p9218_p2 = pnand %p9216_p1, %p9213_p0 }
  0x81   :  { %9221 = shalt.err (!%p9218_p2)
}
  0x82   :  { %s9222_s12 = scalar_lea.vmem %s9470_s29, 2048  ;;  %p9227_p4 = scmp.lt.s32.totalorder %s9470_s29, %s9470_s29 }
  0x83   :  { %p9223_p3 = scmp.ne.s32.totalorder %s9470_s29, %s9222_s12  ;;  %p9228_p5 = scmp.lt.s32.totalorder %s9222_s12, %s9222_s12 }
  0x85   :  { %p9229_p6 = por %p9228_p5, %p9227_p4 }
  0x87   :  { %p9230_p7 = pnand %p9229_p6, %p9223_p3 }
  0x89   :  { %9233 = shalt.err (!%p9230_p7)
}
  0x8a   :  { %141 = dma.hbm_to_vmem [thread:$0]  %s11564_s17, 2048, %s9470_s29, [#allocation14], %s9246_s8, %s9246_s8, %s9247_s30  }
  0x8b   :  { %9234 = dma.done.wait [#allocation3], 8192  }
  0x8c   :  { %9235 = vsyncadd [#allocation3], 4294959104 }
  0x8d   :  { %9236 = dma.done.wait [#allocation5], 8704  }
  0x8e   :  { %9237 = vsyncadd [#allocation5], 4294958592 }
  0x8f   :  { %9238 = dma.done.wait [#allocation8], 10240  }
  0x90   :  { %9239 = vsyncadd [#allocation8], 4294957056 }
  0x91   :  { %9240 = dma.done.wait [#allocation11], 8256  }
  0x92   :  { %9241 = vsyncadd [#allocation11], 4294959040 }
  0x93   :  { %9242 = dma.done.wait [#allocation14], 2048  }
  0x94   :  { %9243 = vsyncadd [#allocation14], 4294965248  ;;  %v11571_v0 = vmov 0.0   ;;  %vm237_vm0 = vcmask 1042432   ;;  %vm9257_vm1 = vmmov 1   ;;  %s11604_s30 = sld [smem:[#allocation38_spill]] }
  0x95   :  { %314 = vmatprep.mubr.f32.mxu0 %v11571_v0  ;;  %427 = vmatprep.mubr.f32.mxu1 %v11571_v0  ;;  %vm9509_vm2 = vmpackc.low %vm237_vm0, %vm9257_vm1  ;;  %v477_v25 = vld [vmem:[#allocation2 + $0x8] sm:$0xff]  ;;  %v479_v28 = vld [vmem:[#allocation2 + $0x18] sm:$0xff]  ;;  %s11605_s20 = sld [smem:[#allocation35_spill]]  ;;  %vm212_vm3 = vcmask 220160   ;;  %vm9259_vm4 = vmmov 0   ;;  %vm2030_vm5 = vcmask 1040384  }
  0x96   :  { %v481_v27 = vld [vmem:[#allocation2 + $0x28] sm:$0xff]  ;;  %v483_v29 = vld [vmem:[#allocation2 + $0x38] sm:$0xff]  ;;  %v476_v32 = vld [vmem:[#allocation2] sm:$0xff]  ;;  %s11610_s22 = sld [smem:[#allocation36_spill]]  ;;  %vm2026_vm6 = vcmask 7168   ;;  %s11612_s12 = sld [smem:[#allocation37_spill]] }
  0x97   :  { %v9565_v30 = vpack.c.bf16 %v481_v27, %v477_v25  ;;  %v9567_v31 = vpack.c.bf16 %v483_v29, %v479_v28  ;;  %v480_v33 = vld [vmem:[#allocation2 + $0x20] sm:$0xff]  ;;  %v478_v34 = vld [vmem:[#allocation2 + $0x10] sm:$0xff]  ;;  %v485_v38 = vld [vmem:[#allocation2 + $0x48] sm:$0xff]  ;;  %vm2181_vm7 = vcmask 64512   ;;  %vm3994_vm8 = vcmask 97328   ;;  %s9262_s8 = smov 116  }
  0x98   :  { %v9574_v36 = vpack.c.bf16 %v480_v33, %v476_v32  ;;  %v482_v37 = vld [vmem:[#allocation2 + $0x30] sm:$0xff]  ;;  %v489_v40 = vld [vmem:[#allocation2 + $0x68] sm:$0xff]  ;;  %v487_v41 = vld [vmem:[#allocation2 + $0x58] sm:$0xff]  ;;  %vm4115_vm9 = vcmask 138336   ;;  %vm3905_vm10 = vcmask 48128   ;;  %vm4237_vm11 = vcmask 179336  }
  0x99   :  { %v9579_v39 = vpack.c.bf16 %v482_v37, %v478_v34  ;;  %v491_v42 = vld [vmem:[#allocation2 + $0x78] sm:$0xff]  ;;  %v9582_v43 = vpack.c.bf16 %v489_v40, %v485_v38  ;;  %v484_v44 = vld [vmem:[#allocation2 + $0x40] sm:$0xff]  ;;  %v486_v46 = vld [vmem:[#allocation2 + $0x50] sm:$0xff]  ;;  %vm4358_vm12 = vcmask 212144   ;;  %s9263_s27 = smov 111   ;;  %s9264_s2 = smov 106  }
  0x9a   :  { %v175_v2 = vld [vmem:[%s11604_s30 + $0x8] sm:$0xff]  ;;  %v177_v4 = vld [vmem:[%s11604_s30 + $0x18] sm:$0xff]  ;;  %v174_v7 = vld [vmem:[%s11604_s30] sm:$0xff]  ;;  %v9588_v48 = vpack.c.bf16 %v491_v42, %v487_v41  ;;  %vm4196_vm13 = vcmask 39936   ;;  %vm4439_vm14 = vcmask 31744   ;;  %vm4488_vm15 = vcmask 97280  }
  0x9b   :  { %v179_v3 = vld [vmem:[%s11604_s30 + $0x28] sm:$0xff]  ;;  %v181_v6 = vld [vmem:[%s11604_s30 + $0x38] sm:$0xff]  ;;  %v178_v8 = vld [vmem:[%s11604_s30 + $0x20] sm:$0xff]  ;;  %vm4497_vm0 = vcmask 138240   ;;  %vm4506_vm1 = vcmask 179200  }
  0x9c   :  { %v6659_v5 = vpack.c.bf16 %v179_v3, %v175_v2  ;;  %v6669_v9 = vpack.c.bf16 %v181_v6, %v177_v4  ;;  %v6661_v10 = vpack.c.bf16 %v178_v8, %v174_v7  ;;  %v176_v11 = vld [vmem:[%s11604_s30 + $0x10] sm:$0xff]  ;;  %v183_v13 = vld [vmem:[%s11604_s30 + $0x48] sm:$0xff]  ;;  %v185_v16 = vld [vmem:[%s11604_s30 + $0x58] sm:$0xff] }
  0x9d   :  { %v180_v12 = vld [vmem:[%s11604_s30 + $0x30] sm:$0xff]  ;;  %v187_v15 = vld [vmem:[%s11604_s30 + $0x68] sm:$0x7]  ;;  %v189_v17 = vld [vmem:[%s11604_s30 + $0x78] sm:$0x7] }
  0x9e   :  { %6660 = vmatprep.subr.bf16.mxu0 %v6659_v5  ;;  %v6671_v14 = vpack.c.bf16 %v180_v12, %v176_v11  ;;  %6670 = vmatprep.subr.bf16.mxu1 %v6669_v9  ;;  %v6663_v18 = vpack.c.bf16 %v187_v15, %v183_v13  ;;  %v6673_v19 = vpack.c.bf16 %v189_v17, %v185_v16  ;;  %v182_v20 = vld [vmem:[%s11604_s30 + $0x40] sm:$0xff]  ;;  %v184_v22 = vld [vmem:[%s11604_s30 + $0x50] sm:$0xff]  ;;  %v167_v47 = vld [vmem:[%s11605_s20 + $0x8] sm:$0xff] }
  0x9f   :  { %6662 = vmatpush1.bf16.msra.mxu0 %v6661_v10  ;;  %v186_v21 = vld [vmem:[%s11604_s30 + $0x60] sm:$0x7]  ;;  %v188_v24 = vld [vmem:[%s11604_s30 + $0x70] sm:$0x7]  ;;  %v493_v50 = vld [vmem:[#allocation2 + $0x88] sm:$0xff] }
  0xa0   :  { %6672 = vmatpush1.bf16.msra.mxu1 %v6671_v14  ;;  %v6666_v23 = vpack.c.bf16 %v186_v21, %v182_v20  ;;  %6665 = vmatprep.subr.msk.bf16.mxu0 %vm9509_vm2, %v6663_v18  ;;  %v6676_v26 = vpack.c.bf16 %v188_v24, %v184_v22  ;;  %v166_v35 = vld [vmem:[%s11605_s20] sm:$0xff]  ;;  %v490_v49 = vld [vmem:[#allocation2 + $0x70] sm:$0xff]  ;;  %v497_v52 = vld [vmem:[#allocation2 + $0xa8] sm:$0xff] }
  0xa1   :  { %6675 = vmatprep.subr.msk.bf16.mxu1 %vm9509_vm2, %v6673_v19  ;;  %v488_v45 = vld [vmem:[#allocation2 + $0x60] sm:$0xff]  ;;  %v495_v53 = vld [vmem:[#allocation2 + $0x98] sm:$0xff]  ;;  %v9596_v55 = vpack.c.bf16 %v490_v49, %v486_v46  ;;  %v9600_v58 = vpack.c.bf16 %v497_v52, %v493_v50  ;;  %v494_v59 = vld [vmem:[#allocation2 + $0x90] sm:$0xff] }
  0xa2   :  { %v9592_v51 = vpack.c.bf16 %v488_v45, %v484_v44  ;;  %v499_v54 = vld [vmem:[#allocation2 + $0xb8] sm:$0xff]  ;;  %v492_v56 = vld [vmem:[#allocation2 + $0x80] sm:$0xff]  ;;  %v498_v60 = vld [vmem:[#allocation2 + $0xb0] sm:$0xff] }
  0xa3   :  { %6668 = vmatpush1.bf16.msk.msra.mxu0 %vm9509_vm2, %v6666_v23  ;;  %v496_v57 = vld [vmem:[#allocation2 + $0xa0] sm:$0xff]  ;;  %v9604_v61 = vpack.c.bf16 %v499_v54, %v495_v53  ;;  %v501_v62 = vld [vmem:[#allocation2 + $0xc8] sm:$0xff]  ;;  %v168_v1 = vld [vmem:[%s11605_s20 + $0x10] sm:$0xff]  ;;  %v9615_v5 = vpack.c.bf16 %v498_v60, %v494_v59 }
  0xa4   :  { %6678 = vmatpush1.bf16.msk.msra.mxu1 %vm9509_vm2, %v6676_v26  ;;  %6680 = vmatprep.subr.bf16.mxu0 %v9565_v30  ;;  %v505_v63 = vld [vmem:[#allocation2 + $0xe8] sm:$0xff]  ;;  %v9611_v2 = vpack.c.bf16 %v496_v57, %v492_v56  ;;  %v503_v3 = vld [vmem:[#allocation2 + $0xd8] sm:$0xff]  ;;  %v500_v6 = vld [vmem:[#allocation2 + $0xc0] sm:$0xff]  ;;  %vm4515_vm2 = vcmask 211968  }
  0xa5   :  { %6712 = vmatprep.subr.bf16.mxu1 %v9567_v31  ;;  %v507_v4 = vld [vmem:[#allocation2 + $0xf8] sm:$0xff]  ;;  %v504_v7 = vld [vmem:[#allocation2 + $0xe0] sm:$0xff]  ;;  %v9619_v8 = vpack.c.bf16 %v505_v63, %v501_v62  ;;  %v502_v9 = vld [vmem:[#allocation2 + $0xd0] sm:$0xff] }
  0xa6   :  { %6371 = vmatmul.mubr.msk.f32.vlgmr.msra.gmra.mrb[0].mxu0 %vm212_vm3, %v166_v35  ;;  %v506_v10 = vld [vmem:[#allocation2 + $0xf0] sm:$0xff]  ;;  %v9623_v11 = vpack.c.bf16 %v507_v4, %v503_v3  ;;  %v509_v12 = vld [vmem:[#allocation2 + $0x108] sm:$0xff]  ;;  %v169_v14 = vld [vmem:[%s11605_s20 + $0x18] sm:$0xff]  ;;  %v9630_v15 = vpack.c.bf16 %v504_v7, %v500_v6 }
  0xa7   :  { %6381 = vmatmul.mubr.msk.f32.vlgmr.msra.gmra.mrb[0].mxu1 %vm212_vm3, %v166_v35  ;;  %6682 = vmatpush1.bf16.msra.mxu0 %v9574_v36  ;;  %v513_v13 = vld [vmem:[#allocation2 + $0x128] sm:$0xff]  ;;  %v511_v16 = vld [vmem:[#allocation2 + $0x118] sm:$0xff]  ;;  %v9634_v18 = vpack.c.bf16 %v506_v10, %v502_v9  ;;  %v508_v19 = vld [vmem:[#allocation2 + $0x100] sm:$0xff] }
  0xa8   :  { %6714 = vmatpush1.bf16.msra.mxu1 %v9579_v39  ;;  %320 = vmatprep.mubr.f32.mxu0 %v11571_v0  ;;  %v515_v17 = vld [vmem:[#allocation2 + $0x138] sm:$0xff]  ;;  %v512_v20 = vld [vmem:[#allocation2 + $0x120] sm:$0xff]  ;;  %v9638_v21 = vpack.c.bf16 %v513_v13, %v509_v12  ;;  %v510_v22 = vld [vmem:[#allocation2 + $0x110] sm:$0xff] }
  0xa9   :  { %433 = vmatprep.mubr.f32.mxu1 %v11571_v0  ;;  %6684 = vmatprep.subr.bf16.mxu0 %v9582_v43  ;;  %v514_v23 = vld [vmem:[#allocation2 + $0x130] sm:$0xff]  ;;  %v9642_v24 = vpack.c.bf16 %v515_v17, %v511_v16  ;;  %v517_v25 = vld [vmem:[#allocation2 + $0x148] sm:$0xff]  ;;  %v170_v27 = vld [vmem:[%s11605_s20 + $0x20] sm:$0xff]  ;;  %v9649_v28 = vpack.c.bf16 %v512_v20, %v508_v19  ;;  %v192_v20 = vlaneseq }
  0xaa   :  { %6372 = vmatmul.mubr.msk.f32.gmra.mrb[2].mxu0 %vm212_vm3, %v167_v47  ;;  %6716 = vmatprep.subr.bf16.mxu1 %v9588_v48  ;;  %v521_v26 = vld [vmem:[#allocation2 + $0x168] sm:$0xff]  ;;  %v519_v29 = vld [vmem:[#allocation2 + $0x158] sm:$0xff]  ;;  %v9653_v33 = vpack.c.bf16 %v514_v23, %v510_v22  ;;  %v516_v34 = vld [vmem:[#allocation2 + $0x140] sm:$0xff] }
  0xab   :  { %6382 = vmatmul.mubr.msk.f32.gmra.mrb[2].mxu1 %vm212_vm3, %v167_v47  ;;  %6686 = vmatpush1.bf16.msra.mxu0 %v9592_v51  ;;  %v523_v32 = vld [vmem:[#allocation2 + $0x178] sm:$0xff]  ;;  %v520_v35 = vld [vmem:[#allocation2 + $0x160] sm:$0xff]  ;;  %v9657_v37 = vpack.c.bf16 %v521_v26, %v517_v25  ;;  %v518_v38 = vld [vmem:[#allocation2 + $0x150] sm:$0xff]  ;;  %v193_v22 = vshrl.u32 %v192_v20, 7 }
  0xac   :  { %6718 = vmatpush1.bf16.msra.mxu1 %v9596_v55  ;;  %326 = vmatprep.mubr.f32.mxu0 %v11571_v0  ;;  %v522_v40 = vld [vmem:[#allocation2 + $0x170] sm:$0xff]  ;;  %v9661_v41 = vpack.c.bf16 %v523_v32, %v519_v29  ;;  %v525_v42 = vld [vmem:[#allocation2 + $0x188] sm:$0xff]  ;;  %v9668_v46 = vpack.c.bf16 %v520_v35, %v516_v34  ;;  %v527_v47 = vld [vmem:[#allocation2 + $0x198] sm:$0xff] }
  0xad   :  { %439 = vmatprep.mubr.f32.mxu1 %v11571_v0  ;;  %6688 = vmatprep.subr.bf16.mxu0 %v9600_v58  ;;  %v529_v44 = vld [vmem:[#allocation2 + $0x1a8] sm:$0xff]  ;;  %v531_v49 = vld [vmem:[#allocation2 + $0x1b8] sm:$0xff]  ;;  %v9672_v50 = vpack.c.bf16 %v522_v40, %v518_v38  ;;  %v524_v52 = vld [vmem:[#allocation2 + $0x180] sm:$0xff]  ;;  %v9759_v23 = vsub.s32 0, %v193_v22  ;;  %v9764_v26 = vsub.s32 1, %v193_v22  ;;  %v9772_v34 = vsub.s32 3, %v193_v22 }
  0xae   :  { %6373 = vmatmul.mubr.msk.f32.gmra.mrb[4].mxu0 %vm212_vm3, %v168_v1  ;;  %6720 = vmatprep.subr.bf16.mxu1 %v9604_v61  ;;  %v171_v45 = vld [vmem:[%s11605_s20 + $0x28] sm:$0xff]  ;;  %v528_v53 = vld [vmem:[#allocation2 + $0x1a0] sm:$0xff]  ;;  %v9676_v54 = vpack.c.bf16 %v529_v44, %v525_v42  ;;  %v526_v56 = vld [vmem:[#allocation2 + $0x190] sm:$0xff]  ;;  %v9680_v59 = vpack.c.bf16 %v531_v49, %v527_v47 }
  0xaf   :  { %6383 = vmatmul.mubr.msk.f32.gmra.mrb[4].mxu1 %vm212_vm3, %v168_v1  ;;  %6690 = vmatpush1.bf16.msra.mxu0 %v9611_v2  ;;  %v530_v57 = vld [vmem:[#allocation2 + $0x1b0] sm:$0xff]  ;;  %v533_v60 = vld [vmem:[#allocation2 + $0x1c8] sm:$0xff]  ;;  %v9687_v1 = vpack.c.bf16 %v528_v53, %v524_v52  ;;  %v535_v3 = vld [vmem:[#allocation2 + $0x1d8] sm:$0xff]  ;;  %11606 = vst [vmem:[#allocation20_spill] sm:$0xff] %v9759_v23  ;;  %v9779_v52 = vsub.s32 2, %v193_v22 }
  0xb0   :  { %6722 = vmatpush1.bf16.msra.mxu1 %v9615_v5  ;;  %332 = vmatprep.mubr.f32.mxu0 %v11571_v0  ;;  %v537_v62 = vld [vmem:[#allocation2 + $0x1e8] sm:$0xff]  ;;  %v172_v63 = vld [vmem:[%s11605_s20 + $0x30] sm:$0xff]  ;;  %v539_v4 = vld [vmem:[#allocation2 + $0x1f8] sm:$0xff]  ;;  %v9691_v6 = vpack.c.bf16 %v530_v57, %v526_v56  ;;  %11607 = vst [vmem:[#allocation21_spill] sm:$0xff] %v9764_v26 }
  0xb1   :  { %445 = vmatprep.mubr.f32.mxu1 %v11571_v0  ;;  %6692 = vmatprep.subr.bf16.mxu0 %v9619_v8  ;;  %v532_v7 = vld [vmem:[#allocation2 + $0x1c0] sm:$0xff]  ;;  %v9695_v10 = vpack.c.bf16 %v537_v62, %v533_v60  ;;  %v534_v12 = vld [vmem:[#allocation2 + $0x1d0] sm:$0xff]  ;;  %v173_v16 = vld [vmem:[%s11605_s20 + $0x38] sm:$0xff]  ;;  %11608 = vst [vmem:[#allocation22_spill] sm:$0xff] %v9772_v34 }
  0xb2   :  { %6374 = vmatmul.mubr.msk.f32.gmra.mrb[6].mxu0 %vm212_vm3, %v169_v14  ;;  %6724 = vmatprep.subr.bf16.mxu1 %v9623_v11  ;;  %v536_v9 = vld [vmem:[#allocation2 + $0x1e0] sm:$0xff]  ;;  %v538_v13 = vld [vmem:[#allocation2 + $0x1f0] sm:$0xff]  ;;  %11609 = vst [vmem:[#allocation23_spill] sm:$0xff] %v9779_v52 }
  0xb3   :  { %6384 = vmatmul.mubr.msk.f32.gmra.mrb[6].mxu1 %vm212_vm3, %v169_v14  ;;  %6694 = vmatpush1.bf16.msra.mxu0 %v9630_v15  ;;  %v9699_v14 = vpack.c.bf16 %v539_v4, %v535_v3  ;;  %v9706_v17 = vpack.c.bf16 %v536_v9, %v532_v7  ;;  %v9710_v19 = vpack.c.bf16 %v538_v13, %v534_v12  ;;  %v190_v25 = vld [vmem:[%s11551_s4] sm:$0xf] }
  0xb4   :  { %6726 = vmatpush1.bf16.msra.mxu1 %v9634_v18  ;;  %338 = vmatprep.mubr.f32.mxu0 %v11571_v0  ;;  %v9770_v29 = vrot.slane %v190_v25, %v9764_v26  ;;  %v9777_v49 = vrot.slane %v190_v25, %v9772_v34  ;;  %v9783_v56 = vrot.slane %v190_v25, %v9779_v52 }
  0xb5   :  { %451 = vmatprep.mubr.f32.mxu1 %v11571_v0  ;;  %6696 = vmatprep.subr.bf16.mxu0 %v9638_v21 }
  0xb6   :  { %6375 = vmatmul.mubr.msk.f32.gmra.mrb[8].mxu0 %vm212_vm3, %v170_v27  ;;  %6728 = vmatprep.subr.bf16.mxu1 %v9642_v24 }
  0xb7   :  { %6385 = vmatmul.mubr.msk.f32.gmra.mrb[8].mxu1 %vm212_vm3, %v170_v27  ;;  %6698 = vmatpush1.bf16.msra.mxu0 %v9649_v28  ;;  %v9767_v27 = vrot.slane %v190_v25, %v9759_v23 }
  0xb8   :  { %6730 = vmatpush1.bf16.msra.mxu1 %v9653_v33  ;;  %344 = vmatprep.mubr.f32.mxu0 %v11571_v0 }
  0xb9   :  { %457 = vmatprep.mubr.f32.mxu1 %v11571_v0  ;;  %6700 = vmatprep.subr.bf16.mxu0 %v9657_v37 }
  0xba   :  { %6376 = vmatmul.mubr.msk.f32.gmra.mrb[10].mxu0 %vm212_vm3, %v171_v45  ;;  %6732 = vmatprep.subr.bf16.mxu1 %v9661_v41 }
  0xbb   :  { %6386 = vmatmul.mubr.msk.f32.gmra.mrb[10].mxu1 %vm212_vm3, %v171_v45  ;;  %6702 = vmatpush1.bf16.msra.mxu0 %v9668_v46 }
  0xbc   :  { %6734 = vmatpush1.bf16.msra.mxu1 %v9672_v50  ;;  %350 = vmatprep.mubr.f32.mxu0 %v11571_v0 }
  0xbd   :  { %463 = vmatprep.mubr.f32.mxu1 %v11571_v0  ;;  %6704 = vmatprep.subr.bf16.mxu0 %v9676_v54 }
  0xbe   :  { %6377 = vmatmul.mubr.msk.f32.gmra.mrb[12].mxu0 %vm212_vm3, %v172_v63  ;;  %6736 = vmatprep.subr.bf16.mxu1 %v9680_v59 }
  0xbf   :  { %6387 = vmatmul.mubr.msk.f32.gmra.mrb[12].mxu1 %vm212_vm3, %v172_v63  ;;  %6706 = vmatpush1.bf16.msra.mxu0 %v9687_v1 }
  0xc0   :  { %6738 = vmatpush1.bf16.msra.mxu1 %v9691_v6  ;;  %356 = vmatprep.mubr.f32.mxu0 %v11571_v0 }
  0xc1   :  { %469 = vmatprep.mubr.f32.mxu1 %v11571_v0  ;;  %6708 = vmatprep.subr.bf16.mxu0 %v9695_v10 }
  0xc2   :  { %6378 = vmatmul.mubr.msk.f32.gmra.mrb[14].mxu0 %vm212_vm3, %v173_v16  ;;  %6740 = vmatprep.subr.bf16.mxu1 %v9699_v14 }
  0xc3   :  { %6388 = vmatmul.mubr.msk.f32.gmra.mrb[14].mxu1 %vm212_vm3, %v173_v16  ;;  %6710 = vmatpush1.bf16.msra.mxu0 %v9706_v17 }
  0xc4   :  { %6742 = vmatpush1.bf16.msra.mxu1 %v9710_v19  ;;  %604 = vmatprep.mubr.f32.mxu0 %v11571_v0 }
  0xc5   :  { %675 = vmatprep.mubr.f32.mxu1 %v11571_v0  ;;  %6744 = vmatprep.subr.bf16.mxu0 %v9565_v30 }
  0xc6   :  { %605 = vmatmul.mubr.f32.vlgmr.msra.gmra.mrb[0].mxu0 %v11571_v0  ;;  %6776 = vmatprep.subr.bf16.mxu1 %v9567_v31 }
  0xc7   :  { %676 = vmatmul.mubr.f32.vlgmr.msra.gmra.mrb[0].mxu1 %v11571_v0  ;;  %6746 = vmatpush1.bf16.msra.mxu0 %v9574_v36 }
  0xc8   :  { %6778 = vmatpush1.bf16.msra.mxu1 %v9579_v39  ;;  %6748 = vmatprep.subr.bf16.mxu0 %v9582_v43 }
  0xc9   :  { %6780 = vmatprep.subr.bf16.mxu1 %v9588_v48  ;;  %774 = vmatprep.mubr.f32.mxu0 %v11571_v0 }
  0xca   :  { %845 = vmatprep.mubr.f32.mxu1 %v11571_v0 }
  0xcb   :  { %6750 = vmatpush1.bf16.msra.mxu0 %v9592_v51 }
  0xcc   :  { %6782 = vmatpush1.bf16.msra.mxu1 %v9596_v55  ;;  %6752 = vmatprep.subr.bf16.mxu0 %v9600_v58 }
  0xcd   :  { %6784 = vmatprep.subr.bf16.mxu1 %v9604_v61 }
  0xcf   :  { %6754 = vmatpush1.bf16.msra.mxu0 %v9611_v2 }
  0xd0   :  { %6786 = vmatpush1.bf16.msra.mxu1 %v9615_v5  ;;  %6756 = vmatprep.subr.bf16.mxu0 %v9619_v8 }
  0xd1   :  { %6788 = vmatprep.subr.bf16.mxu1 %v9623_v11 }
  0xd3   :  { %6758 = vmatpush1.bf16.msra.mxu0 %v9630_v15 }
  0xd4   :  { %6790 = vmatpush1.bf16.msra.mxu1 %v9634_v18  ;;  %6760 = vmatprep.subr.bf16.mxu0 %v9638_v21 }
  0xd5   :  { %6792 = vmatprep.subr.bf16.mxu1 %v9642_v24 }
  0xd7   :  { %6762 = vmatpush1.bf16.msra.mxu0 %v9649_v28 }
  0xd8   :  { %6794 = vmatpush1.bf16.msra.mxu1 %v9653_v33  ;;  %6764 = vmatprep.subr.bf16.mxu0 %v9657_v37 }
  0xd9   :  { %6796 = vmatprep.subr.bf16.mxu1 %v9661_v41 }
  0xdb   :  { %6766 = vmatpush1.bf16.msra.mxu0 %v9668_v46 }
  0xdc   :  { %6798 = vmatpush1.bf16.msra.mxu1 %v9672_v50  ;;  %6768 = vmatprep.subr.bf16.mxu0 %v9676_v54 }
  0xdd   :  { %6800 = vmatprep.subr.bf16.mxu1 %v9680_v59 }
  0xdf   :  { %6770 = vmatpush1.bf16.msra.mxu0 %v9687_v1 }
  0xe0   :  { %6802 = vmatpush1.bf16.msra.mxu1 %v9691_v6  ;;  %6772 = vmatprep.subr.bf16.mxu0 %v9695_v10 }
  0xe1   :  { %6804 = vmatprep.subr.bf16.mxu1 %v9699_v14 }
  0xe3   :  { %6774 = vmatpush1.bf16.msra.mxu0 %v9706_v17 }
  0xe4   :  { %6806 = vmatpush1.bf16.msra.mxu1 %v9710_v19  ;;  %6808 = vmatprep.subr.bf16.mxu0 %v9565_v30 }
  0xe5   :  { %6840 = vmatprep.subr.bf16.mxu1 %v9567_v31 }
 0x199   :  { %v606_v32 = vpop.f32.mrb[0].mxu0 }
 0x19a   :  { %v8359_v35 = vadd.f32 %v606_v32, %v9767_v27  ;;  %v677_v38 = vpop.f32.mrb[0].mxu1  ;;  %v608_v40 = vpop.f32.mrb[1].mxu0 }
 0x19b   :  { %v8360_v42 = vadd.f32 %v608_v40, %v9770_v29  ;;  %v679_v44 = vpop.f32.mrb[1].mxu1  ;;  %v8375_v60 = vadd.f32 %v677_v38, %v9783_v56 }
 0x19c   :  { %v6389_v45 = vmul.f32 -1.442695, %v8359_v35  ;;  %v8376_v53 = vadd.f32 %v679_v44, %v9777_v49 }
 0x19d   :  { %v6390_v47 = vmul.f32 -1.442695, %v8360_v42 }
 0x19e   :  { %8512 = vpow2.f32 %v6389_v45  ;;  %v6391_v57 = vmul.f32 -1.442695, %v8376_v53 }
 0x19f   :  { %8514 = vpow2.f32 %v6390_v47 }
 0x1a0   :  { %8516 = vpow2.f32 %v6391_v57 }
 0x1a1   :  { %8518 = vtanh.f32 %v8375_v60 }
 0x1a8   :  { %v8513_v62 = vpop.eup %8512 }
 0x1a9   :  { %v8515_v63 = vpop.eup %8514  ;;  %v689_v3 = vadd.f32 1.0, %v8513_v62 }
 0x1aa   :  { %v695_v4 = vadd.f32 1.0, %v8515_v63  ;;  %v8517_v7 = vpop.eup %8516 }
 0x1ab   :  { %8520 = vrcp.f32 %v689_v3  ;;  %v8519_v9 = vpop.eup %8518  ;;  %v702_v20 = vadd.f32 1.0, %v8517_v7 }
 0x1ac   :  { %8522 = vrcp.f32 %v695_v4 }
 0x1ad   :  { %8524 = vrcp.f32 %v702_v20 }
 0x1b5   :  { %v8521_v12 = vpop.eup %8520 }
 0x1b6   :  { %v8523_v13 = vpop.eup %8522  ;;  %v706_v16 = vmul.f32 %v8521_v12, %v8519_v9 }
 0x1b7   :  { %v705_v22 = vmul.f32 0.0, %v8523_v13  ;;  %v8525_v32 = vpop.eup %8524 }
 0x1b9   :  { %v9786_v25 = vadd.f32 %v706_v16, %v705_v22 }
 0x1bb   :  { %8526 = vtanh.f32 %v9786_v25 }
 0x1c5   :  { %v8527_v35 = vpop.eup %8526 }
 0x1c6   :  { %v709_v38 = vmul.f32 %v8527_v35, %v8525_v32 }
 0x1c8   :  { %775 = vmatmul.mubr.f32.vlgmr.msra.gmra.mrb[2].mxu0 %v709_v38  ;;  %846 = vmatmul.mubr.f32.vlgmr.msra.gmra.mrb[2].mxu1 %v709_v38 }
 0x1c9   :  { %6810 = vmatpush1.bf16.msra.mxu0 %v9574_v36  ;;  %6842 = vmatpush1.bf16.msra.mxu1 %v9579_v39 }
 0x1ca   :  { %6812 = vmatprep.subr.bf16.mxu0 %v9582_v43  ;;  %6844 = vmatprep.subr.bf16.mxu1 %v9588_v48 }
 0x1cb   :  { %944 = vmatprep.mubr.f32.mxu0 %v11571_v0  ;;  %1015 = vmatprep.mubr.f32.mxu1 %v11571_v0 }
 0x1cd   :  { %6814 = vmatpush1.bf16.msra.mxu0 %v9592_v51  ;;  %6846 = vmatpush1.bf16.msra.mxu1 %v9596_v55 }
 0x1ce   :  { %6816 = vmatprep.subr.bf16.mxu0 %v9600_v58  ;;  %6848 = vmatprep.subr.bf16.mxu1 %v9604_v61 }
 0x1d1   :  { %6818 = vmatpush1.bf16.msra.mxu0 %v9611_v2  ;;  %6850 = vmatpush1.bf16.msra.mxu1 %v9615_v5 }
 0x1d2   :  { %6820 = vmatprep.subr.bf16.mxu0 %v9619_v8  ;;  %6852 = vmatprep.subr.bf16.mxu1 %v9623_v11 }
 0x1d5   :  { %6822 = vmatpush1.bf16.msra.mxu0 %v9630_v15  ;;  %6854 = vmatpush1.bf16.msra.mxu1 %v9634_v18 }
 0x1d6   :  { %6824 = vmatprep.subr.bf16.mxu0 %v9638_v21  ;;  %6856 = vmatprep.subr.bf16.mxu1 %v9642_v24 }
 0x1d9   :  { %6826 = vmatpush1.bf16.msra.mxu0 %v9649_v28  ;;  %6858 = vmatpush1.bf16.msra.mxu1 %v9653_v33 }
 0x1da   :  { %6828 = vmatprep.subr.bf16.mxu0 %v9657_v37  ;;  %6860 = vmatprep.subr.bf16.mxu1 %v9661_v41 }
 0x1dd   :  { %6830 = vmatpush1.bf16.msra.mxu0 %v9668_v46  ;;  %6862 = vmatpush1.bf16.msra.mxu1 %v9672_v50 }
 0x1de   :  { %6832 = vmatprep.subr.bf16.mxu0 %v9676_v54  ;;  %6864 = vmatprep.subr.bf16.mxu1 %v9680_v59 }
 0x1e1   :  { %6834 = vmatpush1.bf16.msra.mxu0 %v9687_v1  ;;  %6866 = vmatpush1.bf16.msra.mxu1 %v9691_v6 }
 0x1e2   :  { %6836 = vmatprep.subr.bf16.mxu0 %v9695_v10  ;;  %6868 = vmatprep.subr.bf16.mxu1 %v9699_v14 }
 0x1e5   :  { %6838 = vmatpush1.bf16.msra.mxu0 %v9706_v17  ;;  %6870 = vmatpush1.bf16.msra.mxu1 %v9710_v19 }
 0x1e6   :  { %6872 = vmatprep.subr.bf16.mxu0 %v9565_v30  ;;  %6904 = vmatprep.subr.bf16.mxu1 %v9567_v31 }
 0x29b   :  { %v776_v40 = vpop.f32.mrb[2].mxu0  ;;  %v847_v42 = vpop.f32.mrb[2].mxu1 }
 0x29c   :  { %v8361_v44 = vadd.f32 %v776_v40, %v9767_v27  ;;  %v778_v45 = vpop.f32.mrb[3].mxu0  ;;  %v849_v47 = vpop.f32.mrb[3].mxu1  ;;  %v8377_v3 = vadd.f32 %v847_v42, %v9783_v56 }
 0x29d   :  { %v8362_v53 = vadd.f32 %v778_v45, %v9770_v29  ;;  %v8378_v62 = vadd.f32 %v849_v47, %v9777_v49 }
 0x29e   :  { %v6392_v57 = vmul.f32 -1.442695, %v8361_v44 }
 0x29f   :  { %v6393_v60 = vmul.f32 -1.442695, %v8362_v53  ;;  %v6394_v63 = vmul.f32 -1.442695, %v8378_v62 }
 0x2a0   :  { %8528 = vpow2.f32 %v6392_v57 }
 0x2a1   :  { %8530 = vpow2.f32 %v6393_v60 }
 0x2a2   :  { %8532 = vpow2.f32 %v6394_v63 }
 0x2a3   :  { %8534 = vtanh.f32 %v8377_v3 }
 0x2aa   :  { %v8529_v4 = vpop.eup %8528 }
 0x2ab   :  { %v8531_v7 = vpop.eup %8530  ;;  %v859_v9 = vadd.f32 1.0, %v8529_v4 }
 0x2ac   :  { %v865_v12 = vadd.f32 1.0, %v8531_v7  ;;  %v8533_v13 = vpop.eup %8532 }
 0x2ad   :  { %8536 = vrcp.f32 %v859_v9  ;;  %v8535_v16 = vpop.eup %8534  ;;  %v872_v35 = vadd.f32 1.0, %v8533_v13 }
 0x2ae   :  { %8538 = vrcp.f32 %v865_v12 }
 0x2af   :  { %8540 = vrcp.f32 %v872_v35 }
 0x2b7   :  { %v8537_v20 = vpop.eup %8536 }
 0x2b8   :  { %v8539_v22 = vpop.eup %8538  ;;  %v876_v32 = vmul.f32 %v8537_v20, %v8535_v16 }
 0x2b9   :  { %v875_v38 = vmul.f32 %v8539_v22, %v9786_v25  ;;  %v8541_v42 = vpop.eup %8540 }
 0x2bb   :  { %v9828_v40 = vadd.f32 %v876_v32, %v875_v38 }
 0x2bd   :  { %8542 = vtanh.f32 %v9828_v40 }
 0x2c7   :  { %v8543_v44 = vpop.eup %8542 }
 0x2c8   :  { %v879_v45 = vmul.f32 %v8543_v44, %v8541_v42 }
 0x2ca   :  { %945 = vmatmul.mubr.f32.vlgmr.msra.gmra.mrb[4].mxu0 %v879_v45  ;;  %1016 = vmatmul.mubr.f32.vlgmr.msra.gmra.mrb[4].mxu1 %v879_v45 }
 0x2cb   :  { %6874 = vmatpush1.bf16.msra.mxu0 %v9574_v36  ;;  %6906 = vmatpush1.bf16.msra.mxu1 %v9579_v39 }
 0x2cc   :  { %6876 = vmatprep.subr.bf16.mxu0 %v9582_v43  ;;  %6908 = vmatprep.subr.bf16.mxu1 %v9588_v48 }
 0x2cd   :  { %1114 = vmatprep.mubr.f32.mxu0 %v11571_v0  ;;  %1185 = vmatprep.mubr.f32.mxu1 %v11571_v0 }
 0x2cf   :  { %6878 = vmatpush1.bf16.msra.mxu0 %v9592_v51  ;;  %6910 = vmatpush1.bf16.msra.mxu1 %v9596_v55 }
 0x2d0   :  { %6880 = vmatprep.subr.bf16.mxu0 %v9600_v58  ;;  %6912 = vmatprep.subr.bf16.mxu1 %v9604_v61 }
 0x2d3   :  { %6882 = vmatpush1.bf16.msra.mxu0 %v9611_v2  ;;  %6914 = vmatpush1.bf16.msra.mxu1 %v9615_v5 }
 0x2d4   :  { %6884 = vmatprep.subr.bf16.mxu0 %v9619_v8  ;;  %6916 = vmatprep.subr.bf16.mxu1 %v9623_v11 }
 0x2d7   :  { %6886 = vmatpush1.bf16.msra.mxu0 %v9630_v15  ;;  %6918 = vmatpush1.bf16.msra.mxu1 %v9634_v18 }
 0x2d8   :  { %6888 = vmatprep.subr.bf16.mxu0 %v9638_v21  ;;  %6920 = vmatprep.subr.bf16.mxu1 %v9642_v24 }
 0x2db   :  { %6890 = vmatpush1.bf16.msra.mxu0 %v9649_v28  ;;  %6922 = vmatpush1.bf16.msra.mxu1 %v9653_v33 }
 0x2dc   :  { %6892 = vmatprep.subr.bf16.mxu0 %v9657_v37  ;;  %6924 = vmatprep.subr.bf16.mxu1 %v9661_v41 }
 0x2df   :  { %6894 = vmatpush1.bf16.msra.mxu0 %v9668_v46  ;;  %6926 = vmatpush1.bf16.msra.mxu1 %v9672_v50 }
 0x2e0   :  { %6896 = vmatprep.subr.bf16.mxu0 %v9676_v54  ;;  %6928 = vmatprep.subr.bf16.mxu1 %v9680_v59 }
 0x2e3   :  { %6898 = vmatpush1.bf16.msra.mxu0 %v9687_v1  ;;  %6930 = vmatpush1.bf16.msra.mxu1 %v9691_v6 }
 0x2e4   :  { %6900 = vmatprep.subr.bf16.mxu0 %v9695_v10  ;;  %6932 = vmatprep.subr.bf16.mxu1 %v9699_v14 }
 0x2e7   :  { %6902 = vmatpush1.bf16.msra.mxu0 %v9706_v17  ;;  %6934 = vmatpush1.bf16.msra.mxu1 %v9710_v19 }
 0x2e8   :  { %6936 = vmatprep.subr.bf16.mxu0 %v9565_v30  ;;  %6968 = vmatprep.subr.bf16.mxu1 %v9567_v31 }
 0x39d   :  { %v946_v25 = vpop.f32.mrb[4].mxu0  ;;  %v1017_v47 = vpop.f32.mrb[4].mxu1 }
 0x39e   :  { %v8363_v53 = vadd.f32 %v946_v25, %v9767_v27  ;;  %v948_v57 = vpop.f32.mrb[5].mxu0  ;;  %v1019_v60 = vpop.f32.mrb[5].mxu1  ;;  %v8379_v9 = vadd.f32 %v1017_v47, %v9783_v56 }
 0x39f   :  { %v8364_v62 = vadd.f32 %v948_v57, %v9770_v29  ;;  %v8380_v4 = vadd.f32 %v1019_v60, %v9777_v49 }
 0x3a0   :  { %v6395_v63 = vmul.f32 -1.442695, %v8363_v53 }
 0x3a1   :  { %v6396_v3 = vmul.f32 -1.442695, %v8364_v62  ;;  %v6397_v7 = vmul.f32 -1.442695, %v8380_v4 }
 0x3a2   :  { %8544 = vpow2.f32 %v6395_v63 }
 0x3a3   :  { %8546 = vpow2.f32 %v6396_v3 }
 0x3a4   :  { %8548 = vpow2.f32 %v6397_v7 }
 0x3a5   :  { %8550 = vtanh.f32 %v8379_v9 }
 0x3ac   :  { %v8545_v12 = vpop.eup %8544 }
 0x3ad   :  { %v8547_v13 = vpop.eup %8546  ;;  %v1029_v16 = vadd.f32 1.0, %v8545_v12 }
 0x3ae   :  { %v1035_v20 = vadd.f32 1.0, %v8547_v13  ;;  %v8549_v22 = vpop.eup %8548 }
 0x3af   :  { %8552 = vrcp.f32 %v1029_v16  ;;  %v8551_v32 = vpop.eup %8550  ;;  %v1042_v44 = vadd.f32 1.0, %v8549_v22 }
 0x3b0   :  { %8554 = vrcp.f32 %v1035_v20 }
 0x3b1   :  { %8556 = vrcp.f32 %v1042_v44 }
 0x3b9   :  { %v8553_v35 = vpop.eup %8552 }
 0x3ba   :  { %v8555_v38 = vpop.eup %8554  ;;  %v1046_v42 = vmul.f32 %v8553_v35, %v8551_v32 }
 0x3bb   :  { %v1045_v45 = vmul.f32 %v8555_v38, %v9828_v40  ;;  %v8557_v47 = vpop.eup %8556 }
 0x3bd   :  { %v9870_v25 = vadd.f32 %v1046_v42, %v1045_v45 }
 0x3bf   :  { %8558 = vtanh.f32 %v9870_v25 }
 0x3c9   :  { %v8559_v53 = vpop.eup %8558 }
 0x3ca   :  { %v1049_v57 = vmul.f32 %v8559_v53, %v8557_v47 }
 0x3cc   :  { %1115 = vmatmul.mubr.f32.vlgmr.msra.gmra.mrb[6].mxu0 %v1049_v57  ;;  %1186 = vmatmul.mubr.f32.vlgmr.msra.gmra.mrb[6].mxu1 %v1049_v57 }
 0x3cd   :  { %6938 = vmatpush1.bf16.msra.mxu0 %v9574_v36  ;;  %6970 = vmatpush1.bf16.msra.mxu1 %v9579_v39 }
 0x3ce   :  { %6940 = vmatprep.subr.bf16.mxu0 %v9582_v43  ;;  %6972 = vmatprep.subr.bf16.mxu1 %v9588_v48 }
 0x3cf   :  { %1284 = vmatprep.mubr.f32.mxu0 %v11571_v0  ;;  %1355 = vmatprep.mubr.f32.mxu1 %v11571_v0 }
 0x3d1   :  { %6942 = vmatpush1.bf16.msra.mxu0 %v9592_v51  ;;  %6974 = vmatpush1.bf16.msra.mxu1 %v9596_v55 }
 0x3d2   :  { %6944 = vmatprep.subr.bf16.mxu0 %v9600_v58  ;;  %6976 = vmatprep.subr.bf16.mxu1 %v9604_v61 }
 0x3d5   :  { %6946 = vmatpush1.bf16.msra.mxu0 %v9611_v2  ;;  %6978 = vmatpush1.bf16.msra.mxu1 %v9615_v5 }
 0x3d6   :  { %6948 = vmatprep.subr.bf16.mxu0 %v9619_v8  ;;  %6980 = vmatprep.subr.bf16.mxu1 %v9623_v11 }
 0x3d9   :  { %6950 = vmatpush1.bf16.msra.mxu0 %v9630_v15  ;;  %6982 = vmatpush1.bf16.msra.mxu1 %v9634_v18 }
 0x3da   :  { %6952 = vmatprep.subr.bf16.mxu0 %v9638_v21  ;;  %6984 = vmatprep.subr.bf16.mxu1 %v9642_v24 }
 0x3dd   :  { %6954 = vmatpush1.bf16.msra.mxu0 %v9649_v28  ;;  %6986 = vmatpush1.bf16.msra.mxu1 %v9653_v33 }
 0x3de   :  { %6956 = vmatprep.subr.bf16.mxu0 %v9657_v37  ;;  %6988 = vmatprep.subr.bf16.mxu1 %v9661_v41 }
 0x3e1   :  { %6958 = vmatpush1.bf16.msra.mxu0 %v9668_v46  ;;  %6990 = vmatpush1.bf16.msra.mxu1 %v9672_v50 }
 0x3e2   :  { %6960 = vmatprep.subr.bf16.mxu0 %v9676_v54  ;;  %6992 = vmatprep.subr.bf16.mxu1 %v9680_v59 }
 0x3e5   :  { %6962 = vmatpush1.bf16.msra.mxu0 %v9687_v1  ;;  %6994 = vmatpush1.bf16.msra.mxu1 %v9691_v6 }
 0x3e6   :  { %6964 = vmatprep.subr.bf16.mxu0 %v9695_v10  ;;  %6996 = vmatprep.subr.bf16.mxu1 %v9699_v14 }
 0x3e9   :  { %6966 = vmatpush1.bf16.msra.mxu0 %v9706_v17  ;;  %6998 = vmatpush1.bf16.msra.mxu1 %v9710_v19 }
 0x3ea   :  { %7000 = vmatprep.subr.bf16.mxu0 %v9565_v30  ;;  %7032 = vmatprep.subr.bf16.mxu1 %v9567_v31 }
 0x49f   :  { %v1116_v40 = vpop.f32.mrb[6].mxu0  ;;  %v1187_v60 = vpop.f32.mrb[6].mxu1 }
 0x4a0   :  { %v8365_v62 = vadd.f32 %v1116_v40, %v9767_v27  ;;  %v1118_v63 = vpop.f32.mrb[7].mxu0  ;;  %v1189_v3 = vpop.f32.mrb[7].mxu1  ;;  %v8381_v16 = vadd.f32 %v1187_v60, %v9783_v56 }
 0x4a1   :  { %v8366_v4 = vadd.f32 %v1118_v63, %v9770_v29  ;;  %v8382_v12 = vadd.f32 %v1189_v3, %v9777_v49 }
 0x4a2   :  { %v6398_v7 = vmul.f32 -1.442695, %v8365_v62 }
 0x4a3   :  { %v6399_v9 = vmul.f32 -1.442695, %v8366_v4  ;;  %v6400_v13 = vmul.f32 -1.442695, %v8382_v12 }
 0x4a4   :  { %8560 = vpow2.f32 %v6398_v7 }
 0x4a5   :  { %8562 = vpow2.f32 %v6399_v9 }
 0x4a6   :  { %8564 = vpow2.f32 %v6400_v13 }
 0x4a7   :  { %8566 = vtanh.f32 %v8381_v16 }
 0x4ae   :  { %v8561_v20 = vpop.eup %8560 }
 0x4af   :  { %v8563_v22 = vpop.eup %8562  ;;  %v1199_v32 = vadd.f32 1.0, %v8561_v20 }
 0x4b0   :  { %v1205_v35 = vadd.f32 1.0, %v8563_v22  ;;  %v8565_v38 = vpop.eup %8564 }
 0x4b1   :  { %8568 = vrcp.f32 %v1199_v32  ;;  %v8567_v42 = vpop.eup %8566  ;;  %v1212_v53 = vadd.f32 1.0, %v8565_v38 }
 0x4b2   :  { %8570 = vrcp.f32 %v1205_v35 }
 0x4b3   :  { %8572 = vrcp.f32 %v1212_v53 }
 0x4bb   :  { %v8569_v44 = vpop.eup %8568 }
 0x4bc   :  { %v8571_v45 = vpop.eup %8570  ;;  %v1216_v47 = vmul.f32 %v8569_v44, %v8567_v42 }
 0x4bd   :  { %v1215_v57 = vmul.f32 %v8571_v45, %v9870_v25  ;;  %v8573_v60 = vpop.eup %8572 }
 0x4bf   :  { %v9912_v40 = vadd.f32 %v1216_v47, %v1215_v57 }
 0x4c1   :  { %8574 = vtanh.f32 %v9912_v40 }
 0x4cb   :  { %v8575_v62 = vpop.eup %8574 }
 0x4cc   :  { %v1219_v63 = vmul.f32 %v8575_v62, %v8573_v60 }
 0x4ce   :  { %1285 = vmatmul.mubr.f32.vlgmr.msra.gmra.mrb[8].mxu0 %v1219_v63  ;;  %1356 = vmatmul.mubr.f32.vlgmr.msra.gmra.mrb[8].mxu1 %v1219_v63 }
 0x4cf   :  { %7002 = vmatpush1.bf16.msra.mxu0 %v9574_v36  ;;  %7034 = vmatpush1.bf16.msra.mxu1 %v9579_v39 }
 0x4d0   :  { %7004 = vmatprep.subr.bf16.mxu0 %v9582_v43  ;;  %7036 = vmatprep.subr.bf16.mxu1 %v9588_v48 }
 0x4d1   :  { %1454 = vmatprep.mubr.f32.mxu0 %v11571_v0  ;;  %1525 = vmatprep.mubr.f32.mxu1 %v11571_v0 }
 0x4d3   :  { %7006 = vmatpush1.bf16.msra.mxu0 %v9592_v51  ;;  %7038 = vmatpush1.bf16.msra.mxu1 %v9596_v55 }
 0x4d4   :  { %7008 = vmatprep.subr.bf16.mxu0 %v9600_v58  ;;  %7040 = vmatprep.subr.bf16.mxu1 %v9604_v61 }
 0x4d7   :  { %7010 = vmatpush1.bf16.msra.mxu0 %v9611_v2  ;;  %7042 = vmatpush1.bf16.msra.mxu1 %v9615_v5 }
 0x4d8   :  { %7012 = vmatprep.subr.bf16.mxu0 %v9619_v8  ;;  %7044 = vmatprep.subr.bf16.mxu1 %v9623_v11 }
 0x4db   :  { %7014 = vmatpush1.bf16.msra.mxu0 %v9630_v15  ;;  %7046 = vmatpush1.bf16.msra.mxu1 %v9634_v18 }
 0x4dc   :  { %7016 = vmatprep.subr.bf16.mxu0 %v9638_v21  ;;  %7048 = vmatprep.subr.bf16.mxu1 %v9642_v24 }
 0x4df   :  { %7018 = vmatpush1.bf16.msra.mxu0 %v9649_v28  ;;  %7050 = vmatpush1.bf16.msra.mxu1 %v9653_v33 }
 0x4e0   :  { %7020 = vmatprep.subr.bf16.mxu0 %v9657_v37  ;;  %7052 = vmatprep.subr.bf16.mxu1 %v9661_v41 }
 0x4e3   :  { %7022 = vmatpush1.bf16.msra.mxu0 %v9668_v46  ;;  %7054 = vmatpush1.bf16.msra.mxu1 %v9672_v50 }
 0x4e4   :  { %7024 = vmatprep.subr.bf16.mxu0 %v9676_v54  ;;  %7056 = vmatprep.subr.bf16.mxu1 %v9680_v59 }
 0x4e7   :  { %7026 = vmatpush1.bf16.msra.mxu0 %v9687_v1  ;;  %7058 = vmatpush1.bf16.msra.mxu1 %v9691_v6 }
 0x4e8   :  { %7028 = vmatprep.subr.bf16.mxu0 %v9695_v10  ;;  %7060 = vmatprep.subr.bf16.mxu1 %v9699_v14 }
 0x4eb   :  { %7030 = vmatpush1.bf16.msra.mxu0 %v9706_v17  ;;  %7062 = vmatpush1.bf16.msra.mxu1 %v9710_v19 }
 0x4ec   :  { %7064 = vmatprep.subr.bf16.mxu0 %v9565_v30  ;;  %7096 = vmatprep.subr.bf16.mxu1 %v9567_v31 }
 0x5a1   :  { %v1286_v25 = vpop.f32.mrb[8].mxu0  ;;  %v1357_v3 = vpop.f32.mrb[8].mxu1 }
 0x5a2   :  { %v8367_v4 = vadd.f32 %v1286_v25, %v9767_v27  ;;  %v1288_v7 = vpop.f32.mrb[9].mxu0  ;;  %v1359_v9 = vpop.f32.mrb[9].mxu1  ;;  %v8383_v32 = vadd.f32 %v1357_v3, %v9783_v56 }
 0x5a3   :  { %v8368_v12 = vadd.f32 %v1288_v7, %v9770_v29  ;;  %v8384_v20 = vadd.f32 %v1359_v9, %v9777_v49 }
 0x5a4   :  { %v6401_v13 = vmul.f32 -1.442695, %v8367_v4 }
 0x5a5   :  { %v6402_v16 = vmul.f32 -1.442695, %v8368_v12  ;;  %v6403_v22 = vmul.f32 -1.442695, %v8384_v20 }
 0x5a6   :  { %8576 = vpow2.f32 %v6401_v13 }
 0x5a7   :  { %8578 = vpow2.f32 %v6402_v16 }
 0x5a8   :  { %8580 = vpow2.f32 %v6403_v22 }
 0x5a9   :  { %8582 = vtanh.f32 %v8383_v32 }
 0x5b0   :  { %v8577_v35 = vpop.eup %8576 }
 0x5b1   :  { %v8579_v38 = vpop.eup %8578  ;;  %v1369_v42 = vadd.f32 1.0, %v8577_v35 }
 0x5b2   :  { %v1375_v44 = vadd.f32 1.0, %v8579_v38  ;;  %v8581_v45 = vpop.eup %8580 }
 0x5b3   :  { %8584 = vrcp.f32 %v1369_v42  ;;  %v8583_v47 = vpop.eup %8582  ;;  %v1382_v62 = vadd.f32 1.0, %v8581_v45 }
 0x5b4   :  { %8586 = vrcp.f32 %v1375_v44 }
 0x5b5   :  { %8588 = vrcp.f32 %v1382_v62 }
 0x5bd   :  { %v8585_v53 = vpop.eup %8584 }
 0x5be   :  { %v8587_v57 = vpop.eup %8586  ;;  %v1386_v60 = vmul.f32 %v8585_v53, %v8583_v47 }
 0x5bf   :  { %v1385_v63 = vmul.f32 %v8587_v57, %v9912_v40  ;;  %v8589_v3 = vpop.eup %8588 }
 0x5c1   :  { %v9954_v25 = vadd.f32 %v1386_v60, %v1385_v63 }
 0x5c3   :  { %8590 = vtanh.f32 %v9954_v25 }
 0x5cd   :  { %v8591_v4 = vpop.eup %8590 }
 0x5ce   :  { %v1389_v7 = vmul.f32 %v8591_v4, %v8589_v3 }
 0x5d0   :  { %1455 = vmatmul.mubr.f32.vlgmr.msra.gmra.mrb[10].mxu0 %v1389_v7  ;;  %1526 = vmatmul.mubr.f32.vlgmr.msra.gmra.mrb[10].mxu1 %v1389_v7 }
 0x5d1   :  { %7066 = vmatpush1.bf16.msra.mxu0 %v9574_v36  ;;  %7098 = vmatpush1.bf16.msra.mxu1 %v9579_v39 }
 0x5d2   :  { %7068 = vmatprep.subr.bf16.mxu0 %v9582_v43  ;;  %7100 = vmatprep.subr.bf16.mxu1 %v9588_v48 }
 0x5d3   :  { %1624 = vmatprep.mubr.f32.mxu0 %v11571_v0  ;;  %1695 = vmatprep.mubr.f32.mxu1 %v11571_v0 }
 0x5d5   :  { %7070 = vmatpush1.bf16.msra.mxu0 %v9592_v51  ;;  %7102 = vmatpush1.bf16.msra.mxu1 %v9596_v55 }
 0x5d6   :  { %7072 = vmatprep.subr.bf16.mxu0 %v9600_v58  ;;  %7104 = vmatprep.subr.bf16.mxu1 %v9604_v61 }
 0x5d9   :  { %7074 = vmatpush1.bf16.msra.mxu0 %v9611_v2  ;;  %7106 = vmatpush1.bf16.msra.mxu1 %v9615_v5 }
 0x5da   :  { %7076 = vmatprep.subr.bf16.mxu0 %v9619_v8  ;;  %7108 = vmatprep.subr.bf16.mxu1 %v9623_v11 }
 0x5dd   :  { %7078 = vmatpush1.bf16.msra.mxu0 %v9630_v15  ;;  %7110 = vmatpush1.bf16.msra.mxu1 %v9634_v18 }
 0x5de   :  { %7080 = vmatprep.subr.bf16.mxu0 %v9638_v21  ;;  %7112 = vmatprep.subr.bf16.mxu1 %v9642_v24 }
 0x5e1   :  { %7082 = vmatpush1.bf16.msra.mxu0 %v9649_v28  ;;  %7114 = vmatpush1.bf16.msra.mxu1 %v9653_v33 }
 0x5e2   :  { %7084 = vmatprep.subr.bf16.mxu0 %v9657_v37  ;;  %7116 = vmatprep.subr.bf16.mxu1 %v9661_v41 }
 0x5e5   :  { %7086 = vmatpush1.bf16.msra.mxu0 %v9668_v46  ;;  %7118 = vmatpush1.bf16.msra.mxu1 %v9672_v50 }
 0x5e6   :  { %7088 = vmatprep.subr.bf16.mxu0 %v9676_v54  ;;  %7120 = vmatprep.subr.bf16.mxu1 %v9680_v59 }
 0x5e9   :  { %7090 = vmatpush1.bf16.msra.mxu0 %v9687_v1  ;;  %7122 = vmatpush1.bf16.msra.mxu1 %v9691_v6 }
 0x5ea   :  { %7092 = vmatprep.subr.bf16.mxu0 %v9695_v10  ;;  %7124 = vmatprep.subr.bf16.mxu1 %v9699_v14 }
 0x5ed   :  { %7094 = vmatpush1.bf16.msra.mxu0 %v9706_v17  ;;  %7126 = vmatpush1.bf16.msra.mxu1 %v9710_v19 }
 0x5ee   :  { %7128 = vmatprep.subr.bf16.mxu0 %v9565_v30  ;;  %7160 = vmatprep.subr.bf16.mxu1 %v9567_v31 }
 0x6a3   :  { %v1456_v40 = vpop.f32.mrb[10].mxu0  ;;  %v1527_v9 = vpop.f32.mrb[10].mxu1 }
 0x6a4   :  { %v8369_v12 = vadd.f32 %v1456_v40, %v9767_v27  ;;  %v1458_v13 = vpop.f32.mrb[11].mxu0  ;;  %v1529_v16 = vpop.f32.mrb[11].mxu1  ;;  %v8385_v42 = vadd.f32 %v1527_v9, %v9783_v56 }
 0x6a5   :  { %v8370_v20 = vadd.f32 %v1458_v13, %v9770_v29  ;;  %v8386_v35 = vadd.f32 %v1529_v16, %v9777_v49  ;;  %v1904_v16 = vld [vmem:[%s11553_s6 + $0x20] sm:$0xff] }
 0x6a6   :  { %v6404_v22 = vmul.f32 -1.442695, %v8369_v12  ;;  %v1903_v12 = vld [vmem:[%s11553_s6 + $0x18] sm:$0xff] }
 0x6a7   :  { %v6405_v32 = vmul.f32 -1.442695, %v8370_v20  ;;  %v6406_v38 = vmul.f32 -1.442695, %v8386_v35  ;;  %v1905_v20 = vld [vmem:[%s11553_s6 + $0x28] sm:$0xff]  ;;  %v1907_v35 = vld [vmem:[%s11553_s6 + $0x38] sm:$0xff] }
 0x6a8   :  { %8592 = vpow2.f32 %v6404_v22  ;;  %v7198_v22 = vpack.c.bf16 %v1905_v20, %v1904_v16  ;;  %v2371_v20 = vld [vmem:[#allocation6 + $0x90] sm:$0xff] }
 0x6a9   :  { %8594 = vpow2.f32 %v6405_v32  ;;  %v1906_v32 = vld [vmem:[%s11553_s6 + $0x30] sm:$0xff] }
 0x6aa   :  { %8596 = vpow2.f32 %v6406_v38  ;;  %v7201_v38 = vpack.c.bf16 %v1907_v35, %v1906_v32  ;;  %v2008_v32 = vld [vmem:[%s11556_s9] sm:$0xf]  ;;  %v2380_v35 = vld [vmem:[#allocation6 + $0xd8] sm:$0xff] }
 0x6ab   :  { %8598 = vtanh.f32 %v8385_v42  ;;  %v1908_v42 = vld [vmem:[%s11553_s6 + $0x40] sm:$0xff] }
 0x6b2   :  { %v8593_v30 = vpop.eup %8592 }
 0x6b3   :  { %v8595_v44 = vpop.eup %8594  ;;  %v1539_v31 = vadd.f32 1.0, %v8593_v30  ;;  %v1909_v30 = vld [vmem:[%s11553_s6 + $0x48] sm:$0xff] }
 0x6b4   :  { %v1545_v45 = vadd.f32 1.0, %v8595_v44  ;;  %v8597_v47 = vpop.eup %8596  ;;  %v7204_v44 = vpack.c.bf16 %v1909_v30, %v1908_v42  ;;  %v2017_v42 = vrot.slane %v2008_v32, %v9764_v26  ;;  %v2013_v30 = vrot.slane %v2008_v32, %v9759_v23 }
 0x6b5   :  { %8600 = vrcp.f32 %v1539_v31  ;;  %v8599_v53 = vpop.eup %8598  ;;  %v1552_v63 = vadd.f32 1.0, %v8597_v47  ;;  %v1910_v31 = vld [vmem:[%s11553_s6 + $0x50] sm:$0xff]  ;;  %v1912_v47 = vld [vmem:[%s11553_s6 + $0x60] sm:$0xff] }
 0x6b6   :  { %8602 = vrcp.f32 %v1545_v45  ;;  %v1911_v45 = vld [vmem:[%s11553_s6 + $0x58] sm:$0xff] }
 0x6b7   :  { %8604 = vrcp.f32 %v1552_v63  ;;  %v1915_v63 = vld [vmem:[%s11553_s6 + $0x78] sm:$0xff] }
 0x6bf   :  { %v8601_v57 = vpop.eup %8600 }
 0x6c0   :  { %v8603_v60 = vpop.eup %8602  ;;  %v1556_v62 = vmul.f32 %v8601_v57, %v8599_v53  ;;  %v7207_v53 = vpack.c.bf16 %v1911_v45, %v1910_v31  ;;  %v1913_v57 = vld [vmem:[%s11553_s6 + $0x68] sm:$0xff]  ;;  %v2007_v31 = vld [vmem:[%s11610_s22] sm:$0xff]  ;;  %v2021_v45 = vrot.slane %v2008_v32, %v9779_v52 }
 0x6c1   :  { %v1555_v3 = vmul.f32 %v8603_v60, %v9954_v25  ;;  %v8605_v7 = vpop.eup %8604  ;;  %v1902_v25 = vld [vmem:[%s11553_s6 + $0x10] sm:$0xff]  ;;  %v7210_v60 = vpack.c.bf16 %v1913_v57, %v1912_v47 }
 0x6c2   :  { %v7195_v13 = vpack.c.bf16 %v1903_v12, %v1902_v25  ;;  %v2372_v25 = vld [vmem:[#allocation6 + $0x98] sm:$0xff]  ;;  %v2379_v57 = vld [vmem:[#allocation6 + $0xd0] sm:$0xff] }
 0x6c3   :  { %v9996_v4 = vadd.f32 %v1556_v62, %v1555_v3  ;;  %v1914_v62 = vld [vmem:[%s11553_s6 + $0x70] sm:$0xff]  ;;  %v2376_v12 = vld [vmem:[#allocation6 + $0xb8] sm:$0xff] }
 0x6c4   :  { %v7213_v3 = vpack.c.bf16 %v1915_v63, %v1914_v62  ;;  %v10115_v16 = vpack.c.bf16 %v2376_v12, %v2372_v25  ;;  %v2388_v62 = vld [vmem:[#allocation6 + $0x118] sm:$0xff]  ;;  %v2354_v25 = vld [vmem:[#allocation6 + $0x8] sm:$0xff] }
 0x6c5   :  { %8606 = vtanh.f32 %v9996_v4  ;;  %v2392_v63 = vld [vmem:[#allocation6 + $0x138] sm:$0xff]  ;;  %v2358_v12 = vld [vmem:[#allocation6 + $0x28] sm:$0xff] }
 0x6cf   :  { %v8607_v40 = vpop.eup %8606 }
 0x6d0   :  { %v1559_v9 = vmul.f32 %v8607_v40, %v8605_v7 }
 0x6d2   :  { %1625 = vmatmul.mubr.f32.vlgmr.msra.gmra.mrb[12].mxu0 %v1559_v9  ;;  %1696 = vmatmul.mubr.f32.vlgmr.msra.gmra.mrb[12].mxu1 %v1559_v9 }
 0x6d3   :  { %7130 = vmatpush1.bf16.msra.mxu0 %v9574_v36  ;;  %7162 = vmatpush1.bf16.msra.mxu1 %v9579_v39 }
 0x6d4   :  { %7132 = vmatprep.subr.bf16.mxu0 %v9582_v43  ;;  %7164 = vmatprep.subr.bf16.mxu1 %v9588_v48 }
 0x6d5   :  { %1794 = vmatprep.mubr.f32.mxu0 %v11571_v0  ;;  %1865 = vmatprep.mubr.f32.mxu1 %v11571_v0 }
 0x6d7   :  { %7134 = vmatpush1.bf16.msra.mxu0 %v9592_v51  ;;  %7166 = vmatpush1.bf16.msra.mxu1 %v9596_v55 }
 0x6d8   :  { %7136 = vmatprep.subr.bf16.mxu0 %v9600_v58  ;;  %7168 = vmatprep.subr.bf16.mxu1 %v9604_v61 }
 0x6db   :  { %7138 = vmatpush1.bf16.msra.mxu0 %v9611_v2  ;;  %7170 = vmatpush1.bf16.msra.mxu1 %v9615_v5 }
 0x6dc   :  { %7140 = vmatprep.subr.bf16.mxu0 %v9619_v8  ;;  %7172 = vmatprep.subr.bf16.mxu1 %v9623_v11 }
 0x6df   :  { %7142 = vmatpush1.bf16.msra.mxu0 %v9630_v15  ;;  %7174 = vmatpush1.bf16.msra.mxu1 %v9634_v18 }
 0x6e0   :  { %7144 = vmatprep.subr.bf16.mxu0 %v9638_v21  ;;  %7176 = vmatprep.subr.bf16.mxu1 %v9642_v24 }
 0x6e3   :  { %7146 = vmatpush1.bf16.msra.mxu0 %v9649_v28  ;;  %7178 = vmatpush1.bf16.msra.mxu1 %v9653_v33 }
 0x6e4   :  { %7148 = vmatprep.subr.bf16.mxu0 %v9657_v37  ;;  %7180 = vmatprep.subr.bf16.mxu1 %v9661_v41 }
 0x6e7   :  { %7150 = vmatpush1.bf16.msra.mxu0 %v9668_v46  ;;  %7182 = vmatpush1.bf16.msra.mxu1 %v9672_v50 }
 0x6e8   :  { %7152 = vmatprep.subr.bf16.mxu0 %v9676_v54  ;;  %7184 = vmatprep.subr.bf16.mxu1 %v9680_v59 }
 0x6eb   :  { %7154 = vmatpush1.bf16.msra.mxu0 %v9687_v1  ;;  %7186 = vmatpush1.bf16.msra.mxu1 %v9691_v6 }
 0x6ec   :  { %7156 = vmatprep.subr.bf16.mxu0 %v9695_v10  ;;  %7188 = vmatprep.subr.bf16.mxu1 %v9699_v14  ;;  %v1900_v10 = vld [vmem:[%s11553_s6] sm:$0xff]  ;;  %v1901_v14 = vld [vmem:[%s11553_s6 + $0x8] sm:$0xff] }
 0x6ef   :  { %7158 = vmatpush1.bf16.msra.mxu0 %v9706_v17  ;;  %7190 = vmatpush1.bf16.msra.mxu1 %v9710_v19  ;;  %v7192_v17 = vpack.c.bf16 %v1901_v14, %v1900_v10  ;;  %v11569_v19 = vmov 0.0|0.0   ;;  %v2363_v14 = vld [vmem:[#allocation6 + $0x50] sm:$0xff] }
 0x6f0   :  { %7191 = vmatprep.subr.bf16.mxu0 %v11569_v19  ;;  %6414 = vmatprep.subr.msk.mxu1 %vm2030_vm5, %v2017_v42  ;;  %v2357_v42 = vld [vmem:[#allocation6 + $0x20] sm:$0xff] }
 0x7a5   :  { %v1626_v36 = vpop.f32.mrb[12].mxu0  ;;  %v1697_v39 = vpop.f32.mrb[12].mxu1 }
 0x7a6   :  { %v8371_v43 = vadd.f32 %v1626_v36, %v9767_v27  ;;  %v1628_v48 = vpop.f32.mrb[13].mxu0  ;;  %v1699_v51 = vpop.f32.mrb[13].mxu1  ;;  %v8387_v8 = vadd.f32 %v1697_v39, %v9783_v56 }
 0x7a7   :  { %v8372_v55 = vadd.f32 %v1628_v48, %v9770_v29  ;;  %v8388_v2 = vadd.f32 %v1699_v51, %v9777_v49 }
 0x7a8   :  { %v6407_v58 = vmul.f32 -1.442695, %v8371_v43 }
 0x7a9   :  { %v6408_v61 = vmul.f32 -1.442695, %v8372_v55  ;;  %v6409_v5 = vmul.f32 -1.442695, %v8388_v2 }
 0x7aa   :  { %8608 = vpow2.f32 %v6407_v58 }
 0x7ab   :  { %8610 = vpow2.f32 %v6408_v61 }
 0x7ac   :  { %8612 = vpow2.f32 %v6409_v5 }
 0x7ad   :  { %8614 = vtanh.f32 %v8387_v8 }
 0x7b4   :  { %v8609_v11 = vpop.eup %8608 }
 0x7b5   :  { %v8611_v15 = vpop.eup %8610  ;;  %v1709_v18 = vadd.f32 1.0, %v8609_v11 }
 0x7b6   :  { %v1715_v21 = vadd.f32 1.0, %v8611_v15  ;;  %v8613_v24 = vpop.eup %8612 }
 0x7b7   :  { %8616 = vrcp.f32 %v1709_v18  ;;  %v8615_v28 = vpop.eup %8614  ;;  %v1722_v46 = vadd.f32 1.0, %v8613_v24 }
 0x7b8   :  { %8618 = vrcp.f32 %v1715_v21 }
 0x7b9   :  { %8620 = vrcp.f32 %v1722_v46  ;;  %v2355_v46 = vld [vmem:[#allocation6 + $0x10] sm:$0xff] }
 0x7c1   :  { %v8617_v33 = vpop.eup %8616 }
 0x7c2   :  { %v8619_v37 = vpop.eup %8618  ;;  %v1726_v41 = vmul.f32 %v8617_v33, %v8615_v28 }
 0x7c3   :  { %v1725_v50 = vmul.f32 %v8619_v37, %v9996_v4  ;;  %v8621_v59 = vpop.eup %8620  ;;  %v2356_v37 = vld [vmem:[#allocation6 + $0x18] sm:$0xff] }
 0x7c5   :  { %v10036_v54 = vadd.f32 %v1726_v41, %v1725_v50  ;;  %v2360_v41 = vld [vmem:[#allocation6 + $0x38] sm:$0xff] }
 0x7c6   :  { %v10104_v50 = vpack.c.bf16 %v2360_v41, %v2356_v37  ;;  %v2416_v37 = vld [vmem:[#allocation6 + $0x1f8] sm:$0xff] }
 0x7c7   :  { %8622 = vtanh.f32 %v10036_v54 }
 0x7d1   :  { %v8623_v1 = vpop.eup %8622 }
 0x7d2   :  { %v1729_v6 = vmul.f32 %v8623_v1, %v8621_v59  ;;  %v2359_v59 = vld [vmem:[#allocation6 + $0x30] sm:$0xff]  ;;  %v2364_v1 = vld [vmem:[#allocation6 + $0x58] sm:$0xff] }
 0x7d3   :  { %v10106_v10 = vpack.c.bf16 %v2359_v59, %v2355_v46  ;;  %v2411_v46 = vld [vmem:[#allocation6 + $0x1d0] sm:$0xff] }
 0x7d4   :  { %1795 = vmatmul.mubr.f32.vlgmr.msra.gmra.mrb[14].mxu0 %v1729_v6  ;;  %1866 = vmatmul.mubr.f32.vlgmr.msra.gmra.mrb[14].mxu1 %v1729_v6  ;;  %v2368_v6 = vld [vmem:[#allocation6 + $0x78] sm:$0xff]  ;;  %v2415_v59 = vld [vmem:[#allocation6 + $0x1f0] sm:$0xff] }
 0x7d5   :  { %2103 = vmatprep.mubr.f32.mxu1 %v11571_v0  ;;  %7193 = vmatpush3.bf16.msra.mxu0 %v7192_v17  ;;  %v2367_v17 = vld [vmem:[#allocation6 + $0x70] sm:$0xff] }
 0x7d6   :  { %7194 = vmatprep.subr.bf16.mxu0 %v11569_v19  ;;  %6577 = vmatprep.mubr.msk.f32.mxu0 %vm9259_vm4, %v11571_v0 }
 0x7d7   :  { %6415 = vmatpush1.msk.msra.mxu1 %vm2030_vm5, %v2013_v30  ;;  %v2362_v30 = vld [vmem:[#allocation6 + $0x48] sm:$0xff] }
 0x7d8   :  { %6416 = vmatmul.mubr.msk.f32.vlgmr.msra.gmra.mrb[16].mxu1 %vm2026_vm6, %v2007_v31 }
 0x7d9   :  { %7196 = vmatpush3.bf16.msra.mxu0 %v7195_v13  ;;  %v10112_v13 = vpack.c.bf16 %v2367_v17, %v2363_v14  ;;  %2174 = vmatprep.mubr.f32.mxu1 %v11571_v0  ;;  %v1993_v14 = vld [vmem:[%s11612_s12] sm:$0xff] }
 0x7da   :  { %7197 = vmatprep.subr.bf16.mxu0 %v11569_v19 }
 0x7dd   :  { %7199 = vmatpush3.bf16.msra.mxu0 %v7198_v22  ;;  %v2375_v22 = vld [vmem:[#allocation6 + $0xb0] sm:$0xff] }
 0x7de   :  { %7200 = vmatprep.subr.bf16.mxu0 %v11569_v19  ;;  %v10128_v47 = vpack.c.bf16 %v2375_v22, %v2371_v20 }
 0x7e1   :  { %7202 = vmatpush3.bf16.msra.mxu0 %v7201_v38  ;;  %v2384_v38 = vld [vmem:[#allocation6 + $0xf8] sm:$0xff] }
 0x7e2   :  { %7203 = vmatprep.subr.bf16.mxu0 %v11569_v19 }
 0x7e5   :  { %7205 = vmatpush3.bf16.msra.mxu0 %v7204_v44  ;;  %v2025_v44 = vrot.slane %v2008_v32, %v9772_v34  ;;  %v2005_v32 = vld [vmem:[#allocation4 + $0x10] sm:$0xff] }
 0x7e6   :  { %7206 = vmatprep.subr.bf16.mxu0 %v11569_v19 }
 0x7e7   :  { %6417 = vmatprep.subr.msk.mxu1 %vm2030_vm5, %v2025_v44  ;;  %v2366_v44 = vld [vmem:[#allocation6 + $0x68] sm:$0xff] }
 0x7e8   :  { %6418 = vmatpush1.msk.msra.mxu1 %vm2030_vm5, %v2021_v45  ;;  %v10206_v45 = vpack.c.bf16 %v2366_v44, %v2362_v30  ;;  %v2409_v30 = vld [vmem:[#allocation6 + $0x1c0] sm:$0xff] }
 0x7e9   :  { %7208 = vmatpush3.bf16.msra.mxu0 %v7207_v53  ;;  %v10132_v53 = vpack.c.bf16 %v2384_v38, %v2380_v35  ;;  %6419 = vmatmul.mubr.msk.f32.vlgmr.msra.gmra.mrb[18].mxu1 %vm2026_vm6, %v2007_v31  ;;  %v10199_v35 = vpack.c.bf16 %v2358_v12, %v2354_v25  ;;  %v2353_v38 = vld [vmem:[#allocation6] sm:$0xff] }
 0x7ea   :  { %7209 = vmatprep.subr.bf16.mxu0 %v11569_v19  ;;  %2249 = vmatprep.mubr.f32.mxu1 %v11571_v0  ;;  %v10203_v31 = vpack.c.bf16 %v2357_v42, %v2353_v38  ;;  %v2401_v12 = vld [vmem:[#allocation6 + $0x180] sm:$0xff] }
 0x7eb   :  { %v2413_v44 = vld [vmem:[#allocation6 + $0x1e0] sm:$0xff] }
 0x7ed   :  { %7211 = vmatpush3.bf16.msra.mxu0 %v7210_v60  ;;  %v2383_v60 = vld [vmem:[#allocation6 + $0xf0] sm:$0xff] }
 0x7ee   :  { %7212 = vmatprep.subr.bf16.mxu0 %v11569_v19  ;;  %v4541_v19 = vld [vmem:[#allocation9 + $0x48] sm:$0xff] }
 0x7f1   :  { %7214 = vmatpush3.bf16.msra.mxu0 %v7213_v3  ;;  %v10140_v3 = vpack.c.bf16 %v2383_v60, %v2379_v57  ;;  %v2361_v57 = vld [vmem:[#allocation6 + $0x40] sm:$0xff] }
 0x7f2   :  { %7248 = vmatprep.subr.bf16.mxu0 %v10104_v50  ;;  %v2365_v60 = vld [vmem:[#allocation6 + $0x60] sm:$0xff] }
 0x8a7   :  { %v1796_v4 = vpop.f32.mrb[14].mxu0  ;;  %v1867_v7 = vpop.f32.mrb[14].mxu1 }
 0x8a8   :  { %v8373_v40 = vadd.f32 %v1796_v4, %v9767_v27  ;;  %v1798_v9 = vpop.f32.mrb[15].mxu0  ;;  %v1869_v36 = vpop.f32.mrb[15].mxu1  ;;  %v8389_v58 = vadd.f32 %v1867_v7, %v9783_v56  ;;  %v10143_v4 = vpack.c.bf16 %v2392_v63, %v2388_v62  ;;  %v2387_v7 = vld [vmem:[#allocation6 + $0x110] sm:$0xff]  ;;  %v2370_v62 = vld [vmem:[#allocation6 + $0x88] sm:$0xff] }
 0x8a9   :  { %v8374_v39 = vadd.f32 %v1798_v9, %v9770_v29  ;;  %v8390_v51 = vadd.f32 %v1869_v36, %v9777_v49  ;;  %v2396_v9 = vld [vmem:[#allocation6 + $0x158] sm:$0xff]  ;;  %v2374_v63 = vld [vmem:[#allocation6 + $0xa8] sm:$0xff] }
 0x8aa   :  { %v6410_v43 = vmul.f32 -1.442695, %v8373_v40  ;;  %v2391_v40 = vld [vmem:[#allocation6 + $0x130] sm:$0xff]  ;;  %v2400_v36 = vld [vmem:[#allocation6 + $0x178] sm:$0xff] }
 0x8ab   :  { %v6411_v48 = vmul.f32 -1.442695, %v8374_v39  ;;  %v6412_v55 = vmul.f32 -1.442695, %v8390_v51  ;;  %v10148_v39 = vpack.c.bf16 %v2391_v40, %v2387_v7  ;;  %v2399_v51 = vld [vmem:[#allocation6 + $0x170] sm:$0xff]  ;;  %v10210_v7 = vpack.c.bf16 %v2365_v60, %v2361_v57 }
 0x8ac   :  { %8624 = vpow2.f32 %v6410_v43  ;;  %v10151_v43 = vpack.c.bf16 %v2400_v36, %v2396_v9  ;;  %v10214_v40 = vpack.c.bf16 %v2374_v63, %v2370_v62  ;;  %v2369_v9 = vld [vmem:[#allocation6 + $0x80] sm:$0xff]  ;;  %v10247_v57 = vpack.c.bf16 %v2413_v44, %v2409_v30 }
 0x8ad   :  { %8626 = vpow2.f32 %v6411_v48  ;;  %v2395_v48 = vld [vmem:[#allocation6 + $0x150] sm:$0xff]  ;;  %v2373_v36 = vld [vmem:[#allocation6 + $0xa0] sm:$0xff] }
 0x8ae   :  { %8628 = vpow2.f32 %v6412_v55  ;;  %v10154_v55 = vpack.c.bf16 %v2399_v51, %v2395_v48  ;;  %v2378_v48 = vld [vmem:[#allocation6 + $0xc8] sm:$0xff] }
 0x8af   :  { %8630 = vtanh.f32 %v8389_v58  ;;  %v6413_v58 = vld [vmem:[%s11554_s7] ss:$0 sm:$0xff]  ;;  %s9260_s7 = smov 120   ;;  %v2382_v51 = vld [vmem:[#allocation6 + $0xe8] sm:$0xff] }
 0x8b6   :  { %v8625_v61 = vpop.eup %8624 }
 0x8b7   :  { %v8627_v2 = vpop.eup %8626  ;;  %v1879_v5 = vadd.f32 1.0, %v8625_v61 }
 0x8b8   :  { %v1885_v8 = vadd.f32 1.0, %v8627_v2  ;;  %v8629_v27 = vpop.eup %8628 }
 0x8b9   :  { %8632 = vrcp.f32 %v1879_v5  ;;  %v8631_v11 = vpop.eup %8630  ;;  %v1892_v21 = vadd.f32 1.0, %v8629_v27 }
 0x8ba   :  { %8634 = vrcp.f32 %v1885_v8 }
 0x8bb   :  { %8636 = vrcp.f32 %v1892_v21  ;;  %v2407_v21 = vld [vmem:[#allocation6 + $0x1b0] sm:$0xff] }
 0x8c3   :  { %v8633_v29 = vpop.eup %8632 }
 0x8c4   :  { %v8635_v15 = vpop.eup %8634  ;;  %v1896_v18 = vmul.f32 %v8633_v29, %v8631_v11  ;;  %v2404_v11 = vld [vmem:[#allocation6 + $0x198] sm:$0xff] }
 0x8c5   :  { %v1895_v24 = vmul.f32 %v8635_v15, %v10036_v54  ;;  %v8637_v56 = vpop.eup %8636  ;;  %v10108_v54 = vpack.c.bf16 %v2368_v6, %v2364_v1  ;;  %v2408_v29 = vld [vmem:[#allocation6 + $0x1b8] sm:$0xff]  ;;  %v10172_v1 = vpack.c.bf16 %v2415_v59, %v2411_v46  ;;  %v2393_v46 = vld [vmem:[#allocation6 + $0x140] sm:$0xff] }
 0x8c6   :  { %v10164_v15 = vpack.c.bf16 %v2408_v29, %v2404_v11  ;;  %v2390_v11 = vld [vmem:[#allocation6 + $0x128] sm:$0xff]  ;;  %v2397_v59 = vld [vmem:[#allocation6 + $0x160] sm:$0xff] }
 0x8c7   :  { %v1897_v49 = vadd.f32 %v1896_v18, %v1895_v24  ;;  %v2403_v18 = vld [vmem:[#allocation6 + $0x190] sm:$0xff]  ;;  %v2004_v24 = vld [vmem:[#allocation4 + $0x8] sm:$0xff] }
 0x8c8   :  { %2185 = vmatprep.subr.mxu1 %v2004_v24  ;;  %v2389_v24 = vld [vmem:[#allocation6 + $0x120] sm:$0xff] }
 0x8c9   :  { %8638 = vtanh.f32 %v1897_v49  ;;  %v2003_v49 = vld [vmem:[#allocation4] sm:$0xff] }
 0x8ca   :  { %2186 = vmatpush1.msra.mxu1 %v2003_v49  ;;  %v2394_v49 = vld [vmem:[#allocation6 + $0x148] sm:$0xff] }
 0x8d3   :  { %v8639_v28 = vpop.eup %8638 }
 0x8d4   :  { %v1899_v33 = vmul.f32 %v8639_v28, %v8637_v56  ;;  %v10166_v56 = vpack.c.bf16 %v2407_v21, %v2403_v18  ;;  %v2006_v28 = vld [vmem:[#allocation4 + $0x18] sm:$0xff]  ;;  %v2385_v21 = vld [vmem:[#allocation6 + $0x100] sm:$0xff] }
 0x8d5   :  { %2256 = vmatprep.subr.mxu1 %v2006_v28  ;;  %v2398_v28 = vld [vmem:[#allocation6 + $0x168] sm:$0xff] }
 0x8d6   :  { %6578 = vmatmul.mubr.f32.vlgmr.msra.gmra.mrb[16].mxu0 %v1899_v33  ;;  %v2412_v33 = vld [vmem:[#allocation6 + $0x1d8] sm:$0xff] }
 0x8d7   :  { %2552 = vmatprep.mubr.f32.mxu0 %v11571_v0  ;;  %7250 = vmatpush1.bf16.msra.mxu0 %v10106_v10  ;;  %v10170_v41 = vpack.c.bf16 %v2416_v37, %v2412_v33  ;;  %v10229_v33 = vpack.c.bf16 %v2389_v24, %v2385_v21  ;;  %v10232_v37 = vpack.c.bf16 %v2398_v28, %v2394_v49 }
 0x8d8   :  { %7252 = vmatprep.subr.bf16.mxu0 %v10108_v54 }
 0x8db   :  { %7254 = vmatpush1.bf16.msra.mxu0 %v10112_v13 }
 0x8dc   :  { %7256 = vmatprep.subr.bf16.mxu0 %v10115_v16 }
 0x8df   :  { %7258 = vmatpush1.bf16.msra.mxu0 %v10128_v47 }
 0x8e0   :  { %7260 = vmatprep.subr.bf16.mxu0 %v10132_v53 }
 0x8e3   :  { %7262 = vmatpush1.bf16.msra.mxu0 %v10140_v3 }
 0x8e4   :  { %7264 = vmatprep.subr.bf16.mxu0 %v10143_v4 }
 0x8e7   :  { %7266 = vmatpush1.bf16.msra.mxu0 %v10148_v39 }
 0x8e8   :  { %7268 = vmatprep.subr.bf16.mxu0 %v10151_v43 }
 0x8eb   :  { %7270 = vmatpush1.bf16.msra.mxu0 %v10154_v55 }
 0x8ec   :  { %7272 = vmatprep.subr.bf16.mxu0 %v10164_v15 }
 0x8ef   :  { %7274 = vmatpush1.bf16.msra.mxu0 %v10166_v56 }
 0x8f0   :  { %7276 = vmatprep.subr.bf16.mxu0 %v10170_v41 }
 0x8f3   :  { %7278 = vmatpush1.bf16.msra.mxu0 %v10172_v1 }
 0x8f4   :  { %7312 = vmatprep.subr.bf16.mxu0 %v10104_v50 }
 0x8f6   :  { %2553 = vmatmul.mubr.f32.vlgmr.msra.gmra.mrb[18].mxu0 %v11571_v0 }
 0x8f7   :  { %7314 = vmatpush1.bf16.msra.mxu0 %v10106_v10  ;;  %2722 = vmatprep.mubr.f32.mxu0 %v11571_v0 }
 0x8f8   :  { %7316 = vmatprep.subr.bf16.mxu0 %v10108_v54 }
 0x8fb   :  { %7318 = vmatpush1.bf16.msra.mxu0 %v10112_v13 }
 0x8fc   :  { %7320 = vmatprep.subr.bf16.mxu0 %v10115_v16 }
 0x8ff   :  { %7322 = vmatpush1.bf16.msra.mxu0 %v10128_v47 }
 0x900   :  { %7324 = vmatprep.subr.bf16.mxu0 %v10132_v53 }
 0x903   :  { %7326 = vmatpush1.bf16.msra.mxu0 %v10140_v3 }
 0x904   :  { %7328 = vmatprep.subr.bf16.mxu0 %v10143_v4 }
 0x907   :  { %7330 = vmatpush1.bf16.msra.mxu0 %v10148_v39 }
 0x908   :  { %7332 = vmatprep.subr.bf16.mxu0 %v10151_v43 }
 0x90b   :  { %7334 = vmatpush1.bf16.msra.mxu0 %v10154_v55 }
 0x90c   :  { %7336 = vmatprep.subr.bf16.mxu0 %v10164_v15 }
 0x90f   :  { %7338 = vmatpush1.bf16.msra.mxu0 %v10166_v56 }
 0x910   :  { %7340 = vmatprep.subr.bf16.mxu0 %v10170_v41 }
 0x913   :  { %7342 = vmatpush1.bf16.msra.mxu0 %v10172_v1 }
 0x914   :  { %7376 = vmatprep.subr.bf16.mxu0 %v10104_v50 }
 0x9a9   :  { %v1989_v61 = vpop.f32.mrb[16].mxu0 }
 0x9aa   :  { %v10161_v2 = vadd.f32 %v6413_v58, %v1989_v61  ;;  %v6579_v5 = vpop.f32.mrb[17].mxu0  ;;  %v10217_v58 = vpack.c.bf16 %v2373_v36, %v2369_v9  ;;  %v10220_v61 = vpack.c.bf16 %v2382_v51, %v2378_v48  ;;  %v2327_v51 = vld [vmem:[%s11557_s10] sm:$0xf] }
 0x9ab   :  { %v2377_v5 = vld [vmem:[#allocation6 + $0xc0] sm:$0xff]  ;;  %v2344_v21 = vrot.slane %v2327_v51, %v9772_v34 }
 0x9ac   :  { %11611 = vst [vmem:[#allocation24_spill] sm:$0xff] %v10161_v2  ;;  %v1994_v8 = vmul.f32 0.5, %v10161_v2 }
 0x9ae   :  { %v1995_v27 = vmul.f32 1.442695, %v1994_v8  ;;  %v2381_v8 = vld [vmem:[#allocation6 + $0xe0] sm:$0xff] }
 0x9af   :  { %v10223_v29 = vpack.c.bf16 %v2381_v8, %v2377_v5  ;;  %v2332_v5 = vrot.slane %v2327_v51, %v9759_v23  ;;  %v2336_v8 = vrot.slane %v2327_v51, %v9764_v26 }
 0x9b0   :  { %8640 = vpow2.f32 %v1995_v27  ;;  %v2386_v27 = vld [vmem:[#allocation6 + $0x108] sm:$0xff] }
 0x9b1   :  { %v10226_v18 = vpack.c.bf16 %v2390_v11, %v2386_v27 }
 0x9ba   :  { %v8641_v6 = vpop.eup %8640 }
 0x9bb   :  { %1998 = vrot.lane.b32.xlu0 %v8641_v6, %s9260_s7  ;;  %v2402_v6 = vld [vmem:[#allocation6 + $0x188] sm:$0xff] }
 0x9c9   :  { %v2554_v60 = vpop.f32.mrb[18].mxu0 }
 0x9ca   :  { %v2556_v62 = vpop.f32.mrb[19].mxu0 }
 0xa2d   :  { %v1999_v17 = vpop.permute.xlu0 %1998 }
 0xa2e   :  { %v2001_v20 = vmul.f32 %v1999_v17, %v1993_v14  ;;  %v2406_v14 = vld [vmem:[#allocation6 + $0x1a8] sm:$0xff]  ;;  %v10235_v17 = vpack.c.bf16 %v2397_v59, %v2393_v46 }
 0xa2f   :  { %v10238_v25 = vpack.c.bf16 %v2406_v14, %v2402_v6 }
 0xa30   :  { %v2002_v22 = vadd.f32 %v2001_v20, %v10161_v2  ;;  %v2405_v20 = vld [vmem:[#allocation6 + $0x1a0] sm:$0xff] }
 0xa31   :  { %v10241_v38 = vpack.c.bf16 %v2405_v20, %v2401_v12  ;;  %v2340_v12 = vrot.slane %v2327_v51, %v9779_v52  ;;  %v4540_v2 = vld [vmem:[#allocation9 + $0x40] sm:$0xff] }
 0xa32   :  { %6420 = vmatmul.mubr.msk.f32.vlgmr.msra.gmra.mrb[16].mxu1 %vm2181_vm7, %v2002_v22 }
 0xa33   :  { %2257 = vmatpush1.msra.mxu1 %v2005_v32  ;;  %2320 = vmatprep.mubr.f32.mxu1 %v11571_v0  ;;  %v2414_v32 = vld [vmem:[#allocation6 + $0x1e8] sm:$0xff] }
 0xa34   :  { %7216 = vmatprep.subr.bf16.mxu1 %v10199_v35 }
 0xa36   :  { %6421 = vmatmul.mubr.msk.f32.vlgmr.msra.gmra.mrb[18].mxu1 %vm2181_vm7, %v2002_v22  ;;  %v2410_v22 = vld [vmem:[#allocation6 + $0x1c8] sm:$0xff] }
 0xa37   :  { %7218 = vmatpush1.bf16.msra.mxu1 %v10203_v31  ;;  %2481 = vmatprep.mubr.f32.mxu1 %v11571_v0  ;;  %v10244_v42 = vpack.c.bf16 %v2414_v32, %v2410_v22 }
 0xa38   :  { %7220 = vmatprep.subr.bf16.mxu1 %v10206_v45 }
 0xa3b   :  { %7222 = vmatpush1.bf16.msra.mxu1 %v10210_v7 }
 0xa3c   :  { %7224 = vmatprep.subr.bf16.mxu1 %v10214_v40 }
 0xa3f   :  { %7226 = vmatpush1.bf16.msra.mxu1 %v10217_v58 }
 0xa40   :  { %7228 = vmatprep.subr.bf16.mxu1 %v10220_v61 }
 0xa43   :  { %7230 = vmatpush1.bf16.msra.mxu1 %v10223_v29 }
 0xa44   :  { %7232 = vmatprep.subr.bf16.mxu1 %v10226_v18 }
 0xa47   :  { %7234 = vmatpush1.bf16.msra.mxu1 %v10229_v33 }
 0xa48   :  { %7236 = vmatprep.subr.bf16.mxu1 %v10232_v37 }
 0xa4b   :  { %7238 = vmatpush1.bf16.msra.mxu1 %v10235_v17 }
 0xa4c   :  { %7240 = vmatprep.subr.bf16.mxu1 %v10238_v25 }
 0xa4f   :  { %7242 = vmatpush1.bf16.msra.mxu1 %v10241_v38 }
 0xa50   :  { %7244 = vmatprep.subr.bf16.mxu1 %v10244_v42 }
 0xa53   :  { %7246 = vmatpush1.bf16.msra.mxu1 %v10247_v57 }
 0xa54   :  { %7280 = vmatprep.subr.bf16.mxu1 %v10199_v35 }
 0xa56   :  { %2482 = vmatmul.mubr.f32.vlgmr.msra.gmra.mrb[20].mxu1 %v11571_v0 }
 0xa57   :  { %7282 = vmatpush1.bf16.msra.mxu1 %v10203_v31  ;;  %2651 = vmatprep.mubr.f32.mxu1 %v11571_v0 }
 0xa58   :  { %7284 = vmatprep.subr.bf16.mxu1 %v10206_v45 }
 0xa5b   :  { %7286 = vmatpush1.bf16.msra.mxu1 %v10210_v7 }
 0xa5c   :  { %7288 = vmatprep.subr.bf16.mxu1 %v10214_v40 }
 0xa5f   :  { %7290 = vmatpush1.bf16.msra.mxu1 %v10217_v58 }
 0xa60   :  { %7292 = vmatprep.subr.bf16.mxu1 %v10220_v61 }
 0xa63   :  { %7294 = vmatpush1.bf16.msra.mxu1 %v10223_v29 }
 0xa64   :  { %7296 = vmatprep.subr.bf16.mxu1 %v10226_v18 }
 0xa67   :  { %7298 = vmatpush1.bf16.msra.mxu1 %v10229_v33 }
 0xa68   :  { %7300 = vmatprep.subr.bf16.mxu1 %v10232_v37 }
 0xa6b   :  { %7302 = vmatpush1.bf16.msra.mxu1 %v10235_v17 }
 0xa6c   :  { %7304 = vmatprep.subr.bf16.mxu1 %v10238_v25 }
 0xa6f   :  { %7306 = vmatpush1.bf16.msra.mxu1 %v10241_v38 }
 0xa70   :  { %7308 = vmatprep.subr.bf16.mxu1 %v10244_v42 }
 0xa73   :  { %7310 = vmatpush1.bf16.msra.mxu1 %v10247_v57 }
 0xa74   :  { %7344 = vmatprep.subr.bf16.mxu1 %v10199_v35 }
 0xb05   :  { %v2251_v63 = vpop.f32.mrb[16].mxu1 }
 0xb06   :  { %v2253_v9 = vpop.f32.mrb[17].mxu1  ;;  %v10275_v27 = vadd.f32 %v2332_v5, %v2251_v63 }
 0xb07   :  { %v10277_v11 = vadd.f32 %v2336_v8, %v2253_v9 }
 0xb09   :  { %v2322_v36 = vpop.f32.mrb[18].mxu1 }
 0xb0a   :  { %v2324_v48 = vpop.f32.mrb[19].mxu1  ;;  %v10286_v22 = vadd.f32 %v2340_v12, %v2322_v36 }
 0xb0b   :  { %v10282_v6 = vadd.f32 %v2344_v21, %v2324_v48 }
 0xb0c   :  { %v2561_v30 = vadd.f32 %v2554_v60, %v10286_v22 }
 0xb0d   :  { %v2562_v20 = vadd.f32 %v2556_v62, %v10282_v6 }
 0xb0f   :  { %v6424_v32 = vmul.f32 -1.442695, %v2562_v20 }
 0xb29   :  { %v2483_v24 = vpop.f32.mrb[20].mxu1 }
 0xb2a   :  { %v2559_v49 = vadd.f32 %v2483_v24, %v10275_v27  ;;  %v2485_v28 = vpop.f32.mrb[21].mxu1 }
 0xb2b   :  { %v2560_v46 = vadd.f32 %v2485_v28, %v10277_v11 }
 0xb2c   :  { %v6422_v59 = vmul.f32 -1.442695, %v2559_v49 }
 0xb2d   :  { %v6423_v14 = vmul.f32 -1.442695, %v2560_v46 }
 0xb2e   :  { %8642 = vpow2.f32 %v6422_v59 }
 0xb2f   :  { %8644 = vpow2.f32 %v6423_v14 }
 0xb30   :  { %8646 = vpow2.f32 %v6424_v32 }
 0xb31   :  { %8648 = vtanh.f32 %v2561_v30 }
 0xb38   :  { %v8643_v44 = vpop.eup %8642 }
 0xb39   :  { %v8645_v63 = vpop.eup %8644  ;;  %v2566_v9 = vadd.f32 1.0, %v8643_v44 }
 0xb3a   :  { %v2572_v5 = vadd.f32 1.0, %v8645_v63  ;;  %v8647_v48 = vpop.eup %8646 }
 0xb3b   :  { %8650 = vrcp.f32 %v2566_v9  ;;  %v8649_v8 = vpop.eup %8648  ;;  %v2579_v24 = vadd.f32 1.0, %v8647_v48 }
 0xb3c   :  { %8652 = vrcp.f32 %v2572_v5 }
 0xb3d   :  { %8654 = vrcp.f32 %v2579_v24 }
 0xb45   :  { %v8651_v51 = vpop.eup %8650 }
 0xb46   :  { %v8653_v21 = vpop.eup %8652  ;;  %v2583_v49 = vmul.f32 %v8651_v51, %v8649_v8 }
 0xb47   :  { %v2582_v62 = vmul.f32 0.0, %v8653_v21  ;;  %v8655_v60 = vpop.eup %8654 }
 0xb49   :  { %v10289_v36 = vadd.f32 %v2583_v49, %v2582_v62 }
 0xb4b   :  { %8656 = vtanh.f32 %v10289_v36 }
 0xb55   :  { %v8657_v28 = vpop.eup %8656 }
 0xb56   :  { %v10292_v46 = vmul.f32 %v8657_v28, %v8655_v60 }
 0xb58   :  { %2652 = vmatmul.mubr.f32.vlgmr.msra.gmra.mrb[22].mxu1 %v10292_v46  ;;  %2723 = vmatmul.mubr.f32.vlgmr.msra.gmra.mrb[20].mxu0 %v10292_v46 }
 0xb59   :  { %7346 = vmatpush1.bf16.msra.mxu1 %v10203_v31  ;;  %7378 = vmatpush1.bf16.msra.mxu0 %v10106_v10 }
 0xb5a   :  { %7348 = vmatprep.subr.bf16.mxu1 %v10206_v45  ;;  %7380 = vmatprep.subr.bf16.mxu0 %v10108_v54 }
 0xb5b   :  { %2821 = vmatprep.mubr.f32.mxu1 %v11571_v0  ;;  %2892 = vmatprep.mubr.f32.mxu0 %v11571_v0 }
 0xb5d   :  { %7350 = vmatpush1.bf16.msra.mxu1 %v10210_v7  ;;  %7382 = vmatpush1.bf16.msra.mxu0 %v10112_v13 }
 0xb5e   :  { %7352 = vmatprep.subr.bf16.mxu1 %v10214_v40  ;;  %7384 = vmatprep.subr.bf16.mxu0 %v10115_v16 }
 0xb61   :  { %7354 = vmatpush1.bf16.msra.mxu1 %v10217_v58  ;;  %7386 = vmatpush1.bf16.msra.mxu0 %v10128_v47 }
 0xb62   :  { %7356 = vmatprep.subr.bf16.mxu1 %v10220_v61  ;;  %7388 = vmatprep.subr.bf16.mxu0 %v10132_v53 }
 0xb65   :  { %7358 = vmatpush1.bf16.msra.mxu1 %v10223_v29  ;;  %7390 = vmatpush1.bf16.msra.mxu0 %v10140_v3 }
 0xb66   :  { %7360 = vmatprep.subr.bf16.mxu1 %v10226_v18  ;;  %7392 = vmatprep.subr.bf16.mxu0 %v10143_v4 }
 0xb69   :  { %7362 = vmatpush1.bf16.msra.mxu1 %v10229_v33  ;;  %7394 = vmatpush1.bf16.msra.mxu0 %v10148_v39 }
 0xb6a   :  { %7364 = vmatprep.subr.bf16.mxu1 %v10232_v37  ;;  %7396 = vmatprep.subr.bf16.mxu0 %v10151_v43 }
 0xb6d   :  { %7366 = vmatpush1.bf16.msra.mxu1 %v10235_v17  ;;  %7398 = vmatpush1.bf16.msra.mxu0 %v10154_v55 }
 0xb6e   :  { %7368 = vmatprep.subr.bf16.mxu1 %v10238_v25  ;;  %7400 = vmatprep.subr.bf16.mxu0 %v10164_v15 }
 0xb71   :  { %7370 = vmatpush1.bf16.msra.mxu1 %v10241_v38  ;;  %7402 = vmatpush1.bf16.msra.mxu0 %v10166_v56 }
 0xb72   :  { %7372 = vmatprep.subr.bf16.mxu1 %v10244_v42  ;;  %7404 = vmatprep.subr.bf16.mxu0 %v10170_v41 }
 0xb75   :  { %7374 = vmatpush1.bf16.msra.mxu1 %v10247_v57  ;;  %7406 = vmatpush1.bf16.msra.mxu0 %v10172_v1 }
 0xb76   :  { %7408 = vmatprep.subr.bf16.mxu1 %v10199_v35  ;;  %7440 = vmatprep.subr.bf16.mxu0 %v10104_v50 }
 0xc2b   :  { %v2653_v59 = vpop.f32.mrb[22].mxu1  ;;  %v2724_v14 = vpop.f32.mrb[20].mxu0 }
 0xc2c   :  { %v2729_v12 = vadd.f32 %v2653_v59, %v10275_v27  ;;  %v2655_v20 = vpop.f32.mrb[23].mxu1  ;;  %v2726_v32 = vpop.f32.mrb[21].mxu0  ;;  %v2731_v48 = vadd.f32 %v2724_v14, %v10286_v22 }
 0xc2d   :  { %v2730_v30 = vadd.f32 %v2655_v20, %v10277_v11  ;;  %v2732_v9 = vadd.f32 %v2726_v32, %v10282_v6 }
 0xc2e   :  { %v6425_v44 = vmul.f32 -1.442695, %v2729_v12 }
 0xc2f   :  { %v6426_v63 = vmul.f32 -1.442695, %v2730_v30  ;;  %v6427_v5 = vmul.f32 -1.442695, %v2732_v9 }
 0xc30   :  { %8658 = vpow2.f32 %v6425_v44 }
 0xc31   :  { %8660 = vpow2.f32 %v6426_v63 }
 0xc32   :  { %8662 = vpow2.f32 %v6427_v5 }
 0xc33   :  { %8664 = vtanh.f32 %v2731_v48 }
 0xc3a   :  { %v8659_v8 = vpop.eup %8658 }
 0xc3b   :  { %v8661_v51 = vpop.eup %8660  ;;  %v2736_v21 = vadd.f32 1.0, %v8659_v8 }
 0xc3c   :  { %v2742_v24 = vadd.f32 1.0, %v8661_v51  ;;  %v8663_v49 = vpop.eup %8662 }
 0xc3d   :  { %8666 = vrcp.f32 %v2736_v21  ;;  %v8665_v62 = vpop.eup %8664  ;;  %v2749_v12 = vadd.f32 1.0, %v8663_v49 }
 0xc3e   :  { %8668 = vrcp.f32 %v2742_v24 }
 0xc3f   :  { %8670 = vrcp.f32 %v2749_v12 }
 0xc47   :  { %v8667_v60 = vpop.eup %8666 }
 0xc48   :  { %v8669_v28 = vpop.eup %8668  ;;  %v2753_v59 = vmul.f32 %v8667_v60, %v8665_v62 }
 0xc49   :  { %v2752_v20 = vmul.f32 %v8669_v28, %v10289_v36  ;;  %v8671_v14 = vpop.eup %8670 }
 0xc4b   :  { %v10335_v32 = vadd.f32 %v2753_v59, %v2752_v20 }
 0xc4d   :  { %8672 = vtanh.f32 %v10335_v32 }
 0xc57   :  { %v8673_v30 = vpop.eup %8672 }
 0xc58   :  { %v10338_v44 = vmul.f32 %v8673_v30, %v8671_v14 }
 0xc5a   :  { %2822 = vmatmul.mubr.f32.vlgmr.msra.gmra.mrb[24].mxu1 %v10338_v44  ;;  %2893 = vmatmul.mubr.f32.vlgmr.msra.gmra.mrb[22].mxu0 %v10338_v44 }
 0xc5b   :  { %7410 = vmatpush1.bf16.msra.mxu1 %v10203_v31  ;;  %7442 = vmatpush1.bf16.msra.mxu0 %v10106_v10 }
 0xc5c   :  { %7412 = vmatprep.subr.bf16.mxu1 %v10206_v45  ;;  %7444 = vmatprep.subr.bf16.mxu0 %v10108_v54 }
 0xc5d   :  { %2991 = vmatprep.mubr.f32.mxu1 %v11571_v0  ;;  %3062 = vmatprep.mubr.f32.mxu0 %v11571_v0 }
 0xc5f   :  { %7414 = vmatpush1.bf16.msra.mxu1 %v10210_v7  ;;  %7446 = vmatpush1.bf16.msra.mxu0 %v10112_v13 }
 0xc60   :  { %7416 = vmatprep.subr.bf16.mxu1 %v10214_v40  ;;  %7448 = vmatprep.subr.bf16.mxu0 %v10115_v16 }
 0xc63   :  { %7418 = vmatpush1.bf16.msra.mxu1 %v10217_v58  ;;  %7450 = vmatpush1.bf16.msra.mxu0 %v10128_v47 }
 0xc64   :  { %7420 = vmatprep.subr.bf16.mxu1 %v10220_v61  ;;  %7452 = vmatprep.subr.bf16.mxu0 %v10132_v53 }
 0xc67   :  { %7422 = vmatpush1.bf16.msra.mxu1 %v10223_v29  ;;  %7454 = vmatpush1.bf16.msra.mxu0 %v10140_v3 }
 0xc68   :  { %7424 = vmatprep.subr.bf16.mxu1 %v10226_v18  ;;  %7456 = vmatprep.subr.bf16.mxu0 %v10143_v4 }
 0xc6b   :  { %7426 = vmatpush1.bf16.msra.mxu1 %v10229_v33  ;;  %7458 = vmatpush1.bf16.msra.mxu0 %v10148_v39 }
 0xc6c   :  { %7428 = vmatprep.subr.bf16.mxu1 %v10232_v37  ;;  %7460 = vmatprep.subr.bf16.mxu0 %v10151_v43 }
 0xc6f   :  { %7430 = vmatpush1.bf16.msra.mxu1 %v10235_v17  ;;  %7462 = vmatpush1.bf16.msra.mxu0 %v10154_v55 }
 0xc70   :  { %7432 = vmatprep.subr.bf16.mxu1 %v10238_v25  ;;  %7464 = vmatprep.subr.bf16.mxu0 %v10164_v15 }
 0xc73   :  { %7434 = vmatpush1.bf16.msra.mxu1 %v10241_v38  ;;  %7466 = vmatpush1.bf16.msra.mxu0 %v10166_v56 }
 0xc74   :  { %7436 = vmatprep.subr.bf16.mxu1 %v10244_v42  ;;  %7468 = vmatprep.subr.bf16.mxu0 %v10170_v41 }
 0xc77   :  { %7438 = vmatpush1.bf16.msra.mxu1 %v10247_v57  ;;  %7470 = vmatpush1.bf16.msra.mxu0 %v10172_v1 }
 0xc78   :  { %7472 = vmatprep.subr.bf16.mxu1 %v10199_v35  ;;  %7504 = vmatprep.subr.bf16.mxu0 %v10104_v50 }
 0xd2d   :  { %v2823_v36 = vpop.f32.mrb[24].mxu1  ;;  %v2894_v63 = vpop.f32.mrb[22].mxu0 }
 0xd2e   :  { %v2899_v9 = vadd.f32 %v2823_v36, %v10275_v27  ;;  %v2825_v5 = vpop.f32.mrb[25].mxu1  ;;  %v2896_v48 = vpop.f32.mrb[23].mxu0  ;;  %v2901_v62 = vadd.f32 %v2894_v63, %v10286_v22 }
 0xd2f   :  { %v2900_v8 = vadd.f32 %v2825_v5, %v10277_v11  ;;  %v2902_v24 = vadd.f32 %v2896_v48, %v10282_v6 }
 0xd30   :  { %v6428_v51 = vmul.f32 -1.442695, %v2899_v9 }
 0xd31   :  { %v6429_v21 = vmul.f32 -1.442695, %v2900_v8  ;;  %v6430_v49 = vmul.f32 -1.442695, %v2902_v24 }
 0xd32   :  { %8674 = vpow2.f32 %v6428_v51 }
 0xd33   :  { %8676 = vpow2.f32 %v6429_v21 }
 0xd34   :  { %8678 = vpow2.f32 %v6430_v49 }
 0xd35   :  { %8680 = vtanh.f32 %v2901_v62 }
 0xd3c   :  { %v8675_v60 = vpop.eup %8674 }
 0xd3d   :  { %v8677_v28 = vpop.eup %8676  ;;  %v2906_v59 = vadd.f32 1.0, %v8675_v60 }
 0xd3e   :  { %v2912_v12 = vadd.f32 1.0, %v8677_v28  ;;  %v8679_v20 = vpop.eup %8678 }
 0xd3f   :  { %8682 = vrcp.f32 %v2906_v59  ;;  %v8681_v14 = vpop.eup %8680  ;;  %v2919_v5 = vadd.f32 1.0, %v8679_v20 }
 0xd40   :  { %8684 = vrcp.f32 %v2912_v12 }
 0xd41   :  { %8686 = vrcp.f32 %v2919_v5 }
 0xd49   :  { %v8683_v30 = vpop.eup %8682 }
 0xd4a   :  { %v8685_v36 = vpop.eup %8684  ;;  %v2923_v9 = vmul.f32 %v8683_v30, %v8681_v14 }
 0xd4b   :  { %v2922_v8 = vmul.f32 %v8685_v36, %v10335_v32  ;;  %v8687_v63 = vpop.eup %8686 }
 0xd4d   :  { %v10381_v48 = vadd.f32 %v2923_v9, %v2922_v8 }
 0xd4f   :  { %8688 = vtanh.f32 %v10381_v48 }
 0xd59   :  { %v8689_v51 = vpop.eup %8688 }
 0xd5a   :  { %v10384_v21 = vmul.f32 %v8689_v51, %v8687_v63 }
 0xd5c   :  { %2992 = vmatmul.mubr.f32.vlgmr.msra.gmra.mrb[26].mxu1 %v10384_v21  ;;  %3063 = vmatmul.mubr.f32.vlgmr.msra.gmra.mrb[24].mxu0 %v10384_v21 }
 0xd5d   :  { %7474 = vmatpush1.bf16.msra.mxu1 %v10203_v31  ;;  %7506 = vmatpush1.bf16.msra.mxu0 %v10106_v10 }
 0xd5e   :  { %7476 = vmatprep.subr.bf16.mxu1 %v10206_v45  ;;  %7508 = vmatprep.subr.bf16.mxu0 %v10108_v54 }
 0xd5f   :  { %3161 = vmatprep.mubr.f32.mxu1 %v11571_v0  ;;  %3232 = vmatprep.mubr.f32.mxu0 %v11571_v0 }
 0xd61   :  { %7478 = vmatpush1.bf16.msra.mxu1 %v10210_v7  ;;  %7510 = vmatpush1.bf16.msra.mxu0 %v10112_v13 }
 0xd62   :  { %7480 = vmatprep.subr.bf16.mxu1 %v10214_v40  ;;  %7512 = vmatprep.subr.bf16.mxu0 %v10115_v16 }
 0xd65   :  { %7482 = vmatpush1.bf16.msra.mxu1 %v10217_v58  ;;  %7514 = vmatpush1.bf16.msra.mxu0 %v10128_v47 }
 0xd66   :  { %7484 = vmatprep.subr.bf16.mxu1 %v10220_v61  ;;  %7516 = vmatprep.subr.bf16.mxu0 %v10132_v53 }
 0xd69   :  { %7486 = vmatpush1.bf16.msra.mxu1 %v10223_v29  ;;  %7518 = vmatpush1.bf16.msra.mxu0 %v10140_v3 }
 0xd6a   :  { %7488 = vmatprep.subr.bf16.mxu1 %v10226_v18  ;;  %7520 = vmatprep.subr.bf16.mxu0 %v10143_v4 }
 0xd6d   :  { %7490 = vmatpush1.bf16.msra.mxu1 %v10229_v33  ;;  %7522 = vmatpush1.bf16.msra.mxu0 %v10148_v39 }
 0xd6e   :  { %7492 = vmatprep.subr.bf16.mxu1 %v10232_v37  ;;  %7524 = vmatprep.subr.bf16.mxu0 %v10151_v43 }
 0xd71   :  { %7494 = vmatpush1.bf16.msra.mxu1 %v10235_v17  ;;  %7526 = vmatpush1.bf16.msra.mxu0 %v10154_v55 }
 0xd72   :  { %7496 = vmatprep.subr.bf16.mxu1 %v10238_v25  ;;  %7528 = vmatprep.subr.bf16.mxu0 %v10164_v15 }
 0xd75   :  { %7498 = vmatpush1.bf16.msra.mxu1 %v10241_v38  ;;  %7530 = vmatpush1.bf16.msra.mxu0 %v10166_v56 }
 0xd76   :  { %7500 = vmatprep.subr.bf16.mxu1 %v10244_v42  ;;  %7532 = vmatprep.subr.bf16.mxu0 %v10170_v41 }
 0xd79   :  { %7502 = vmatpush1.bf16.msra.mxu1 %v10247_v57  ;;  %7534 = vmatpush1.bf16.msra.mxu0 %v10172_v1 }
 0xd7a   :  { %7536 = vmatprep.subr.bf16.mxu1 %v10199_v35  ;;  %7568 = vmatprep.subr.bf16.mxu0 %v10104_v50 }
 0xe2f   :  { %v2993_v32 = vpop.f32.mrb[26].mxu1  ;;  %v3064_v24 = vpop.f32.mrb[24].mxu0 }
 0xe30   :  { %v3069_v49 = vadd.f32 %v2993_v32, %v10275_v27  ;;  %v2995_v62 = vpop.f32.mrb[27].mxu1  ;;  %v3066_v60 = vpop.f32.mrb[25].mxu0  ;;  %v3071_v30 = vadd.f32 %v3064_v24, %v10286_v22 }
 0xe31   :  { %v3070_v28 = vadd.f32 %v2995_v62, %v10277_v11  ;;  %v3072_v20 = vadd.f32 %v3066_v60, %v10282_v6 }
 0xe32   :  { %v6431_v59 = vmul.f32 -1.442695, %v3069_v49 }
 0xe33   :  { %v6432_v12 = vmul.f32 -1.442695, %v3070_v28  ;;  %v6433_v14 = vmul.f32 -1.442695, %v3072_v20 }
 0xe34   :  { %8690 = vpow2.f32 %v6431_v59 }
 0xe35   :  { %8692 = vpow2.f32 %v6432_v12 }
 0xe36   :  { %8694 = vpow2.f32 %v6433_v14 }
 0xe37   :  { %8696 = vtanh.f32 %v3071_v30 }
 0xe3e   :  { %v8691_v36 = vpop.eup %8690 }
 0xe3f   :  { %v8693_v9 = vpop.eup %8692  ;;  %v3076_v5 = vadd.f32 1.0, %v8691_v36 }
 0xe40   :  { %v3082_v8 = vadd.f32 1.0, %v8693_v9  ;;  %v8695_v63 = vpop.eup %8694 }
 0xe41   :  { %8698 = vrcp.f32 %v3076_v5  ;;  %v8697_v51 = vpop.eup %8696  ;;  %v3089_v28 = vadd.f32 1.0, %v8695_v63 }
 0xe42   :  { %8700 = vrcp.f32 %v3082_v8 }
 0xe43   :  { %8702 = vrcp.f32 %v3089_v28 }
 0xe4b   :  { %v8699_v32 = vpop.eup %8698 }
 0xe4c   :  { %v8701_v49 = vpop.eup %8700  ;;  %v3093_v62 = vmul.f32 %v8699_v32, %v8697_v51 }
 0xe4d   :  { %v3092_v59 = vmul.f32 %v8701_v49, %v10381_v48  ;;  %v8703_v24 = vpop.eup %8702 }
 0xe4f   :  { %v10427_v60 = vadd.f32 %v3093_v62, %v3092_v59 }
 0xe51   :  { %8704 = vtanh.f32 %v10427_v60 }
 0xe5b   :  { %v8705_v12 = vpop.eup %8704 }
 0xe5c   :  { %v10430_v20 = vmul.f32 %v8705_v12, %v8703_v24 }
 0xe5e   :  { %3162 = vmatmul.mubr.f32.vlgmr.msra.gmra.mrb[28].mxu1 %v10430_v20  ;;  %3233 = vmatmul.mubr.f32.vlgmr.msra.gmra.mrb[26].mxu0 %v10430_v20 }
 0xe5f   :  { %7538 = vmatpush1.bf16.msra.mxu1 %v10203_v31  ;;  %7570 = vmatpush1.bf16.msra.mxu0 %v10106_v10 }
 0xe60   :  { %7540 = vmatprep.subr.bf16.mxu1 %v10206_v45  ;;  %7572 = vmatprep.subr.bf16.mxu0 %v10108_v54 }
 0xe61   :  { %3331 = vmatprep.mubr.f32.mxu1 %v11571_v0  ;;  %3402 = vmatprep.mubr.f32.mxu0 %v11571_v0 }
 0xe63   :  { %7542 = vmatpush1.bf16.msra.mxu1 %v10210_v7  ;;  %7574 = vmatpush1.bf16.msra.mxu0 %v10112_v13 }
 0xe64   :  { %7544 = vmatprep.subr.bf16.mxu1 %v10214_v40  ;;  %7576 = vmatprep.subr.bf16.mxu0 %v10115_v16 }
 0xe67   :  { %7546 = vmatpush1.bf16.msra.mxu1 %v10217_v58  ;;  %7578 = vmatpush1.bf16.msra.mxu0 %v10128_v47 }
 0xe68   :  { %7548 = vmatprep.subr.bf16.mxu1 %v10220_v61  ;;  %7580 = vmatprep.subr.bf16.mxu0 %v10132_v53 }
 0xe6b   :  { %7550 = vmatpush1.bf16.msra.mxu1 %v10223_v29  ;;  %7582 = vmatpush1.bf16.msra.mxu0 %v10140_v3 }
 0xe6c   :  { %7552 = vmatprep.subr.bf16.mxu1 %v10226_v18  ;;  %7584 = vmatprep.subr.bf16.mxu0 %v10143_v4 }
 0xe6f   :  { %7554 = vmatpush1.bf16.msra.mxu1 %v10229_v33  ;;  %7586 = vmatpush1.bf16.msra.mxu0 %v10148_v39 }
 0xe70   :  { %7556 = vmatprep.subr.bf16.mxu1 %v10232_v37  ;;  %7588 = vmatprep.subr.bf16.mxu0 %v10151_v43 }
 0xe73   :  { %7558 = vmatpush1.bf16.msra.mxu1 %v10235_v17  ;;  %7590 = vmatpush1.bf16.msra.mxu0 %v10154_v55 }
 0xe74   :  { %7560 = vmatprep.subr.bf16.mxu1 %v10238_v25  ;;  %7592 = vmatprep.subr.bf16.mxu0 %v10164_v15 }
 0xe77   :  { %7562 = vmatpush1.bf16.msra.mxu1 %v10241_v38  ;;  %7594 = vmatpush1.bf16.msra.mxu0 %v10166_v56 }
 0xe78   :  { %7564 = vmatprep.subr.bf16.mxu1 %v10244_v42  ;;  %7596 = vmatprep.subr.bf16.mxu0 %v10170_v41 }
 0xe7b   :  { %7566 = vmatpush1.bf16.msra.mxu1 %v10247_v57  ;;  %7598 = vmatpush1.bf16.msra.mxu0 %v10172_v1 }
 0xe7c   :  { %7600 = vmatprep.subr.bf16.mxu1 %v10199_v35  ;;  %7632 = vmatprep.subr.bf16.mxu0 %v10104_v50 }
 0xf31   :  { %v3163_v48 = vpop.f32.mrb[28].mxu1  ;;  %v3234_v14 = vpop.f32.mrb[26].mxu0 }
 0xf32   :  { %v3239_v30 = vadd.f32 %v3163_v48, %v10275_v27  ;;  %v3165_v36 = vpop.f32.mrb[29].mxu1  ;;  %v3236_v9 = vpop.f32.mrb[27].mxu0  ;;  %v3241_v49 = vadd.f32 %v3234_v14, %v10286_v22 }
 0xf33   :  { %v3240_v5 = vadd.f32 %v3165_v36, %v10277_v11  ;;  %v3242_v51 = vadd.f32 %v3236_v9, %v10282_v6 }
 0xf34   :  { %v6434_v8 = vmul.f32 -1.442695, %v3239_v30 }
 0xf35   :  { %v6435_v63 = vmul.f32 -1.442695, %v3240_v5  ;;  %v6436_v32 = vmul.f32 -1.442695, %v3242_v51 }
 0xf36   :  { %8706 = vpow2.f32 %v6434_v8 }
 0xf37   :  { %8708 = vpow2.f32 %v6435_v63 }
 0xf38   :  { %8710 = vpow2.f32 %v6436_v32 }
 0xf39   :  { %8712 = vtanh.f32 %v3241_v49 }
 0xf40   :  { %v8707_v62 = vpop.eup %8706 }
 0xf41   :  { %v8709_v28 = vpop.eup %8708  ;;  %v3246_v59 = vadd.f32 1.0, %v8707_v62 }
 0xf42   :  { %v3252_v24 = vadd.f32 1.0, %v8709_v28  ;;  %v8711_v12 = vpop.eup %8710 }
 0xf43   :  { %8714 = vrcp.f32 %v3246_v59  ;;  %v8713_v48 = vpop.eup %8712  ;;  %v3259_v8 = vadd.f32 1.0, %v8711_v12 }
 0xf44   :  { %8716 = vrcp.f32 %v3252_v24 }
 0xf45   :  { %8718 = vrcp.f32 %v3259_v8 }
 0xf4d   :  { %v8715_v36 = vpop.eup %8714 }
 0xf4e   :  { %v8717_v30 = vpop.eup %8716  ;;  %v3263_v5 = vmul.f32 %v8715_v36, %v8713_v48 }
 0xf4f   :  { %v3262_v63 = vmul.f32 %v8717_v30, %v10427_v60  ;;  %v8719_v14 = vpop.eup %8718 }
 0xf51   :  { %v10473_v9 = vadd.f32 %v3263_v5, %v3262_v63 }
 0xf53   :  { %8720 = vtanh.f32 %v10473_v9 }
 0xf5d   :  { %v8721_v51 = vpop.eup %8720 }
 0xf5e   :  { %v10476_v32 = vmul.f32 %v8721_v51, %v8719_v14 }
 0xf60   :  { %3332 = vmatmul.mubr.f32.vlgmr.msra.gmra.mrb[30].mxu1 %v10476_v32  ;;  %3403 = vmatmul.mubr.f32.vlgmr.msra.gmra.mrb[28].mxu0 %v10476_v32 }
 0xf61   :  { %7602 = vmatpush1.bf16.msra.mxu1 %v10203_v31  ;;  %7634 = vmatpush1.bf16.msra.mxu0 %v10106_v10 }
 0xf62   :  { %7604 = vmatprep.subr.bf16.mxu1 %v10206_v45  ;;  %7636 = vmatprep.subr.bf16.mxu0 %v10108_v54 }
 0xf63   :  { %3501 = vmatprep.mubr.f32.mxu1 %v11571_v0  ;;  %3572 = vmatprep.mubr.f32.mxu0 %v11571_v0 }
 0xf65   :  { %7606 = vmatpush1.bf16.msra.mxu1 %v10210_v7  ;;  %7638 = vmatpush1.bf16.msra.mxu0 %v10112_v13 }
 0xf66   :  { %7608 = vmatprep.subr.bf16.mxu1 %v10214_v40  ;;  %7640 = vmatprep.subr.bf16.mxu0 %v10115_v16 }
 0xf69   :  { %7610 = vmatpush1.bf16.msra.mxu1 %v10217_v58  ;;  %7642 = vmatpush1.bf16.msra.mxu0 %v10128_v47 }
 0xf6a   :  { %7612 = vmatprep.subr.bf16.mxu1 %v10220_v61  ;;  %7644 = vmatprep.subr.bf16.mxu0 %v10132_v53 }
 0xf6d   :  { %7614 = vmatpush1.bf16.msra.mxu1 %v10223_v29  ;;  %7646 = vmatpush1.bf16.msra.mxu0 %v10140_v3 }
 0xf6e   :  { %7616 = vmatprep.subr.bf16.mxu1 %v10226_v18  ;;  %7648 = vmatprep.subr.bf16.mxu0 %v10143_v4 }
 0xf71   :  { %7618 = vmatpush1.bf16.msra.mxu1 %v10229_v33  ;;  %7650 = vmatpush1.bf16.msra.mxu0 %v10148_v39 }
 0xf72   :  { %7620 = vmatprep.subr.bf16.mxu1 %v10232_v37  ;;  %7652 = vmatprep.subr.bf16.mxu0 %v10151_v43 }
 0xf75   :  { %7622 = vmatpush1.bf16.msra.mxu1 %v10235_v17  ;;  %7654 = vmatpush1.bf16.msra.mxu0 %v10154_v55 }
 0xf76   :  { %7624 = vmatprep.subr.bf16.mxu1 %v10238_v25  ;;  %7656 = vmatprep.subr.bf16.mxu0 %v10164_v15 }
 0xf79   :  { %7626 = vmatpush1.bf16.msra.mxu1 %v10241_v38  ;;  %7658 = vmatpush1.bf16.msra.mxu0 %v10166_v56 }
 0xf7a   :  { %7628 = vmatprep.subr.bf16.mxu1 %v10244_v42  ;;  %7660 = vmatprep.subr.bf16.mxu0 %v10170_v41 }
 0xf7d   :  { %7630 = vmatpush1.bf16.msra.mxu1 %v10247_v57  ;;  %7662 = vmatpush1.bf16.msra.mxu0 %v10172_v1 }
 0xf7e   :  { %7664 = vmatprep.subr.bf16.mxu1 %v10199_v35  ;;  %7696 = vmatprep.subr.bf16.mxu0 %v10104_v50 }
0x1033   :  { %v3333_v60 = vpop.f32.mrb[30].mxu1  ;;  %v3404_v49 = vpop.f32.mrb[28].mxu0 }
0x1034   :  { %v3409_v62 = vadd.f32 %v3333_v60, %v10275_v27  ;;  %v3335_v28 = vpop.f32.mrb[31].mxu1  ;;  %v3406_v59 = vpop.f32.mrb[29].mxu0  ;;  %v3411_v5 = vadd.f32 %v3404_v49, %v10286_v22 }
0x1035   :  { %v3410_v24 = vadd.f32 %v3335_v28, %v10277_v11  ;;  %v3412_v36 = vadd.f32 %v3406_v59, %v10282_v6 }
0x1036   :  { %v6437_v12 = vmul.f32 -1.442695, %v3409_v62 }
0x1037   :  { %v6438_v48 = vmul.f32 -1.442695, %v3410_v24  ;;  %v6439_v30 = vmul.f32 -1.442695, %v3412_v36 }
0x1038   :  { %8722 = vpow2.f32 %v6437_v12 }
0x1039   :  { %8724 = vpow2.f32 %v6438_v48 }
0x103a   :  { %8726 = vpow2.f32 %v6439_v30 }
0x103b   :  { %8728 = vtanh.f32 %v3411_v5  ;;  %v3781_v5 = vld [vmem:[#allocation7 + $0x20] sm:$0xff] }
0x1042   :  { %v8723_v35 = vpop.eup %8722 }
0x1043   :  { %v8725_v8 = vpop.eup %8724  ;;  %v3416_v50 = vadd.f32 1.0, %v8723_v35  ;;  %v3782_v35 = vld [vmem:[#allocation7 + $0x28] sm:$0xff] }
0x1044   :  { %v3422_v63 = vadd.f32 1.0, %v8725_v8  ;;  %v8727_v14 = vpop.eup %8726  ;;  %v7735_v8 = vpack.c.bf16 %v3782_v35, %v3781_v5 }
0x1045   :  { %8730 = vrcp.f32 %v3416_v50  ;;  %v8729_v51 = vpop.eup %8728  ;;  %v3429_v24 = vadd.f32 1.0, %v8727_v14  ;;  %v3783_v50 = vld [vmem:[#allocation7 + $0x30] sm:$0xff] }
0x1046   :  { %8732 = vrcp.f32 %v3422_v63  ;;  %v3784_v63 = vld [vmem:[#allocation7 + $0x38] sm:$0xff] }
0x1047   :  { %8734 = vrcp.f32 %v3429_v24  ;;  %v7739_v14 = vpack.c.bf16 %v3784_v63, %v3783_v50  ;;  %v3788_v24 = vld [vmem:[#allocation7 + $0x58] sm:$0xff] }
0x104f   :  { %v8731_v60 = vpop.eup %8730 }
0x1050   :  { %v8733_v62 = vpop.eup %8732  ;;  %v3433_v28 = vmul.f32 %v8731_v60, %v8729_v51  ;;  %v3785_v51 = vld [vmem:[#allocation7 + $0x40] sm:$0xff]  ;;  %v3786_v60 = vld [vmem:[#allocation7 + $0x48] sm:$0xff] }
0x1051   :  { %v3432_v12 = vmul.f32 %v8733_v62, %v10473_v9  ;;  %v8735_v49 = vpop.eup %8734  ;;  %v7743_v62 = vpack.c.bf16 %v3786_v60, %v3785_v51 }
0x1053   :  { %v10519_v59 = vadd.f32 %v3433_v28, %v3432_v12  ;;  %v3787_v28 = vld [vmem:[#allocation7 + $0x50] sm:$0xff] }
0x1054   :  { %v7747_v12 = vpack.c.bf16 %v3788_v24, %v3787_v28 }
0x1055   :  { %8736 = vtanh.f32 %v10519_v59 }
0x105f   :  { %v8737_v48 = vpop.eup %8736 }
0x1060   :  { %v10522_v36 = vmul.f32 %v8737_v48, %v8735_v49  ;;  %v3791_v48 = vld [vmem:[#allocation7 + $0x70] sm:$0xff] }
0x1062   :  { %3502 = vmatmul.mubr.f32.vlgmr.msra.gmra.mrb[32].mxu1 %v10522_v36  ;;  %3573 = vmatmul.mubr.f32.vlgmr.msra.gmra.mrb[30].mxu0 %v10522_v36 }
0x1063   :  { %7666 = vmatpush1.bf16.msra.mxu1 %v10203_v31  ;;  %7698 = vmatpush1.bf16.msra.mxu0 %v10106_v10  ;;  %v3777_v10 = vld [vmem:[#allocation7] sm:$0xff] }
0x1064   :  { %7668 = vmatprep.subr.bf16.mxu1 %v10206_v45  ;;  %7700 = vmatprep.subr.bf16.mxu0 %v10108_v54  ;;  %v3778_v54 = vld [vmem:[#allocation7 + $0x8] sm:$0xff] }
0x1065   :  { %3671 = vmatprep.mubr.f32.mxu1 %v11571_v0  ;;  %3742 = vmatprep.mubr.f32.mxu0 %v11571_v0 }
0x1067   :  { %7670 = vmatpush1.bf16.msra.mxu1 %v10210_v7  ;;  %7702 = vmatpush1.bf16.msra.mxu0 %v10112_v13  ;;  %v7727_v13 = vpack.c.bf16 %v3778_v54, %v3777_v10  ;;  %v3792_v10 = vld [vmem:[#allocation7 + $0x78] sm:$0xff] }
0x1068   :  { %7672 = vmatprep.subr.bf16.mxu1 %v10214_v40  ;;  %7704 = vmatprep.subr.bf16.mxu0 %v10115_v16  ;;  %v7755_v54 = vpack.c.bf16 %v3792_v10, %v3791_v48 }
0x106b   :  { %7674 = vmatpush1.bf16.msra.mxu1 %v10217_v58  ;;  %7706 = vmatpush1.bf16.msra.mxu0 %v10128_v47 }
0x106c   :  { %7676 = vmatprep.subr.bf16.mxu1 %v10220_v61  ;;  %7708 = vmatprep.subr.bf16.mxu0 %v10132_v53 }
0x106f   :  { %7678 = vmatpush1.bf16.msra.mxu1 %v10223_v29  ;;  %7710 = vmatpush1.bf16.msra.mxu0 %v10140_v3 }
0x1070   :  { %7680 = vmatprep.subr.bf16.mxu1 %v10226_v18  ;;  %7712 = vmatprep.subr.bf16.mxu0 %v10143_v4 }
0x1073   :  { %7682 = vmatpush1.bf16.msra.mxu1 %v10229_v33  ;;  %7714 = vmatpush1.bf16.msra.mxu0 %v10148_v39 }
0x1074   :  { %7684 = vmatprep.subr.bf16.mxu1 %v10232_v37  ;;  %7716 = vmatprep.subr.bf16.mxu0 %v10151_v43 }
0x1077   :  { %7686 = vmatpush1.bf16.msra.mxu1 %v10235_v17  ;;  %7718 = vmatpush1.bf16.msra.mxu0 %v10154_v55 }
0x1078   :  { %7688 = vmatprep.subr.bf16.mxu1 %v10238_v25  ;;  %7720 = vmatprep.subr.bf16.mxu0 %v10164_v15  ;;  %v3779_v25 = vld [vmem:[#allocation7 + $0x10] sm:$0xff] }
0x107b   :  { %7690 = vmatpush1.bf16.msra.mxu1 %v10241_v38  ;;  %7722 = vmatpush1.bf16.msra.mxu0 %v10166_v56  ;;  %v3780_v38 = vld [vmem:[#allocation7 + $0x18] sm:$0xff] }
0x107c   :  { %7692 = vmatprep.subr.bf16.mxu1 %v10244_v42  ;;  %7724 = vmatprep.subr.bf16.mxu0 %v10170_v41  ;;  %v7731_v30 = vpack.c.bf16 %v3780_v38, %v3779_v25 }
0x107f   :  { %7694 = vmatpush1.bf16.msra.mxu1 %v10247_v57  ;;  %7726 = vmatpush1.bf16.msra.mxu0 %v10172_v1 }
0x1080   :  { %7728 = vmatprep.subr.bf16.mxu1 %v7727_v13 }
0x1135   :  { %v3503_v16 = vpop.f32.mrb[32].mxu1  ;;  %v3574_v47 = vpop.f32.mrb[30].mxu0 }
0x1136   :  { %v3579_v53 = vadd.f32 %v3503_v16, %v10275_v27  ;;  %v3505_v3 = vpop.f32.mrb[33].mxu1  ;;  %v3576_v4 = vpop.f32.mrb[31].mxu0  ;;  %v3581_v41 = vadd.f32 %v3574_v47, %v10286_v22 }
0x1137   :  { %v3580_v39 = vadd.f32 %v3505_v3, %v10277_v11  ;;  %v3582_v15 = vadd.f32 %v3576_v4, %v10282_v6 }
0x1138   :  { %v6440_v43 = vmul.f32 -1.442695, %v3579_v53 }
0x1139   :  { %v6441_v55 = vmul.f32 -1.442695, %v3580_v39  ;;  %v6442_v56 = vmul.f32 -1.442695, %v3582_v15 }
0x113a   :  { %8738 = vpow2.f32 %v6440_v43 }
0x113b   :  { %8740 = vpow2.f32 %v6441_v55 }
0x113c   :  { %8742 = vpow2.f32 %v6442_v56 }
0x113d   :  { %8744 = vtanh.f32 %v3581_v41 }
0x1144   :  { %v8739_v1 = vpop.eup %8738 }
0x1145   :  { %v8741_v31 = vpop.eup %8740  ;;  %v3586_v45 = vadd.f32 1.0, %v8739_v1 }
0x1146   :  { %v3592_v7 = vadd.f32 1.0, %v8741_v31  ;;  %v8743_v40 = vpop.eup %8742 }
0x1147   :  { %8746 = vrcp.f32 %v3586_v45  ;;  %v8745_v58 = vpop.eup %8744  ;;  %v3599_v33 = vadd.f32 1.0, %v8743_v40 }
0x1148   :  { %8748 = vrcp.f32 %v3592_v7 }
0x1149   :  { %8750 = vrcp.f32 %v3599_v33 }
0x1151   :  { %v8747_v61 = vpop.eup %8746 }
0x1152   :  { %v8749_v29 = vpop.eup %8748  ;;  %v3603_v18 = vmul.f32 %v8747_v61, %v8745_v58 }
0x1153   :  { %v3602_v37 = vmul.f32 %v8749_v29, %v10519_v59  ;;  %v8751_v42 = vpop.eup %8750  ;;  %v3790_v59 = vld [vmem:[#allocation7 + $0x68] sm:$0xff] }
0x1155   :  { %v10563_v17 = vadd.f32 %v3603_v18, %v3602_v37 }
0x1157   :  { %8752 = vtanh.f32 %v10563_v17 }
0x1161   :  { %v8753_v57 = vpop.eup %8752 }
0x1162   :  { %v3606_v9 = vmul.f32 %v8753_v57, %v8751_v42 }
0x1164   :  { %3672 = vmatmul.mubr.f32.vlgmr.msra.gmra.mrb[34].mxu1 %v3606_v9  ;;  %3743 = vmatmul.mubr.f32.vlgmr.msra.gmra.mrb[32].mxu0 %v3606_v9 }
0x1165   :  { %7730 = vmatpush3.bf16.msra.mxu1 %v7727_v13  ;;  %6612 = vmatprep.mubr.f32.mxu1 %v10292_v46  ;;  %v3789_v46 = vld [vmem:[#allocation7 + $0x60] sm:$0xff] }
0x1166   :  { %7732 = vmatprep.subr.bf16.mxu1 %v7731_v30  ;;  %4682 = vmatprep.mubr.f32.mxu0 %v11571_v0  ;;  %v7751_v49 = vpack.c.bf16 %v3790_v59, %v3789_v46 }
0x1169   :  { %7734 = vmatpush3.bf16.msra.mxu1 %v7731_v30 }
0x116a   :  { %7736 = vmatprep.subr.bf16.mxu1 %v7735_v8 }
0x116d   :  { %7738 = vmatpush3.bf16.msra.mxu1 %v7735_v8 }
0x116e   :  { %7740 = vmatprep.subr.bf16.mxu1 %v7739_v14 }
0x1171   :  { %7742 = vmatpush3.bf16.msra.mxu1 %v7739_v14 }
0x1172   :  { %7744 = vmatprep.subr.bf16.mxu1 %v7743_v62 }
0x1175   :  { %7746 = vmatpush3.bf16.msra.mxu1 %v7743_v62 }
0x1176   :  { %7748 = vmatprep.subr.bf16.mxu1 %v7747_v12 }
0x1179   :  { %7750 = vmatpush3.bf16.msra.mxu1 %v7747_v12 }
0x117a   :  { %7752 = vmatprep.subr.bf16.mxu1 %v7751_v49 }
0x117d   :  { %7754 = vmatpush3.bf16.msra.mxu1 %v7751_v49 }
0x117e   :  { %7756 = vmatprep.subr.bf16.mxu1 %v7755_v54 }
0x1181   :  { %7758 = vmatpush3.bf16.msra.mxu1 %v7755_v54 }
0x1184   :  { %6613 = vmatmul.mubr.f32.vlgmr.msra.gmra.mrb[36].mxu1 %v10338_v44 }
0x1185   :  { %6615 = vmatprep.mubr.f32.mxu1 %v10384_v21 }
0x1188   :  { %6616 = vmatmul.mubr.f32.gmra.mrb[38].mxu1 %v10430_v20 }
0x1189   :  { %6618 = vmatprep.mubr.f32.mxu1 %v10476_v32 }
0x118c   :  { %6619 = vmatmul.mubr.f32.gmra.mrb[40].mxu1 %v10522_v36 }
0x118d   :  { %6621 = vmatprep.mubr.f32.mxu1 %v3606_v9 }
0x1237   :  { %v3673_v13 = vpop.f32.mrb[34].mxu1  ;;  %v3744_v16 = vpop.f32.mrb[32].mxu0 }
0x1238   :  { %v3749_v47 = vadd.f32 %v3673_v13, %v10275_v27  ;;  %v3675_v53 = vpop.f32.mrb[35].mxu1  ;;  %v3746_v3 = vpop.f32.mrb[33].mxu0  ;;  %v3751_v20 = vadd.f32 %v3744_v16, %v10286_v22 }
0x1239   :  { %v3750_v4 = vadd.f32 %v3675_v53, %v10277_v11  ;;  %v3752_v44 = vadd.f32 %v3746_v3, %v10282_v6  ;;  %v10581_v6 = vld [vmem:[%s11560_s13] ss:$0 sm:$0xff]  ;;  %s9261_s13 = smov 122  }
0x123a   :  { %v6443_v39 = vmul.f32 -1.442695, %v3749_v47 }
0x123b   :  { %v6444_v43 = vmul.f32 -1.442695, %v3750_v4  ;;  %v6445_v21 = vmul.f32 -1.442695, %v3752_v44 }
0x123c   :  { %8754 = vpow2.f32 %v6443_v39 }
0x123d   :  { %8756 = vpow2.f32 %v6444_v43 }
0x123e   :  { %8758 = vpow2.f32 %v6445_v21 }
0x123f   :  { %8760 = vtanh.f32 %v3751_v20 }
0x1246   :  { %v8755_v32 = vpop.eup %8754 }
0x1247   :  { %v8757_v36 = vpop.eup %8756  ;;  %v3756_v55 = vadd.f32 1.0, %v8755_v32 }
0x1248   :  { %v3762_v15 = vadd.f32 1.0, %v8757_v36  ;;  %v8759_v27 = vpop.eup %8758 }
0x1249   :  { %8762 = vrcp.f32 %v3756_v55  ;;  %v8761_v56 = vpop.eup %8760  ;;  %v3769_v31 = vadd.f32 1.0, %v8759_v27 }
0x124a   :  { %8764 = vrcp.f32 %v3762_v15 }
0x124b   :  { %8766 = vrcp.f32 %v3769_v31 }
0x1253   :  { %v8763_v11 = vpop.eup %8762 }
0x1254   :  { %v8765_v41 = vpop.eup %8764  ;;  %v3773_v1 = vmul.f32 %v8763_v11, %v8761_v56 }
0x1255   :  { %v3772_v45 = vmul.f32 %v8765_v41, %v10563_v17  ;;  %v8767_v9 = vpop.eup %8766 }
0x1257   :  { %v6614_v22 = vpop.f32.mrb[36].mxu1  ;;  %v3774_v7 = vadd.f32 %v3773_v1, %v3772_v45 }
0x1258   :  { %v10584_v40 = vadd.f32 %v6614_v22, %v10581_v6  ;;  %v3866_v58 = vpop.f32.mrb[37].mxu1 }
0x1259   :  { %v10587_v61 = vadd.f32 %v10581_v6, %v3866_v58  ;;  %8768 = vtanh.f32 %v3774_v7 }
0x125a   :  { %v3998_v29 = vsel %vm3994_vm8, %v10584_v40, -inf  ;;  %v4119_v17 = vsel %vm4115_vm9, %v10584_v40, -inf  ;;  %v4241_v30 = vsel %vm4237_vm11, %v10584_v40, -inf  ;;  %v4362_v50 = vsel %vm4358_vm12, %v10584_v40, -inf }
0x125b   :  { %3999 = vmax.xlane.f32.xlu1 %v3998_v29  ;;  %v6617_v18 = vpop.f32.mrb[38].mxu1  ;;  %v3995_v33 = vsel %vm3994_vm8, %v10587_v61, -inf  ;;  %v3906_v42 = vsel %vm3905_vm10, %v10587_v61, -inf  ;;  %v3909_v51 = vsel %vm3905_vm10, %v10584_v40, -inf  ;;  %v4116_v62 = vsel %vm4115_vm9, %v10587_v61, -inf }
0x125c   :  { %v3876_v37 = vpop.f32.mrb[39].mxu1  ;;  %3996 = vmax.xlane.f32.xlu0 %v3995_v33  ;;  %v10596_v25 = vadd.f32 %v6617_v18, %v10581_v6  ;;  %v4238_v12 = vsel %vm4237_vm11, %v10587_v61, -inf  ;;  %v4359_v59 = vsel %vm4358_vm12, %v10587_v61, -inf }
0x125d   :  { %v10607_v63 = vadd.f32 %v10581_v6, %v3876_v37 }
0x125e   :  { %v4004_v35 = vsel %vm3994_vm8, %v10596_v25, -inf  ;;  %v4247_v14 = vsel %vm4237_vm11, %v10596_v25, -inf  ;;  %v4125_v10 = vsel %vm4115_vm9, %v10596_v25, -inf  ;;  %v4368_v13 = vsel %vm4358_vm12, %v10596_v25, -inf }
0x125f   :  { %4120 = vmax.xlane.f32.xlu1 %v4119_v17  ;;  %v6620_v38 = vpop.f32.mrb[40].mxu1  ;;  %v4244_v60 = vsel %vm4237_vm11, %v10607_v63, -inf  ;;  %v3912_v24 = vsel %vm3905_vm10, %v10607_v63, -inf  ;;  %v3915_v47 = vsel %vm3905_vm10, %v10596_v25, -inf  ;;  %v4001_v3 = vsel %vm3994_vm8, %v10607_v63, -inf }
0x1260   :  { %v3886_v57 = vpop.f32.mrb[41].mxu1  ;;  %3907 = vmax.xlane.f32.xlu0 %v3906_v42  ;;  %v10619_v28 = vadd.f32 %v6620_v38, %v10581_v6  ;;  %v4122_v4 = vsel %vm4115_vm9, %v10607_v63, -inf  ;;  %v4365_v39 = vsel %vm4358_vm12, %v10607_v63, -inf }
0x1261   :  { %v10630_v49 = vadd.f32 %v10581_v6, %v3886_v57 }
0x1262   :  { %v4010_v46 = vsel %vm3994_vm8, %v10619_v28, -inf  ;;  %v4253_v48 = vsel %vm4237_vm11, %v10619_v28, -inf  ;;  %v4131_v43 = vsel %vm4115_vm9, %v10619_v28, -inf  ;;  %v4374_v44 = vsel %vm4358_vm12, %v10619_v28, -inf }
0x1263   :  { %v8769_v5 = vpop.eup %8768  ;;  %4242 = vmax.xlane.f32.xlu1 %v4241_v30  ;;  %v4007_v54 = vsel %vm3994_vm8, %v10630_v49, -inf  ;;  %v4250_v16 = vsel %vm4237_vm11, %v10630_v49, -inf  ;;  %v3918_v53 = vsel %vm3905_vm10, %v10630_v49, -inf  ;;  %v3921_v21 = vsel %vm3905_vm10, %v10619_v28, -inf }
0x1264   :  { %4005 = vmax.xlane.f32.xlu0 %v4004_v35  ;;  %v3776_v8 = vmul.f32 %v8769_v5, %v8767_v9  ;;  %v4128_v20 = vsel %vm4115_vm9, %v10630_v49, -inf  ;;  %v4371_v32 = vsel %vm4358_vm12, %v10630_v49, -inf }
0x1266   :  { %6622 = vmatmul.mubr.f32.gmra.mrb[42].mxu1 %v3776_v8 }
0x1267   :  { %4363 = vmax.xlane.f32.xlu1 %v4362_v50  ;;  %4795 = vmatprep.mubr.f32.mxu1 %v11571_v0  ;;  %v4545_v0 = vld [vmem:[#allocation9 + $0x68] sm:$0xff] }
0x1268   :  { %4248 = vmax.xlane.f32.xlu0 %v4247_v14 }
0x126b   :  { %3910 = vmax.xlane.f32.xlu1 %v3909_v51 }
0x126c   :  { %4245 = vmax.xlane.f32.xlu0 %v4244_v60 }
0x126f   :  { %4117 = vmax.xlane.f32.xlu1 %v4116_v62 }
0x1270   :  { %3913 = vmax.xlane.f32.xlu0 %v3912_v24 }
0x1273   :  { %4239 = vmax.xlane.f32.xlu1 %v4238_v12 }
0x1274   :  { %4011 = vmax.xlane.f32.xlu0 %v4010_v46 }
0x1277   :  { %4360 = vmax.xlane.f32.xlu1 %v4359_v59 }
0x1278   :  { %4254 = vmax.xlane.f32.xlu0 %v4253_v48 }
0x127b   :  { %4126 = vmax.xlane.f32.xlu1 %v4125_v10 }
0x127c   :  { %4008 = vmax.xlane.f32.xlu0 %v4007_v54 }
0x127f   :  { %4369 = vmax.xlane.f32.xlu1 %v4368_v13 }
0x1280   :  { %4251 = vmax.xlane.f32.xlu0 %v4250_v16 }
0x1283   :  { %3916 = vmax.xlane.f32.xlu1 %v3915_v47 }
0x1284   :  { %3919 = vmax.xlane.f32.xlu0 %v3918_v53 }
0x1287   :  { %4002 = vmax.xlane.f32.xlu1 %v4001_v3 }
0x128b   :  { %4123 = vmax.xlane.f32.xlu1 %v4122_v4 }
0x128f   :  { %4366 = vmax.xlane.f32.xlu1 %v4365_v39 }
0x1293   :  { %4132 = vmax.xlane.f32.xlu1 %v4131_v43 }
0x1297   :  { %4375 = vmax.xlane.f32.xlu1 %v4374_v44 }
0x129b   :  { %3922 = vmax.xlane.f32.xlu1 %v3921_v21 }
0x129f   :  { %4129 = vmax.xlane.f32.xlu1 %v4128_v20 }
0x12a3   :  { %4372 = vmax.xlane.f32.xlu1 %v4371_v32 }
0x12e8   :  { %v4000_v36 = vpop.xlane.xlu1 %3999 }
0x12e9   :  { %v4020_v55 = vsub.f32 %v10584_v40, %v4000_v36  ;;  %v3997_v15 = vpop.xlane.xlu0 %3996 }
0x12ea   :  { %v4019_v29 = vsub.f32 %v10587_v61, %v3997_v15 }
0x12eb   :  { %v4029_v27 = vmul.f32 1.442695, %v4020_v55 }
0x12ec   :  { %v4121_v56 = vpop.xlane.xlu1 %4120  ;;  %v4027_v38 = vmul.f32 1.442695, %v4019_v29 }
0x12ed   :  { %8770 = vpow2.f32 %v4029_v27  ;;  %v4141_v11 = vsub.f32 %v10584_v40, %v4121_v56  ;;  %v10664_v41 = vpop.xlane.xlu0 %3907 }
0x12ef   :  { %v4150_v1 = vmul.f32 1.442695, %v4141_v11 }
0x12f0   :  { %v4243_v31 = vpop.xlane.xlu1 %4242 }
0x12f1   :  { %8772 = vpow2.f32 %v4150_v1  ;;  %v4263_v45 = vsub.f32 %v10584_v40, %v4243_v31  ;;  %v4006_v7 = vpop.xlane.xlu0 %4005 }
0x12f2   :  { %v4022_v8 = vsub.f32 %v10596_v25, %v4006_v7 }
0x12f3   :  { %v4272_v22 = vmul.f32 1.442695, %v4263_v45 }
0x12f4   :  { %v4364_v58 = vpop.xlane.xlu1 %4363  ;;  %v4033_v24 = vmul.f32 1.442695, %v4022_v8 }
0x12f5   :  { %8774 = vpow2.f32 %v4272_v22  ;;  %v4384_v18 = vsub.f32 %v10584_v40, %v4364_v58  ;;  %v4249_v42 = vpop.xlane.xlu0 %4248 }
0x12f6   :  { %v4265_v12 = vsub.f32 %v10596_v25, %v4249_v42 }
0x12f7   :  { %v10669_v33 = vpop.eup %8770  ;;  %v4393_v37 = vmul.f32 1.442695, %v4384_v18 }
0x12f8   :  { %v10671_v17 = vpop.xlane.xlu1 %3910  ;;  %4053 = vrot.lane.b32.xlu1 %v10669_v33, %s9261_s13  ;;  %v4276_v13 = vmul.f32 1.442695, %v4265_v12 }
0x12f9   :  { %8776 = vpow2.f32 %v4393_v37  ;;  %v4246_v50 = vpop.xlane.xlu0 %4245 }
0x12fa   :  { %8778 = vpow2.f32 %v4027_v38  ;;  %v4264_v15 = vsub.f32 %v10607_v63, %v4246_v50 }
0x12fb   :  { %v10675_v57 = vpop.eup %8772 }
0x12fc   :  { %v4118_v9 = vpop.xlane.xlu1 %4117  ;;  %4174 = vrot.lane.b32.xlu0 %v10675_v57, %s9262_s8  ;;  %v4274_v45 = vmul.f32 1.442695, %v4264_v15 }
0x12fd   :  { %v4140_v30 = vsub.f32 %v10587_v61, %v4118_v9  ;;  %v10692_v48 = vpop.xlane.xlu0 %3913 }
0x12ff   :  { %v10680_v5 = vpop.eup %8774  ;;  %v4148_v35 = vmul.f32 1.442695, %v4140_v30 }
0x1300   :  { %4296 = vrot.lane.b32.xlu1 %v10680_v5, %s9263_s27  ;;  %v4240_v14 = vpop.xlane.xlu1 %4239 }
0x1301   :  { %8780 = vpow2.f32 %v4148_v35  ;;  %v4262_v51 = vsub.f32 %v10587_v61, %v4240_v14  ;;  %v4012_v4 = vpop.xlane.xlu0 %4011 }
0x1302   :  { %v4024_v22 = vsub.f32 %v10619_v28, %v4012_v4 }
0x1303   :  { %v10686_v60 = vpop.eup %8776  ;;  %v4270_v62 = vmul.f32 1.442695, %v4262_v51 }
0x1304   :  { %v4361_v46 = vpop.xlane.xlu1 %4360  ;;  %4417 = vrot.lane.b32.xlu0 %v10686_v60, %s9264_s2  ;;  %v10694_v10 = vpop.eup %8778  ;;  %v4037_v38 = vmul.f32 1.442695, %v4024_v22 }
0x1305   :  { %8782 = vpow2.f32 %v4270_v62  ;;  %v4383_v59 = vsub.f32 %v10587_v61, %v4361_v46  ;;  %v10712_v36 = vpop.xlane.xlu0 %4254 }
0x1306   :  { %8784 = vpow2.f32 %v4033_v24 }
0x1307   :  { %v4391_v54 = vmul.f32 1.442695, %v4383_v59 }
0x1308   :  { %v4127_v16 = vpop.xlane.xlu1 %4126  ;;  %4051 = vrot.lane.b32.xlu0 %v10694_v10, %s9261_s13 }
0x1309   :  { %8786 = vpow2.f32 %v4391_v54  ;;  %v4143_v47 = vsub.f32 %v10596_v25, %v4127_v16  ;;  %v4009_v7 = vpop.xlane.xlu0 %4008 }
0x130a   :  { %8788 = vpow2.f32 %v4276_v13  ;;  %v4023_v42 = vsub.f32 %v10630_v49, %v4009_v7 }
0x130b   :  { %v10699_v53 = vpop.eup %8780  ;;  %v4154_v3 = vmul.f32 1.442695, %v4143_v47 }
0x130c   :  { %4172 = vrot.lane.b32.xlu1 %v10699_v53, %s9262_s8  ;;  %v4370_v39 = vpop.xlane.xlu1 %4369  ;;  %v4035_v50 = vmul.f32 1.442695, %v4023_v42 }
0x130d   :  { %8790 = vpow2.f32 %v4154_v3  ;;  %v4386_v43 = vsub.f32 %v10596_v25, %v4370_v39  ;;  %v4252_v35 = vpop.xlane.xlu0 %4251 }
0x130e   :  { %v4266_v51 = vsub.f32 %v10630_v49, %v4252_v35 }
0x130f   :  { %v10704_v44 = vpop.eup %8782  ;;  %v4397_v21 = vmul.f32 1.442695, %v4386_v43 }
0x1310   :  { %4294 = vrot.lane.b32.xlu1 %v10704_v44, %s9263_s27  ;;  %v10708_v20 = vpop.xlane.xlu1 %3916  ;;  %v10710_v32 = vpop.eup %8784  ;;  %v4278_v59 = vmul.f32 1.442695, %v4266_v51 }
0x1311   :  { %8792 = vpow2.f32 %v4397_v21 }
0x1313   :  { %v10714_v55 = vpop.eup %8786 }
0x1314   :  { %v4003_v27 = vpop.xlane.xlu1 %4002  ;;  %4415 = vrot.lane.b32.xlu0 %v10714_v55, %s9264_s2  ;;  %4057 = vrot.lane.b32.xlu1 %v10710_v32, %s9261_s13  ;;  %v10722_v11 = vpop.eup %8788 }
0x1315   :  { %v4021_v56 = vsub.f32 %v10607_v63, %v4003_v27 }
0x1317   :  { %v10724_v1 = vpop.eup %8790  ;;  %v4031_v31 = vmul.f32 1.442695, %v4021_v56 }
0x1318   :  { %v4124_v58 = vpop.xlane.xlu1 %4123  ;;  %4178 = vrot.lane.b32.xlu0 %v10724_v1, %s9262_s8  ;;  %4300 = vrot.lane.b32.xlu1 %v10722_v11, %s9263_s27 }
0x1319   :  { %8794 = vpow2.f32 %v4031_v31  ;;  %v4142_v29 = vsub.f32 %v10607_v63, %v4124_v58 }
0x131a   :  { %8796 = vpow2.f32 %v4274_v45 }
0x131b   :  { %v10732_v18 = vpop.eup %8792  ;;  %v4152_v37 = vmul.f32 1.442695, %v4142_v29 }
0x131c   :  { %v4367_v9 = vpop.xlane.xlu1 %4366  ;;  %4421 = vrot.lane.b32.xlu0 %v10732_v18, %s9264_s2 }
0x131d   :  { %8798 = vpow2.f32 %v4152_v37  ;;  %v4385_v30 = vsub.f32 %v10607_v63, %v4367_v9 }
0x131e   :  { %8800 = vpow2.f32 %v4037_v38 }
0x131f   :  { %v4395_v8 = vmul.f32 1.442695, %v4385_v30 }
0x1320   :  { %v4133_v14 = vpop.xlane.xlu1 %4132 }
0x1321   :  { %8802 = vpow2.f32 %v4395_v8  ;;  %v4145_v62 = vsub.f32 %v10619_v28, %v4133_v14  ;;  %v4267_v14 = vsub.f32 %v10619_v28, %v10712_v36 }
0x1322   :  { %8804 = vpow2.f32 %v4035_v50 }
0x1323   :  { %v10740_v24 = vpop.eup %8794  ;;  %v4158_v12 = vmul.f32 1.442695, %v4145_v62  ;;  %v4280_v62 = vmul.f32 1.442695, %v4267_v14 }
0x1324   :  { %v4376_v46 = vpop.xlane.xlu1 %4375  ;;  %4055 = vrot.lane.b32.xlu1 %v10740_v24, %s9261_s13  ;;  %v10744_v54 = vpop.eup %8796 }
0x1325   :  { %8806 = vpow2.f32 %v4158_v12 }
0x1326   :  { %8808 = vpow2.f32 %v4278_v59  ;;  %v4388_v59 = vsub.f32 %v10619_v28, %v4376_v46  ;;  %v3931_v46 = vsub.f32 %v10584_v40, %v10671_v17 }
0x1327   :  { %v10746_v13 = vpop.eup %8798 }
0x1328   :  { %v10748_v16 = vpop.xlane.xlu1 %3922  ;;  %4176 = vrot.lane.b32.xlu0 %v10746_v13, %s9262_s8  ;;  %4298 = vrot.lane.b32.xlu1 %v10744_v54, %s9263_s27  ;;  %v10754_v47 = vpop.eup %8800 }
0x1329   :  { %v3935_v26 = vsub.f32 %v10619_v28, %v10748_v16 }
0x132b   :  { %v10756_v3 = vpop.eup %8802 }
0x132c   :  { %v4130_v4 = vpop.xlane.xlu1 %4129  ;;  %4419 = vrot.lane.b32.xlu0 %v10756_v3, %s9264_s2  ;;  %4061 = vrot.lane.b32.xlu1 %v10754_v47, %s9261_s13  ;;  %v10763_v43 = vpop.eup %8804 }
0x132d   :  { %v4144_v39 = vsub.f32 %v10630_v49, %v4130_v4  ;;  %v4401_v4 = vmul.f32 1.442695, %v4388_v59 }
0x132f   :  { %v10765_v21 = vpop.eup %8806  ;;  %v4156_v15 = vmul.f32 1.442695, %v4144_v39 }
0x1330   :  { %v4373_v27 = vpop.xlane.xlu1 %4372  ;;  %4182 = vrot.lane.b32.xlu0 %v10765_v21, %s9262_s8  ;;  %4059 = vrot.lane.b32.xlu1 %v10763_v43, %s9261_s13  ;;  %v10772_v31 = vpop.eup %8808 }
0x1331   :  { %8810 = vpow2.f32 %v4156_v15  ;;  %v4387_v56 = vsub.f32 %v10630_v49, %v4373_v27  ;;  %v3930_v15 = vsub.f32 %v10587_v61, %v10664_v41  ;;  %v3932_v27 = vsub.f32 %v10607_v63, %v10692_v48 }
0x1333   :  { %v4399_v45 = vmul.f32 1.442695, %v4387_v56  ;;  %v3938_v56 = vmul.f32 1.442695, %v3930_v15 }
0x1334   :  { %4302 = vrot.lane.b32.xlu1 %v10772_v31, %s9263_s27 }
0x1335   :  { %8812 = vpow2.f32 %v4399_v45 }
0x1336   :  { %8814 = vpow2.f32 %v4280_v62 }
0x1337   :  { %8816 = vpow2.f32 %v4401_v4 }
0x1338   :  { %8818 = vpow2.f32 %v3938_v56 }
0x1339   :  { %v6623_v22 = vpop.f32.mrb[42].mxu1 }
0x133a   :  { %v3896_v7 = vpop.f32.mrb[43].mxu1  ;;  %v10785_v37 = vadd.f32 %v6623_v22, %v10581_v6  ;;  %v3942_v22 = vmul.f32 1.442695, %v3932_v27 }
0x133b   :  { %v10776_v58 = vpop.eup %8810  ;;  %v10794_v30 = vadd.f32 %v10581_v6, %v3896_v7  ;;  %v3940_v7 = vmul.f32 1.442695, %v3931_v46 }
0x133c   :  { %4180 = vrot.lane.b32.xlu0 %v10776_v58, %s9262_s8  ;;  %v4137_v38 = vsel %vm4115_vm9, %v10785_v37, -inf  ;;  %v4380_v42 = vsel %vm4358_vm12, %v10785_v37, -inf  ;;  %v4016_v9 = vsel %vm3994_vm8, %v10785_v37, -inf  ;;  %v3927_v35 = vsel %vm3905_vm10, %v10785_v37, -inf }
0x133d   :  { %v4259_v8 = vsel %vm4237_vm11, %v10785_v37, -inf  ;;  %v4134_v50 = vsel %vm4115_vm9, %v10794_v30, -inf  ;;  %v4013_v6 = vsel %vm3994_vm8, %v10794_v30, -inf  ;;  %v4377_v51 = vsel %vm4358_vm12, %v10794_v30, -inf }
0x133e   :  { %v4256_v12 = vsel %vm4237_vm11, %v10794_v30, -inf  ;;  %8820 = vpow2.f32 %v3942_v22 }
0x133f   :  { %v10780_v29 = vpop.eup %8812  ;;  %8822 = vpow2.f32 %v3940_v7 }
0x1340   :  { %4423 = vrot.lane.b32.xlu0 %v10780_v29, %s9264_s2  ;;  %v10811_v39 = vpop.eup %8814 }
0x1341   :  { %v10815_v36 = vpop.eup %8816 }
0x1358   :  { %4138 = vmax.xlane.f32.xlu1 %v4137_v38 }
0x135c   :  { %4381 = vmax.xlane.f32.xlu1 %v4380_v42  ;;  %v10825_v42 = vpop.xlane.xlu0 %3919 }
0x135f   :  { %4017 = vmax.xlane.f32.xlu0 %v4016_v9 }
0x1360   :  { %3928 = vmax.xlane.f32.xlu1 %v3927_v35 }
0x1363   :  { %4260 = vmax.xlane.f32.xlu0 %v4259_v8  ;;  %v10827_v8 = vpop.eup %8818 }
0x1364   :  { %4135 = vmax.xlane.f32.xlu1 %v4134_v50  ;;  %v10829_v41 = vpop.eup %8820  ;;  %v3954_v40 = vsel %vm3905_vm10, %v10827_v8, 0.0 }
0x1365   :  { %v10833_v17 = vpop.eup %8822  ;;  %v3960_v48 = vsel %vm3905_vm10, %v10829_v41, 0.0 }
0x1366   :  { %v3957_v50 = vsel %vm3905_vm10, %v10833_v17, 0.0 }
0x1367   :  { %4014 = vmax.xlane.f32.xlu0 %v4013_v6 }
0x1368   :  { %4378 = vmax.xlane.f32.xlu1 %v4377_v51  ;;  %v3924_v51 = vsel %vm3905_vm10, %v10794_v30, -inf }
0x136a   :  { %v4054_v45 = vpop.permute.xlu1 %4053 }
0x136b   :  { %4257 = vmax.xlane.f32.xlu0 %v4256_v12  ;;  %v4078_v4 = vsel %vm3905_vm10, %v4054_v45, 0.0 }
0x136e   :  { %v4175_v35 = vpop.permute.xlu0 %4174 }
0x136f   :  { %v4200_v62 = vsel %vm4196_vm13, %v4175_v35, 0.0 }
0x1372   :  { %v4297_v38 = vpop.permute.xlu1 %4296 }
0x1373   :  { %v4321_v56 = vsel %vm4196_vm13, %v4297_v38, 0.0 }
0x1376   :  { %v4418_v63 = vpop.permute.xlu0 %4417 }
0x1377   :  { %v4443_v15 = vsel %vm4439_vm14, %v4418_v63, 0.0  ;;  %v4533_v63 = vld [vmem:[#allocation9 + $0x8] sm:$0xff] }
0x1379   :  { %4304 = vrot.lane.b32.xlu1 %v10811_v39, %s9263_s27 }
0x137a   :  { %v4052_v6 = vpop.permute.xlu0 %4051 }
0x137b   :  { %v4075_v7 = vsel %vm3905_vm10, %v4052_v6, 0.0 }
0x137e   :  { %v4173_v9 = vpop.permute.xlu1 %4172 }
0x137f   :  { %v4197_v38 = vsel %vm4196_vm13, %v4173_v9, 0.0  ;;  %v4543_v9 = vld [vmem:[#allocation9 + $0x58] sm:$0xff] }
0x1381   :  { %4425 = vrot.lane.b32.xlu0 %v10815_v36, %s9264_s2 }
0x1382   :  { %v4295_v61 = vpop.permute.xlu1 %4294 }
0x1383   :  { %v4318_v22 = vsel %vm4196_vm13, %v4295_v61, 0.0 }
0x1386   :  { %v10839_v14 = vpop.permute.xlu1 %4057  ;;  %v4416_v12 = vpop.permute.xlu0 %4415 }
0x138a   :  { %v10844_v59 = vpop.permute.xlu1 %4300  ;;  %v10849_v46 = vpop.permute.xlu0 %4178 }
0x138e   :  { %v10854_v45 = vpop.permute.xlu0 %4421 }
0x138f   :  { %v4449_v28 = vsel %vm4439_vm14, %v10854_v45, 0.0 }
0x1396   :  { %v4056_v27 = vpop.permute.xlu1 %4055 }
0x1397   :  { %v4081_v35 = vsel %vm3905_vm10, %v4056_v27, 0.0  ;;  %v4538_v27 = vld [vmem:[#allocation9 + $0x30] sm:$0xff] }
0x139d   :  { %3955 = vadd.xlane.f32.xlu1 %v3954_v40  ;;  %v4299_v40 = vpop.permute.xlu1 %4298 }
0x139e   :  { %v4324_v61 = vsel %vm4196_vm13, %v4299_v40, 0.0  ;;  %v4544_v40 = vld [vmem:[#allocation9 + $0x60] sm:$0xff] }
0x13a0   :  { %3961 = vadd.xlane.f32.xlu0 %v3960_v48  ;;  %v4537_v48 = vld [vmem:[#allocation9 + $0x28] sm:$0xff] }
0x13a1   :  { %3958 = vadd.xlane.f32.xlu1 %v3957_v50  ;;  %v4535_v50 = vld [vmem:[#allocation9 + $0x18] sm:$0xff] }
0x13a4   :  { %3925 = vmax.xlane.f32.xlu0 %v3924_v51  ;;  %v7759_v51 = vpack.c.bf16 %v4537_v48, %v4533_v63  ;;  %v4440_v63 = vsel %vm4439_vm14, %v4416_v12, 0.0  ;;  %v7763_v48 = vpack.c.bf16 %v4545_v0, %v4541_v19  ;;  %v4555_v0 = vld [vmem:[#allocation9 + $0xb8] sm:$0xff]  ;;  %v4548_v19 = vld [vmem:[#allocation9 + $0x80] sm:$0xff] }
0x13a5   :  { %4201 = vadd.xlane.f32.xlu1 %v4200_v62  ;;  %v4539_v62 = vld [vmem:[#allocation9 + $0x38] sm:$0xff] }
0x13a6   :  { %v7791_v6 = vpack.c.bf16 %v4539_v62, %v4535_v50  ;;  %7760 = vmatprep.subr.bf16.mxu0 %v7759_v51  ;;  %v7765_v62 = vpack.c.bf16 %v4544_v40, %v4540_v2  ;;  %v4557_v40 = vld [vmem:[#allocation9 + $0xc8] sm:$0xff] }
0x13a8   :  { %4079 = vadd.xlane.f32.xlu0 %v4078_v4  ;;  %v4532_v4 = vld [vmem:[#allocation9] sm:$0xff]  ;;  %7792 = vmatprep.subr.bf16.mxu1 %v7791_v6  ;;  %v4553_v6 = vld [vmem:[#allocation9 + $0xa8] sm:$0xff] }
0x13a9   :  { %4444 = vadd.xlane.f32.xlu1 %v4443_v15  ;;  %v4536_v15 = vld [vmem:[#allocation9 + $0x20] sm:$0xff] }
0x13ac   :  { %4322 = vadd.xlane.f32.xlu0 %v4321_v56  ;;  %v7761_v56 = vpack.c.bf16 %v4536_v15, %v4532_v4  ;;  %v4542_v4 = vld [vmem:[#allocation9 + $0x50] sm:$0xff] }
0x13ad   :  { %4319 = vadd.xlane.f32.xlu1 %v4318_v22  ;;  %v4534_v22 = vld [vmem:[#allocation9 + $0x10] sm:$0xff] }
0x13ae   :  { %7762 = vmatpush1.bf16.msra.mxu0 %v7761_v56  ;;  %v4546_v15 = vld [vmem:[#allocation9 + $0x70] sm:$0xff]  ;;  %v4551_v56 = vld [vmem:[#allocation9 + $0x98] sm:$0xff] }
0x13af   :  { %7764 = vmatprep.subr.bf16.mxu0 %v7763_v48  ;;  %v7797_v51 = vpack.c.bf16 %v4546_v15, %v4542_v4  ;;  %v4563_v15 = vld [vmem:[#allocation9 + $0xf8] sm:$0xff] }
0x13b0   :  { %4076 = vadd.xlane.f32.xlu0 %v4075_v7  ;;  %v7793_v7 = vpack.c.bf16 %v4538_v27, %v4534_v22  ;;  %v4552_v27 = vld [vmem:[#allocation9 + $0xa0] sm:$0xff] }
0x13b1   :  { %4082 = vadd.xlane.f32.xlu1 %v4081_v35  ;;  %v4177_v35 = vpop.permute.xlu0 %4176  ;;  %v7769_v2 = vpack.c.bf16 %v4552_v27, %v4548_v19  ;;  %v4565_v19 = vld [vmem:[#allocation9 + $0x108] sm:$0xff] }
0x13b2   :  { %7794 = vmatpush1.bf16.msra.mxu1 %v7793_v7  ;;  %7766 = vmatpush1.bf16.msra.mxu0 %v7765_v62  ;;  %v4203_v22 = vsel %vm4196_vm13, %v4177_v35, 0.0  ;;  %v4559_v62 = vld [vmem:[#allocation9 + $0xd8] sm:$0xff]  ;;  %v4569_v27 = vld [vmem:[#allocation9 + $0x128] sm:$0xff] }
0x13b4   :  { %4198 = vadd.xlane.f32.xlu0 %v4197_v38  ;;  %v4547_v38 = vld [vmem:[#allocation9 + $0x78] sm:$0xff] }
0x13b5   :  { %4325 = vadd.xlane.f32.xlu1 %v4324_v61  ;;  %v7795_v50 = vpack.c.bf16 %v4547_v38, %v4543_v9  ;;  %v4549_v61 = vld [vmem:[#allocation9 + $0x88] sm:$0xff]  ;;  %v4420_v7 = vpop.permute.xlu0 %4419  ;;  %v7799_v9 = vpack.c.bf16 %v4555_v0, %v4551_v56  ;;  %v4554_v38 = vld [vmem:[#allocation9 + $0xb0] sm:$0xff] }
0x13b6   :  { %v7767_v12 = vpack.c.bf16 %v4553_v6, %v4549_v61  ;;  %v4446_v35 = vsel %vm4439_vm14, %v4420_v7, 0.0  ;;  %v4560_v61 = vld [vmem:[#allocation9 + $0xe0] sm:$0xff]  ;;  %v7803_v6 = vpack.c.bf16 %v4563_v15, %v4559_v62  ;;  %v4562_v0 = vld [vmem:[#allocation9 + $0xf0] sm:$0xff]  ;;  %v4571_v7 = vld [vmem:[#allocation9 + $0x138] sm:$0xff] }
0x13b7   :  { %7796 = vmatprep.subr.bf16.mxu1 %v7795_v50  ;;  %v4561_v50 = vld [vmem:[#allocation9 + $0xe8] sm:$0xff] }
0x13b8   :  { %4441 = vadd.xlane.f32.xlu0 %v4440_v63  ;;  %7798 = vmatpush1.bf16.msra.mxu1 %v7797_v51  ;;  %v4550_v63 = vld [vmem:[#allocation9 + $0x90] sm:$0xff]  ;;  %v7771_v4 = vpack.c.bf16 %v4561_v50, %v4557_v40  ;;  %v4556_v51 = vld [vmem:[#allocation9 + $0xc0] sm:$0xff]  ;;  %v4577_v15 = vld [vmem:[#allocation9 + $0x168] sm:$0xff] }
0x13b9   :  { %7768 = vmatprep.subr.bf16.mxu0 %v7767_v12  ;;  %v7801_v48 = vpack.c.bf16 %v4554_v38, %v4550_v63  ;;  %7800 = vmatprep.subr.bf16.mxu1 %v7799_v9  ;;  %v7773_v56 = vpack.c.bf16 %v4560_v61, %v4556_v51  ;;  %v4567_v9 = vld [vmem:[#allocation9 + $0x118] sm:$0xff]  ;;  %v4564_v63 = vld [vmem:[#allocation9 + $0x100] sm:$0xff]  ;;  %v4566_v50 = vld [vmem:[#allocation9 + $0x110] sm:$0xff] }
0x13ba   :  { %7770 = vmatpush1.bf16.msra.mxu0 %v7769_v2  ;;  %v7775_v2 = vpack.c.bf16 %v4569_v27, %v4565_v19  ;;  %v4568_v38 = vld [vmem:[#allocation9 + $0x120] sm:$0xff]  ;;  %v4575_v51 = vld [vmem:[#allocation9 + $0x158] sm:$0xff]  ;;  %v4574_v19 = vld [vmem:[#allocation9 + $0x150] sm:$0xff] }
0x13bb   :  { %7772 = vmatprep.subr.bf16.mxu0 %v7771_v4  ;;  %v7777_v40 = vpack.c.bf16 %v4568_v38, %v4564_v63  ;;  %v4573_v4 = vld [vmem:[#allocation9 + $0x148] sm:$0xff]  ;;  %v4578_v27 = vld [vmem:[#allocation9 + $0x170] sm:$0xff]  ;;  %v4583_v63 = vld [vmem:[#allocation9 + $0x198] sm:$0xff] }
0x13bc   :  { %4204 = vadd.xlane.f32.xlu0 %v4203_v22  ;;  %7802 = vmatpush1.bf16.msra.mxu1 %v7801_v48  ;;  %v4558_v22 = vld [vmem:[#allocation9 + $0xd0] sm:$0xff]  ;;  %v7807_v48 = vpack.c.bf16 %v4571_v7, %v4567_v9  ;;  %v7779_v61 = vpack.c.bf16 %v4577_v15, %v4573_v4  ;;  %v7813_v9 = vpack.c.bf16 %v4578_v27, %v4574_v19  ;;  %v4585_v7 = vld [vmem:[#allocation9 + $0x1a8] sm:$0xff]  ;;  %v4592_v19 = vld [vmem:[#allocation9 + $0x1e0] sm:$0xff] }
0x13bd   :  { %v7805_v12 = vpack.c.bf16 %v4562_v0, %v4558_v22  ;;  %7804 = vmatprep.subr.bf16.mxu1 %v7803_v6  ;;  %v4579_v6 = vld [vmem:[#allocation9 + $0x178] sm:$0xff]  ;;  %v4576_v22 = vld [vmem:[#allocation9 + $0x160] sm:$0xff]  ;;  %v4582_v4 = vld [vmem:[#allocation9 + $0x190] sm:$0xff] }
0x13be   :  { %7774 = vmatpush1.bf16.msra.mxu0 %v7773_v56  ;;  %v4572_v56 = vld [vmem:[#allocation9 + $0x140] sm:$0xff]  ;;  %v7811_v0 = vpack.c.bf16 %v4579_v6, %v4575_v51  ;;  %v4586_v15 = vld [vmem:[#allocation9 + $0x1b0] sm:$0xff]  ;;  %v4593_v6 = vld [vmem:[#allocation9 + $0x1e8] sm:$0xff] }
0x13bf   :  { %7776 = vmatprep.subr.bf16.mxu0 %v7775_v2  ;;  %v4581_v2 = vld [vmem:[#allocation9 + $0x188] sm:$0xff]  ;;  %v7817_v51 = vpack.c.bf16 %v4586_v15, %v4582_v4 }
0x13c0   :  { %4447 = vadd.xlane.f32.xlu0 %v4446_v35  ;;  %7806 = vmatpush1.bf16.msra.mxu1 %v7805_v12  ;;  %v4570_v35 = vld [vmem:[#allocation9 + $0x130] sm:$0xff]  ;;  %v7781_v12 = vpack.c.bf16 %v4576_v22, %v4572_v56  ;;  %v7783_v38 = vpack.c.bf16 %v4585_v7, %v4581_v2  ;;  %v4591_v56 = vld [vmem:[#allocation9 + $0x1d8] sm:$0xff] }
0x13c1   :  { %v7809_v62 = vpack.c.bf16 %v4570_v35, %v4566_v50  ;;  %7808 = vmatprep.subr.bf16.mxu1 %v7807_v48  ;;  %v4587_v48 = vld [vmem:[#allocation9 + $0x1b8] sm:$0xff]  ;;  %v4584_v50 = vld [vmem:[#allocation9 + $0x1a0] sm:$0xff]  ;;  %v4590_v2 = vld [vmem:[#allocation9 + $0x1d0] sm:$0xff] }
0x13c2   :  { %7778 = vmatpush1.bf16.msra.mxu0 %v7777_v40  ;;  %v4580_v40 = vld [vmem:[#allocation9 + $0x180] sm:$0xff]  ;;  %v7815_v35 = vpack.c.bf16 %v4587_v48, %v4583_v63  ;;  %v4594_v7 = vld [vmem:[#allocation9 + $0x1f0] sm:$0xff] }
0x13c3   :  { %7780 = vmatprep.subr.bf16.mxu0 %v7779_v61  ;;  %v4589_v61 = vld [vmem:[#allocation9 + $0x1c8] sm:$0xff]  ;;  %v7821_v63 = vpack.c.bf16 %v4594_v7, %v4590_v2 }
0x13c4   :  { %7810 = vmatpush1.bf16.msra.mxu1 %v7809_v62  ;;  %v7785_v62 = vpack.c.bf16 %v4584_v50, %v4580_v40  ;;  %v7787_v22 = vpack.c.bf16 %v4593_v6, %v4589_v61  ;;  %v10865_v40 = vpop.permute.xlu0 %4182 }
0x13c5   :  { %7812 = vmatprep.subr.bf16.mxu1 %v7811_v0  ;;  %v4595_v0 = vld [vmem:[#allocation9 + $0x1f8] sm:$0xff] }
0x13c6   :  { %7782 = vmatpush1.bf16.msra.mxu0 %v7781_v12  ;;  %v4588_v12 = vld [vmem:[#allocation9 + $0x1c0] sm:$0xff]  ;;  %v7819_v27 = vpack.c.bf16 %v4595_v0, %v4591_v56 }
0x13c7   :  { %7784 = vmatprep.subr.bf16.mxu0 %v7783_v38  ;;  %v10861_v38 = vpop.permute.xlu1 %4061 }
0x13c8   :  { %7814 = vmatpush1.bf16.msra.mxu1 %v7813_v9  ;;  %v7789_v9 = vpack.c.bf16 %v4592_v19, %v4588_v12 }
0x13c9   :  { %7816 = vmatprep.subr.bf16.mxu1 %v7815_v35  ;;  %v10869_v35 = vpop.permute.xlu0 %4180 }
0x13ca   :  { %7786 = vmatpush1.bf16.msra.mxu0 %v7785_v62 }
0x13cb   :  { %7788 = vmatprep.subr.bf16.mxu0 %v7787_v22  ;;  %v10863_v48 = vpop.permute.xlu1 %4059 }
0x13cc   :  { %7818 = vmatpush1.bf16.msra.mxu1 %v7817_v51 }
0x13cd   :  { %7820 = vmatprep.subr.bf16.mxu1 %v7819_v27  ;;  %v10872_v15 = vpop.permute.xlu0 %4423 }
0x13ce   :  { %7790 = vmatpush1.bf16.msra.mxu0 %v7789_v9 }
0x13cf   :  { %v10867_v50 = vpop.permute.xlu1 %4302 }
0x13d0   :  { %7822 = vmatpush1.bf16.msra.mxu1 %v7821_v63 }
0x13e5   :  { %v4139_v62 = vpop.xlane.xlu1 %4138 }
0x13e6   :  { %v4147_v4 = vsub.f32 %v10785_v37, %v4139_v62 }
0x13e8   :  { %v4162_v51 = vmul.f32 1.442695, %v4147_v4 }
0x13e9   :  { %v4382_v61 = vpop.xlane.xlu1 %4381 }
0x13ea   :  { %8824 = vpow2.f32 %v4162_v51  ;;  %v4390_v6 = vsub.f32 %v10785_v37, %v4382_v61 }
0x13ec   :  { %v4405_v56 = vmul.f32 1.442695, %v4390_v6  ;;  %v4018_v22 = vpop.xlane.xlu0 %4017 }
0x13ed   :  { %v4026_v0 = vsub.f32 %v10785_v37, %v4018_v22  ;;  %v10876_v12 = vpop.xlane.xlu1 %3928 }
0x13ee   :  { %8826 = vpow2.f32 %v4405_v56 }
0x13ef   :  { %v4041_v19 = vmul.f32 1.442695, %v4026_v0 }
0x13f0   :  { %v4261_v27 = vpop.xlane.xlu0 %4260 }
0x13f1   :  { %8828 = vpow2.f32 %v4041_v19  ;;  %v4269_v9 = vsub.f32 %v10785_v37, %v4261_v27  ;;  %v4136_v2 = vpop.xlane.xlu1 %4135 }
0x13f2   :  { %v4146_v7 = vsub.f32 %v10794_v30, %v4136_v2 }
0x13f3   :  { %v4284_v63 = vmul.f32 1.442695, %v4269_v9 }
0x13f4   :  { %v10880_v62 = vpop.eup %8824  ;;  %v4160_v4 = vmul.f32 1.442695, %v4146_v7  ;;  %v4015_v51 = vpop.xlane.xlu0 %4014 }
0x13f5   :  { %8830 = vpow2.f32 %v4284_v63  ;;  %v4025_v61 = vsub.f32 %v10794_v30, %v4015_v51  ;;  %4186 = vrot.lane.b32.xlu0 %v10880_v62, %s9262_s8 }
0x13f6   :  { %8832 = vpow2.f32 %v4160_v4  ;;  %v3933_v4 = vsub.f32 %v10596_v25, %v10708_v20 }
0x13f7   :  { %v4039_v6 = vmul.f32 1.442695, %v4025_v61  ;;  %v4084_v61 = vsel %vm3905_vm10, %v10839_v14, 0.0 }
0x13f8   :  { %v10885_v56 = vpop.eup %8826  ;;  %v4258_v22 = vpop.xlane.xlu0 %4257  ;;  %v3944_v51 = vmul.f32 1.442695, %v3933_v4  ;;  %v3948_v4 = vmul.f32 1.442695, %v3935_v26 }
0x13f9   :  { %8834 = vpow2.f32 %v4039_v6  ;;  %v4268_v0 = vsub.f32 %v10794_v30, %v4258_v22  ;;  %4429 = vrot.lane.b32.xlu0 %v10885_v56, %s9264_s2  ;;  %v4379_v6 = vpop.xlane.xlu1 %4378 }
0x13fa   :  { %v4389_v22 = vsub.f32 %v10794_v30, %v4379_v6 }
0x13fb   :  { %v10890_v19 = vpop.eup %8828  ;;  %v4282_v27 = vmul.f32 1.442695, %v4268_v0 }
0x13fc   :  { %4065 = vrot.lane.b32.xlu1 %v10890_v19, %s9261_s13  ;;  %v10919_v34 = vpop.permute.xlu0 %4425 }
0x13fd   :  { %8836 = vpow2.f32 %v4282_v27  ;;  %v10915_v0 = vpop.permute.xlu1 %4304  ;;  %v4403_v27 = vmul.f32 1.442695, %v4389_v22 }
0x13fe   :  { %8838 = vpow2.f32 %v3944_v51 }
0x13ff   :  { %v10894_v9 = vpop.eup %8830  ;;  %8840 = vpow2.f32 %v4403_v27  ;;  %v3937_v27 = vsub.f32 %v10785_v37, %v10876_v12 }
0x1400   :  { %v10896_v2 = vpop.eup %8832  ;;  %4308 = vrot.lane.b32.xlu1 %v10894_v9, %s9263_s27  ;;  %8842 = vpow2.f32 %v3948_v4 }
0x1401   :  { %4184 = vrot.lane.b32.xlu0 %v10896_v2, %s9262_s8  ;;  %v3952_v4 = vmul.f32 1.442695, %v3937_v27 }
0x1403   :  { %v10902_v7 = vpop.eup %8834 }
0x1404   :  { %4063 = vrot.lane.b32.xlu1 %v10902_v7, %s9261_s13 }
0x1407   :  { %v10906_v63 = vpop.eup %8836 }
0x1408   :  { %4306 = vrot.lane.b32.xlu1 %v10906_v63, %s9263_s27  ;;  %v10917_v52 = vpop.eup %8838 }
0x1409   :  { %v3963_v20 = vsel %vm3905_vm10, %v10917_v52, 0.0  ;;  %v10933_v16 = vpop.eup %8840 }
0x140a   :  { %v10943_v37 = vpop.eup %8842 }
0x1420   :  { %4085 = vadd.xlane.f32.xlu0 %v4084_v61  ;;  %v4206_v61 = vsel %vm4196_vm13, %v10849_v46, 0.0  ;;  %v4087_v46 = vsel %vm3905_vm10, %v10863_v48, 0.0  ;;  %v3969_v48 = vsel %vm3905_vm10, %v10943_v37, 0.0 }
0x142a   :  { %v3956_v25 = vpop.xlane.xlu1 %3955 }
0x142c   :  { %3964 = vadd.xlane.f32.xlu1 %v3963_v20 }
0x142d   :  { %v10925_v14 = vpop.xlane.xlu0 %3961 }
0x142e   :  { %v3959_v51 = vpop.xlane.xlu1 %3958 }
0x142f   :  { %8844 = vrcp.f32 %v3959_v51 }
0x1430   :  { %4207 = vadd.xlane.f32.xlu1 %v4206_v61  ;;  %v4330_v61 = vsel %vm4196_vm13, %v10867_v50, 0.0 }
0x1431   :  { %v10929_v6 = vpop.xlane.xlu0 %3925 }
0x1432   :  { %v4202_v22 = vpop.xlane.xlu1 %4201 }
0x1433   :  { %8846 = vrcp.f32 %v4202_v22 }
0x1434   :  { %4450 = vadd.xlane.f32.xlu1 %v4449_v28 }
0x1435   :  { %v4080_v26 = vpop.xlane.xlu0 %4079 }
0x1436   :  { %v4445_v20 = vpop.xlane.xlu1 %4444  ;;  %4427 = vrot.lane.b32.xlu0 %v10933_v16, %s9264_s2  ;;  %8848 = vrcp.f32 %v4080_v26  ;;  %v3934_v26 = vsub.f32 %v10630_v49, %v10825_v42 }
0x1437   :  { %8850 = vrcp.f32 %v4445_v20 }
0x1438   :  { %4088 = vadd.xlane.f32.xlu1 %v4087_v46  ;;  %v3946_v42 = vmul.f32 1.442695, %v3934_v26 }
0x1439   :  { %v4323_v45 = vpop.xlane.xlu0 %4322  ;;  %v8845_v22 = vpop.eup %8844 }
0x143a   :  { %8852 = vrcp.f32 %v4323_v45  ;;  %v4320_v12 = vpop.xlane.xlu1 %4319  ;;  %v3981_v50 = vmul.f32 %v8845_v22, %v10833_v17 }
0x143b   :  { %8854 = vpow2.f32 %v3952_v4 }
0x143c   :  { %4331 = vadd.xlane.f32.xlu1 %v4330_v61 }
0x143d   :  { %v4077_v51 = vpop.xlane.xlu0 %4076  ;;  %v8847_v28 = vpop.eup %8846 }
0x143e   :  { %8856 = vrcp.f32 %v4077_v51  ;;  %v4083_v45 = vpop.xlane.xlu1 %4082  ;;  %v4224_v51 = vmul.f32 %v8847_v28, %v10675_v57  ;;  %v4455_v57 = vsel %vm4439_vm14, %v10919_v34, 0.0 }
0x143f   :  { %8858 = vrcp.f32 %v3956_v25  ;;  %v4212_v25 = vsel %vm4196_vm13, %v10865_v40, 0.0 }
0x1440   :  { %3970 = vadd.xlane.f32.xlu1 %v3969_v48  ;;  %v8849_v27 = vpop.eup %8848 }
0x1441   :  { %v4199_v20 = vpop.xlane.xlu0 %4198  ;;  %v4102_v46 = vmul.f32 %v8849_v27, %v10669_v33  ;;  %v8851_v4 = vpop.eup %8850 }
0x1442   :  { %8860 = vrcp.f32 %v4199_v20  ;;  %v4467_v22 = vmul.f32 %v8851_v4, %v10686_v60  ;;  %v4326_v27 = vpop.xlane.xlu1 %4325 }
0x1443   :  { %8862 = vrcp.f32 %v4320_v12  ;;  %v4481_v49 = vsel %vm3905_vm10, %v3981_v50, %v4102_v46 }
0x1444   :  { %v8853_v61 = vpop.eup %8852  ;;  %4213 = vadd.xlane.f32.xlu1 %v4212_v25  ;;  %8864 = vrcp.f32 %v4083_v45  ;;  %v4490_v40 = vsel %vm4488_vm15, %v4481_v49, %v4224_v51 }
0x1445   :  { %v4442_v17 = vpop.xlane.xlu0 %4441  ;;  %v4345_v33 = vmul.f32 %v8853_v61, %v10680_v5  ;;  %v10958_v12 = vpop.eup %8854 }
0x1446   :  { %8866 = vrcp.f32 %v4442_v17  ;;  %v3975_v34 = vsel %vm3905_vm10, %v10958_v12, 0.0 }
0x1447   :  { %8868 = vrcp.f32 %v10925_v14  ;;  %v4499_v48 = vsel %vm4497_vm0, %v4490_v40, %v4345_v33 }
0x1448   :  { %v8857_v28 = vpop.eup %8856  ;;  %4456 = vadd.xlane.f32.xlu1 %v4455_v57  ;;  %v4508_v5 = vsel %vm4506_vm1, %v4499_v48, %v4467_v22  ;;  %8870 = vpow2.f32 %v3946_v42 }
0x1449   :  { %v8859_v26 = vpop.eup %8858  ;;  %v4205_v20 = vpop.xlane.xlu0 %4204  ;;  %v4517_v60 = vsel %vm4515_vm2, %v4508_v5, 0.0  ;;  %v4100_v50 = vmul.f32 %v8857_v28, %v10694_v10 }
0x144a   :  { %8872 = vrcp.f32 %v4205_v20  ;;  %4525 = vst [vmem:[%s11566_s19 + $0x8] sm:$0xff] %v4517_v60  ;;  %v3979_v46 = vmul.f32 %v8859_v26, %v10827_v8  ;;  %v3936_v26 = vsub.f32 %v10794_v30, %v10929_v6 }
0x144b   :  { %8874 = vrcp.f32 %v4326_v27  ;;  %v11613_v27 = vmov 0.0  }
0x144c   :  { %v8861_v14 = vpop.eup %8860  ;;  %3976 = vadd.xlane.f32.xlu1 %v3975_v34  ;;  %v4480_v10 = vsel %vm3905_vm10, %v3979_v46, %v4100_v50  ;;  %v3950_v6 = vmul.f32 1.442695, %v3936_v26  ;;  %v4846_v26 = vld [vmem:[#allocation12 + $0x10] sm:$0xff] }
0x144d   :  { %v8863_v45 = vpop.eup %8862  ;;  %v4222_v4 = vmul.f32 %v8861_v14, %v10699_v53  ;;  %v4448_v25 = vpop.xlane.xlu0 %4447 }
0x144e   :  { %8876 = vrcp.f32 %v4448_v25  ;;  %v8865_v61 = vpop.eup %8864  ;;  %v4343_v42 = vmul.f32 %v8863_v45, %v10704_v44  ;;  %v4327_v44 = vsel %vm4196_vm13, %v10844_v59, 0.0 }
0x144f   :  { %v4489_v51 = vsel %vm4488_vm15, %v4480_v10, %v4222_v4  ;;  %v4104_v22 = vmul.f32 %v8865_v61, %v10740_v24  ;;  %8878 = vpow2.f32 %v3950_v6 }
0x1450   :  { %v8867_v49 = vpop.eup %8866  ;;  %v4498_v8 = vsel %vm4497_vm0, %v4489_v51, %v4343_v42 }
0x1451   :  { %v8869_v17 = vpop.eup %8868  ;;  %v4465_v33 = vmul.f32 %v8867_v49, %v10714_v55 }
0x1452   :  { %v10980_v40 = vpop.eup %8870  ;;  %v3983_v48 = vmul.f32 %v8869_v17, %v10829_v41 }
0x1453   :  { %v4507_v53 = vsel %vm4506_vm1, %v4498_v8, %v4465_v33  ;;  %v4845_v8 = vld [vmem:[#allocation12 + $0x8] sm:$0xff] }
0x1454   :  { %v8873_v57 = vpop.eup %8872  ;;  %v4516_v28 = vsel %vm4515_vm2, %v4507_v53, 0.0  ;;  %6447 = vmatmul.mubr.msk.f32.vlgmr.msra.gmra.mrb[34].mxu0 %vm4515_vm2, %v4507_v53  ;;  %6455 = vmatmul.mubr.msk.f32.vlgmr.msra.gmra.mrb[44].mxu1 %vm4515_vm2, %v4507_v53  ;;  %v4482_v41 = vsel %vm3905_vm10, %v3983_v48, %v4104_v22  ;;  %v4849_v53 = vld [vmem:[#allocation12 + $0x28] sm:$0xff] }
0x1455   :  { %v8875_v55 = vpop.eup %8874  ;;  %v4226_v24 = vmul.f32 %v8873_v57, %v10746_v13  ;;  %4524 = vst [vmem:[%s11566_s19] sm:$0xff] %v4516_v28  ;;  %4328 = vadd.xlane.f32.xlu0 %v4327_v44  ;;  %4688 = vmatprep.mubr.f32.mxu0 %v11613_v27  ;;  %v3966_v13 = vsel %vm3905_vm10, %v10980_v40, 0.0  ;;  %v4847_v57 = vld [vmem:[#allocation12 + $0x18] sm:$0xff]  ;;  %v11035_v48 = vpack.c.bf16 %v4849_v53, %v4845_v8  ;;  %v4844_v44 = vld [vmem:[#allocation12] sm:$0xff]  ;;  %v4862_v8 = vld [vmem:[#allocation12 + $0x90] sm:$0xff] }
0x1456   :  { %4801 = vmatprep.mubr.f32.mxu1 %v11613_v27  ;;  %v4347_v60 = vmul.f32 %v8875_v55, %v10744_v54  ;;  %v4209_v54 = vsel %vm4196_vm13, %v10869_v35, 0.0  ;;  %v4333_v35 = vsel %vm4196_vm13, %v10915_v0, 0.0  ;;  %v4851_v28 = vld [vmem:[#allocation12 + $0x38] sm:$0xff]  ;;  %v4848_v55 = vld [vmem:[#allocation12 + $0x20] sm:$0xff] }
0x1457   :  { %v4491_v20 = vsel %vm4488_vm15, %v4482_v41, %v4226_v24  ;;  %11614 = vst [vmem:[#allocation25_spill] sm:$0xff] %v11035_v48  ;;  %v11037_v24 = vpack.c.bf16 %v4851_v28, %v4847_v57  ;;  %v11039_v41 = vpack.c.bf16 %v4848_v55, %v4844_v44  ;;  %7824 = vmatprep.subr.bf16.mxu0 %v11035_v48  ;;  %v4866_v57 = vld [vmem:[#allocation12 + $0xb0] sm:$0xff]  ;;  %v4869_v44 = vld [vmem:[#allocation12 + $0xc8] sm:$0xff] }
0x1458   :  { %v8877_v59 = vpop.eup %8876  ;;  %6448 = vmatmul.mubr.msk.f32.gmra.mrb[36].mxu0 %vm4515_vm2, %v4508_v5  ;;  %6456 = vmatmul.mubr.msk.f32.gmra.mrb[46].mxu1 %vm4515_vm2, %v4508_v5  ;;  %v4500_v30 = vsel %vm4497_vm0, %v4491_v20, %v4347_v60  ;;  %v4090_v5 = vsel %vm3905_vm10, %v10861_v38, 0.0  ;;  %v4850_v20 = vld [vmem:[#allocation12 + $0x30] sm:$0xff]  ;;  %v4857_v60 = vld [vmem:[#allocation12 + $0x68] sm:$0xff]  ;;  %v11071_v28 = vpack.c.bf16 %v4866_v57, %v4862_v8 }
0x1459   :  { %3967 = vadd.xlane.f32.xlu0 %v3966_v13  ;;  %4694 = vmatprep.mubr.f32.mxu0 %v11613_v27  ;;  %v4469_v50 = vmul.f32 %v8877_v59, %v10756_v3  ;;  %v4452_v3 = vsel %vm4439_vm14, %v10872_v15, 0.0  ;;  %v11025_v46 = vpop.eup %8878  ;;  %11615 = vst [vmem:[#allocation26_spill] sm:$0xff] %v11037_v24  ;;  %v4853_v59 = vld [vmem:[#allocation12 + $0x48] sm:$0xff]  ;;  %v11042_v13 = vpack.c.bf16 %v4850_v20, %v4846_v26  ;;  %v4871_v26 = vld [vmem:[#allocation12 + $0xd8] sm:$0xff]  ;;  %v4882_v8 = vld [vmem:[#allocation12 + $0x130] sm:$0xff] }
0x145a   :  { %4807 = vmatprep.mubr.f32.mxu1 %v11613_v27  ;;  %v3972_v4 = vsel %vm3905_vm10, %v11025_v46, 0.0  ;;  %7856 = vmatprep.subr.bf16.mxu1 %v11037_v24  ;;  %v11046_v6 = vpack.c.bf16 %v4857_v60, %v4853_v59  ;;  %v4873_v55 = vld [vmem:[#allocation12 + $0xe8] sm:$0xff]  ;;  %v4875_v59 = vld [vmem:[#allocation12 + $0xf8] sm:$0xff]  ;;  %v4868_v60 = vld [vmem:[#allocation12 + $0xc0] sm:$0xff] }
0x145b   :  { %v4509_v34 = vsel %vm4506_vm1, %v4500_v30, %v4469_v50  ;;  %v4855_v50 = vld [vmem:[#allocation12 + $0x58] sm:$0xff]  ;;  %7826 = vmatpush1.bf16.msra.mxu0 %v11039_v41  ;;  %7858 = vmatpush1.bf16.msra.mxu1 %v11042_v13  ;;  %v11074_v20 = vpack.c.bf16 %v4873_v55, %v4869_v44  ;;  %v4885_v57 = vld [vmem:[#allocation12 + $0x148] sm:$0xff] }
0x145c   :  { %v4518_v14 = vsel %vm4515_vm2, %v4509_v34, 0.0  ;;  %6449 = vmatmul.mubr.msk.f32.gmra.mrb[38].mxu0 %vm4515_vm2, %v4509_v34  ;;  %6457 = vmatmul.mubr.msk.f32.gmra.mrb[48].mxu1 %vm4515_vm2, %v4509_v34  ;;  %v4859_v30 = vld [vmem:[#allocation12 + $0x78] sm:$0xff]  ;;  %v4889_v55 = vld [vmem:[#allocation12 + $0x168] sm:$0xff] }
0x145d   :  { %4526 = vst [vmem:[%s11566_s19 + $0x10] sm:$0xff] %v4518_v14  ;;  %4210 = vadd.xlane.f32.xlu0 %v4209_v54  ;;  %4700 = vmatprep.mubr.f32.mxu0 %v11613_v27  ;;  %v11048_v34 = vpack.c.bf16 %v4859_v30, %v4855_v50  ;;  %v4852_v14 = vld [vmem:[#allocation12 + $0x40] sm:$0xff]  ;;  %v4870_v30 = vld [vmem:[#allocation12 + $0xd0] sm:$0xff] }
0x145e   :  { %4813 = vmatprep.mubr.f32.mxu1 %v11613_v27  ;;  %v4856_v54 = vld [vmem:[#allocation12 + $0x60] sm:$0xff]  ;;  %7828 = vmatprep.subr.bf16.mxu0 %v11046_v6 }
0x145f   :  { %7860 = vmatprep.subr.bf16.mxu1 %v11048_v34  ;;  %v4872_v50 = vld [vmem:[#allocation12 + $0xe0] sm:$0xff] }
0x1461   :  { %4453 = vadd.xlane.f32.xlu0 %v4452_v3  ;;  %v4854_v3 = vld [vmem:[#allocation12 + $0x50] sm:$0xff] }
0x1465   :  { %4091 = vadd.xlane.f32.xlu0 %v4090_v5  ;;  %v11051_v5 = vpack.c.bf16 %v4856_v54, %v4852_v14  ;;  %v11080_v14 = vpack.c.bf16 %v4872_v50, %v4868_v60  ;;  %v4874_v54 = vld [vmem:[#allocation12 + $0xf0] sm:$0xff]  ;;  %v11097_v50 = vpack.c.bf16 %v4889_v55, %v4885_v57 }
0x1467   :  { %v4187_v45 = vpop.permute.xlu0 %4186  ;;  %7830 = vmatpush1.bf16.msra.mxu0 %v11051_v5  ;;  %11616 = vst [vmem:[#allocation27_spill] sm:$0xff] %v11097_v50 }
0x1468   :  { %v4218_v33 = vsel %vm4196_vm13, %v4187_v45, 0.0  ;;  %v4861_v45 = vld [vmem:[#allocation12 + $0x88] sm:$0xff] }
0x1469   :  { %4334 = vadd.xlane.f32.xlu0 %v4333_v35  ;;  %v4858_v35 = vld [vmem:[#allocation12 + $0x70] sm:$0xff] }
0x146b   :  { %v4430_v10 = vpop.permute.xlu0 %4429 }
0x146c   :  { %v4461_v22 = vsel %vm4439_vm14, %v4430_v10, 0.0 }
0x146d   :  { %3973 = vadd.xlane.f32.xlu0 %v3972_v4  ;;  %v4865_v4 = vld [vmem:[#allocation12 + $0xa8] sm:$0xff] }
0x146e   :  { %v4066_v25 = vpop.permute.xlu1 %4065  ;;  %v11057_v10 = vpack.c.bf16 %v4865_v4, %v4861_v45  ;;  %v4881_v45 = vld [vmem:[#allocation12 + $0x128] sm:$0xff]  ;;  %v4879_v4 = vld [vmem:[#allocation12 + $0x118] sm:$0xff] }
0x146f   :  { %v4096_v15 = vsel %vm3905_vm10, %v4066_v25, 0.0  ;;  %v11055_v25 = vpack.c.bf16 %v4858_v35, %v4854_v3  ;;  %v11083_v3 = vpack.c.bf16 %v4874_v54, %v4870_v30  ;;  %v4877_v35 = vld [vmem:[#allocation12 + $0x108] sm:$0xff]  ;;  %v4884_v54 = vld [vmem:[#allocation12 + $0x140] sm:$0xff] }
0x1470   :  { %7832 = vmatprep.subr.bf16.mxu0 %v11057_v10 }
0x1471   :  { %4097 = vadd.xlane.f32.xlu0 %v4096_v15  ;;  %v4863_v15 = vld [vmem:[#allocation12 + $0x98] sm:$0xff]  ;;  %7862 = vmatpush1.bf16.msra.mxu1 %v11055_v25 }
0x1472   :  { %v4309_v61 = vpop.permute.xlu1 %4308 }
0x1473   :  { %v4185_v51 = vpop.permute.xlu0 %4184 }
0x1474   :  { %v4215_v38 = vsel %vm4196_vm13, %v4185_v51, 0.0  ;;  %v4867_v51 = vld [vmem:[#allocation12 + $0xb8] sm:$0xff] }
0x1475   :  { %4216 = vadd.xlane.f32.xlu0 %v4215_v38  ;;  %v11059_v38 = vpack.c.bf16 %v4867_v51, %v4863_v15  ;;  %v11086_v15 = vpack.c.bf16 %v4881_v45, %v4877_v35  ;;  %v4883_v51 = vld [vmem:[#allocation12 + $0x138] sm:$0xff]  ;;  %v4888_v35 = vld [vmem:[#allocation12 + $0x160] sm:$0xff]  ;;  %v4886_v45 = vld [vmem:[#allocation12 + $0x150] sm:$0xff] }
0x1476   :  { %v4064_v49 = vpop.permute.xlu1 %4063 }
0x1477   :  { %v4093_v0 = vsel %vm3905_vm10, %v4064_v49, 0.0  ;;  %7864 = vmatprep.subr.bf16.mxu1 %v11059_v38 }
0x1478   :  { %4094 = vadd.xlane.f32.xlu1 %v4093_v0  ;;  %7866 = vmatpush1.bf16.msra.mxu1 %v11071_v28 }
0x147a   :  { %v4307_v42 = vpop.permute.xlu1 %4306 }
0x147b   :  { %v4336_v17 = vsel %vm4196_vm13, %v4307_v42, 0.0 }
0x147c   :  { %4337 = vadd.xlane.f32.xlu1 %v4336_v17  ;;  %v4339_v17 = vsel %vm4196_vm13, %v4309_v61, 0.0  ;;  %v11077_v61 = vpack.c.bf16 %v4875_v59, %v4871_v26  ;;  %v4887_v26 = vld [vmem:[#allocation12 + $0x158] sm:$0xff] }
0x147d   :  { %v4891_v59 = vld [vmem:[#allocation12 + $0x178] sm:$0xff] }
0x147e   :  { %7868 = vmatprep.subr.bf16.mxu1 %v11077_v61  ;;  %v11099_v30 = vpack.c.bf16 %v4891_v59, %v4887_v26  ;;  %v4899_v26 = vld [vmem:[#allocation12 + $0x1b8] sm:$0xff]  ;;  %v4892_v59 = vld [vmem:[#allocation12 + $0x180] sm:$0xff] }
0x147f   :  { %7870 = vmatpush1.bf16.msra.mxu1 %v11083_v3 }
0x1480   :  { %4219 = vadd.xlane.f32.xlu1 %v4218_v33  ;;  %v4860_v33 = vld [vmem:[#allocation12 + $0x80] sm:$0xff]  ;;  %11617 = vst [vmem:[#allocation28_spill] sm:$0xff] %v11099_v30 }
0x1484   :  { %4462 = vadd.xlane.f32.xlu1 %v4461_v22  ;;  %v4864_v22 = vld [vmem:[#allocation12 + $0xa0] sm:$0xff] }
0x1485   :  { %v11069_v53 = vpack.c.bf16 %v4864_v22, %v4860_v33  ;;  %v4878_v22 = vld [vmem:[#allocation12 + $0x110] sm:$0xff] }
0x1486   :  { %v11094_v44 = vpack.c.bf16 %v4882_v8, %v4878_v22  ;;  %v4897_v22 = vld [vmem:[#allocation12 + $0x1a8] sm:$0xff]  ;;  %v4895_v8 = vld [vmem:[#allocation12 + $0x198] sm:$0xff] }
0x1487   :  { %7834 = vmatpush1.bf16.msra.mxu0 %v11069_v53 }
0x1488   :  { %7836 = vmatprep.subr.bf16.mxu0 %v11074_v20 }
0x148b   :  { %7838 = vmatpush1.bf16.msra.mxu0 %v11080_v14 }
0x148c   :  { %7840 = vmatprep.subr.bf16.mxu0 %v11086_v15 }
0x14ad   :  { %v11065_v49 = vpop.xlane.xlu0 %4085 }
0x14b1   :  { %v4428_v0 = vpop.permute.xlu0 %4427 }
0x14b2   :  { %v4458_v42 = vsel %vm4439_vm14, %v4428_v0, 0.0  ;;  %v4876_v0 = vld [vmem:[#allocation12 + $0x100] sm:$0xff] }
0x14b3   :  { %4459 = vadd.xlane.f32.xlu0 %v4458_v42  ;;  %v4880_v42 = vld [vmem:[#allocation12 + $0x120] sm:$0xff] }
0x14b4   :  { %v11091_v33 = vpack.c.bf16 %v4880_v42, %v4876_v0  ;;  %v4893_v42 = vld [vmem:[#allocation12 + $0x188] sm:$0xff] }
0x14b5   :  { %v11111_v55 = vpack.c.bf16 %v4897_v22, %v4893_v42  ;;  %v4905_v42 = vld [vmem:[#allocation12 + $0x1e8] sm:$0xff]  ;;  %v4903_v22 = vld [vmem:[#allocation12 + $0x1d8] sm:$0xff] }
0x14b6   :  { %7842 = vmatpush1.bf16.msra.mxu0 %v11091_v33 }
0x14b7   :  { %4340 = vadd.xlane.f32.xlu0 %v4339_v17  ;;  %v11089_v17 = vpack.c.bf16 %v4883_v51, %v4879_v4  ;;  %v11102_v4 = vpack.c.bf16 %v4888_v35, %v4884_v54  ;;  %v4890_v51 = vld [vmem:[#allocation12 + $0x170] sm:$0xff]  ;;  %7844 = vmatprep.subr.bf16.mxu0 %v11097_v50  ;;  %11620 = vst [vmem:[#allocation31_spill] sm:$0xff] %v11111_v55  ;;  %v4896_v54 = vld [vmem:[#allocation12 + $0x1a0] sm:$0xff] }
0x14b8   :  { %v11106_v0 = vpack.c.bf16 %v4890_v51, %v4886_v45  ;;  %v11113_v35 = vpack.c.bf16 %v4899_v26, %v4895_v8  ;;  %v11115_v23 = vpack.c.bf16 %v4896_v54, %v4892_v59  ;;  %v4894_v45 = vld [vmem:[#allocation12 + $0x190] sm:$0xff]  ;;  %v4907_v8 = vld [vmem:[#allocation12 + $0x1f8] sm:$0xff]  ;;  %v4900_v26 = vld [vmem:[#allocation12 + $0x1c0] sm:$0xff] }
0x14b9   :  { %v3965_v60 = vpop.xlane.xlu1 %3964  ;;  %7872 = vmatprep.subr.bf16.mxu1 %v11089_v17  ;;  %11618 = vst [vmem:[#allocation29_spill] sm:$0xff] %v11102_v4  ;;  %v4898_v51 = vld [vmem:[#allocation12 + $0x1b0] sm:$0xff]  ;;  %v4904_v59 = vld [vmem:[#allocation12 + $0x1e0] sm:$0xff]  ;;  %v11125_v54 = vpack.c.bf16 %v4907_v8, %v4903_v22 }
0x14ba   :  { %7874 = vmatpush1.bf16.msra.mxu1 %v11094_v44  ;;  %11619 = vst [vmem:[#allocation30_spill] sm:$0xff] %v11106_v0  ;;  %7846 = vmatpush1.bf16.msra.mxu0 %v11102_v4  ;;  %11621 = vst [vmem:[#allocation32_spill] sm:$0xff] %v11115_v23  ;;  %v11118_v4 = vpack.c.bf16 %v4898_v51, %v4894_v45  ;;  %v11127_v50 = vpack.c.bf16 %v4904_v59, %v4900_v26  ;;  %v4902_v45 = vld [vmem:[#allocation12 + $0x1d0] sm:$0xff]  ;;  %8880 = vrcp.f32 %v3965_v60 }
0x14bb   :  { %7876 = vmatprep.subr.bf16.mxu1 %v11099_v30  ;;  %7848 = vmatprep.subr.bf16.mxu0 %v11111_v55  ;;  %v4906_v51 = vld [vmem:[#allocation12 + $0x1f0] sm:$0xff] }
0x14bc   :  { %11622 = vst [vmem:[#allocation33_spill] sm:$0xff] %v11127_v50 }
0x14bd   :  { %v4208_v57 = vpop.xlane.xlu1 %4207 }
0x14be   :  { %7878 = vmatpush1.bf16.msra.mxu1 %v11106_v0  ;;  %7850 = vmatpush1.bf16.msra.mxu0 %v11115_v23  ;;  %v4901_v0 = vld [vmem:[#allocation12 + $0x1c8] sm:$0xff]  ;;  %v11130_v23 = vpack.c.bf16 %v4906_v51, %v4902_v45  ;;  %8882 = vrcp.f32 %v4208_v57 }
0x14bf   :  { %7880 = vmatprep.subr.bf16.mxu1 %v11113_v35  ;;  %v11123_v30 = vpack.c.bf16 %v4905_v42, %v4901_v0  ;;  %8884 = vrcp.f32 %v11065_v49 }
0x14c0   :  { %11623 = vst [vmem:[#allocation34_spill] sm:$0xff] %v11130_v23 }
0x14c1   :  { %v4451_v55 = vpop.xlane.xlu1 %4450  ;;  %7852 = vmatprep.subr.bf16.mxu0 %v11123_v30 }
0x14c2   :  { %7882 = vmatpush1.bf16.msra.mxu1 %v11118_v4  ;;  %7854 = vmatpush1.bf16.msra.mxu0 %v11127_v50  ;;  %8886 = vrcp.f32 %v4451_v55 }
0x14c3   :  { %7884 = vmatprep.subr.bf16.mxu1 %v11125_v54  ;;  %7888 = vmatprep.subr.bf16.mxu0 %v11035_v48 }
0x14c4   :  { %v8881_v26 = vpop.eup %8880 }
0x14c5   :  { %v4089_v0 = vpop.xlane.xlu1 %4088  ;;  %v3985_v48 = vmul.f32 %v8881_v26, %v10917_v52 }
0x14c6   :  { %7886 = vmatpush1.bf16.msra.mxu1 %v11130_v23 }
0x14c7   :  { %7920 = vmatprep.subr.bf16.mxu1 %v11037_v24 }
0x14c8   :  { %v8883_v45 = vpop.eup %8882 }
0x14c9   :  { %v4332_v42 = vpop.xlane.xlu1 %4331  ;;  %v8885_v51 = vpop.eup %8884  ;;  %v4228_v24 = vmul.f32 %v8883_v45, %v10724_v1 }
0x14ca   :  { %v4106_v49 = vmul.f32 %v8885_v51, %v10710_v32 }
0x14cc   :  { %v8887_v60 = vpop.eup %8886 }
0x14cd   :  { %v3971_v59 = vpop.xlane.xlu1 %3970 }
0x14d1   :  { %v4214_v55 = vpop.xlane.xlu1 %4213 }
0x14e2   :  { %v4329_v22 = vpop.xlane.xlu0 %4328 }
0x14e3   :  { %8888 = vrcp.f32 %v4329_v22 }
0x14e6   :  { %v3968_v8 = vpop.xlane.xlu0 %3967 }
0x14e7   :  { %8890 = vrcp.f32 %v3968_v8  ;;  %v4483_v8 = vsel %vm3905_vm10, %v3985_v48, %v4106_v49  ;;  %v4457_v48 = vpop.xlane.xlu1 %4456 }
0x14e8   :  { %8892 = vrcp.f32 %v4089_v0  ;;  %v4471_v0 = vmul.f32 %v8887_v60, %v10732_v18  ;;  %v4492_v52 = vsel %vm4488_vm15, %v4483_v8, %v4228_v24 }
0x14ea   :  { %v4211_v23 = vpop.xlane.xlu0 %4210 }
0x14eb   :  { %8894 = vrcp.f32 %v4211_v23 }
0x14ec   :  { %8896 = vrcp.f32 %v4332_v42 }
0x14ed   :  { %v8889_v57 = vpop.eup %8888 }
0x14ee   :  { %v4454_v22 = vpop.xlane.xlu0 %4453  ;;  %v4349_v50 = vmul.f32 %v8889_v57, %v10722_v11 }
0x14ef   :  { %8898 = vrcp.f32 %v4454_v22 }
0x14f0   :  { %v4501_v26 = vsel %vm4497_vm0, %v4492_v52, %v4349_v50  ;;  %8900 = vrcp.f32 %v3971_v59 }
0x14f1   :  { %v8891_v1 = vpop.eup %8890  ;;  %v4510_v23 = vsel %vm4506_vm1, %v4501_v26, %v4471_v0 }
0x14f2   :  { %v8893_v32 = vpop.eup %8892  ;;  %v4519_v42 = vsel %vm4515_vm2, %v4510_v23, 0.0  ;;  %6450 = vmatmul.mubr.msk.f32.gmra.mrb[40].mxu0 %vm4515_vm2, %v4510_v23  ;;  %6458 = vmatmul.mubr.msk.f32.gmra.mrb[50].mxu1 %vm4515_vm2, %v4510_v23  ;;  %v4092_v11 = vpop.xlane.xlu0 %4091  ;;  %v3987_v45 = vmul.f32 %v8891_v1, %v10980_v40 }
0x14f3   :  { %4527 = vst [vmem:[%s11566_s19 + $0x18] sm:$0xff] %v4519_v42  ;;  %8902 = vrcp.f32 %v4092_v11  ;;  %4706 = vmatprep.mubr.f32.mxu0 %v11613_v27  ;;  %4819 = vmatprep.mubr.f32.mxu1 %v11613_v27  ;;  %v4108_v24 = vmul.f32 %v8893_v32, %v10763_v43 }
0x14f4   :  { %8904 = vrcp.f32 %v4214_v55 }
0x14f5   :  { %v8895_v18 = vpop.eup %8894  ;;  %8906 = vrcp.f32 %v4457_v48  ;;  %v4484_v40 = vsel %vm3905_vm10, %v3987_v45, %v4108_v24 }
0x14f6   :  { %v8897_v50 = vpop.eup %8896  ;;  %v4230_v59 = vmul.f32 %v8895_v18, %v10776_v58  ;;  %v4335_v51 = vpop.xlane.xlu0 %4334 }
0x14f7   :  { %8908 = vrcp.f32 %v4335_v51  ;;  %v4351_v57 = vmul.f32 %v8897_v50, %v10772_v31 }
0x14f8   :  { %v4493_v60 = vsel %vm4488_vm15, %v4484_v40, %v4230_v59 }
0x14f9   :  { %v8899_v49 = vpop.eup %8898  ;;  %v4502_v55 = vsel %vm4497_vm0, %v4493_v60, %v4351_v57 }
0x14fa   :  { %v4473_v22 = vmul.f32 %v8899_v49, %v10780_v29  ;;  %v8901_v8 = vpop.eup %8900 }
0x14fb   :  { %v3989_v26 = vmul.f32 %v8901_v8, %v10943_v37 }
0x14fc   :  { %v4511_v43 = vsel %vm4506_vm1, %v4502_v55, %v4473_v22 }
0x14fd   :  { %v8903_v0 = vpop.eup %8902  ;;  %v4520_v52 = vsel %vm4515_vm2, %v4511_v43, 0.0  ;;  %6451 = vmatmul.mubr.msk.f32.gmra.mrb[42].mxu0 %vm4515_vm2, %v4511_v43  ;;  %6459 = vmatmul.mubr.msk.f32.gmra.mrb[52].mxu1 %vm4515_vm2, %v4511_v43 }
0x14fe   :  { %v8905_v58 = vpop.eup %8904  ;;  %v4110_v1 = vmul.f32 %v8903_v0, %v10754_v47  ;;  %4528 = vst [vmem:[%s11566_s19 + $0x20] sm:$0xff] %v4520_v52  ;;  %4712 = vmatprep.mubr.f32.mxu0 %v11613_v27  ;;  %4825 = vmatprep.mubr.f32.mxu1 %v11613_v27 }
0x14ff   :  { %v8907_v31 = vpop.eup %8906  ;;  %v4232_v32 = vmul.f32 %v8905_v58, %v10765_v21  ;;  %v3977_v21 = vpop.xlane.xlu1 %3976 }
0x1500   :  { %v4485_v29 = vsel %vm3905_vm10, %v3989_v26, %v4110_v1  ;;  %v4475_v37 = vmul.f32 %v8907_v31, %v10815_v36 }
0x1501   :  { %v8909_v23 = vpop.eup %8908  ;;  %v4494_v47 = vsel %vm4488_vm15, %v4485_v29, %v4232_v32 }
0x1502   :  { %v4353_v42 = vmul.f32 %v8909_v23, %v10811_v39  ;;  %v3974_v39 = vpop.xlane.xlu0 %3973 }
0x1504   :  { %v4503_v11 = vsel %vm4497_vm0, %v4494_v47, %v4353_v42 }
0x1505   :  { %v4512_v48 = vsel %vm4506_vm1, %v4503_v11, %v4475_v37  ;;  %v4095_v36 = vpop.xlane.xlu1 %4094 }
0x1506   :  { %v4521_v45 = vsel %vm4515_vm2, %v4512_v48, 0.0  ;;  %6452 = vmatmul.mubr.msk.f32.gmra.mrb[44].mxu0 %vm4515_vm2, %v4512_v48  ;;  %6460 = vmatmul.mubr.msk.f32.gmra.mrb[54].mxu1 %vm4515_vm2, %v4512_v48  ;;  %v4098_v18 = vpop.xlane.xlu0 %4097  ;;  %8910 = vrcp.f32 %v4095_v36  ;;  %v11627_v36 = vld [vmem:[#allocation30_spill] sm:$0xff] }
0x1507   :  { %4529 = vst [vmem:[%s11566_s19 + $0x28] sm:$0xff] %v4521_v45  ;;  %4718 = vmatprep.mubr.f32.mxu0 %v11613_v27  ;;  %4831 = vmatprep.mubr.f32.mxu1 %v11613_v27  ;;  %8912 = vrcp.f32 %v3974_v39  ;;  %v11626_v39 = vld [vmem:[#allocation29_spill] sm:$0xff] }
0x1509   :  { %v4338_v24 = vpop.xlane.xlu1 %4337 }
0x150a   :  { %v4217_v50 = vpop.xlane.xlu0 %4216  ;;  %8914 = vrcp.f32 %v4338_v24  ;;  %v11629_v24 = vld [vmem:[#allocation32_spill] sm:$0xff] }
0x150b   :  { %8916 = vrcp.f32 %v4217_v50  ;;  %v11630_v50 = vld [vmem:[#allocation33_spill] sm:$0xff] }
0x150c   :  { %8918 = vrcp.f32 %v3977_v21 }
0x150d   :  { %v4220_v59 = vpop.xlane.xlu1 %4219  ;;  %8920 = vrcp.f32 %v4098_v18  ;;  %v11628_v18 = vld [vmem:[#allocation31_spill] sm:$0xff] }
0x150e   :  { %8922 = vrcp.f32 %v4220_v59  ;;  %v11631_v59 = vld [vmem:[#allocation34_spill] sm:$0xff] }
0x1510   :  { %v8911_v60 = vpop.eup %8910 }
0x1511   :  { %v4463_v40 = vpop.xlane.xlu1 %4462  ;;  %v8913_v49 = vpop.eup %8912  ;;  %v4112_v22 = vmul.f32 %v8911_v60, %v10902_v7  ;;  %v4596_v60 = vld [vmem:[#allocation10] sm:$0xf] }
0x1512   :  { %v3991_v43 = vmul.f32 %v8913_v49, %v11025_v46  ;;  %v11634_v49 = vld [vmem:[#allocation20_spill] sm:$0xff] }
0x1514   :  { %v8915_v8 = vpop.eup %8914  ;;  %v4486_v26 = vsel %vm3905_vm10, %v3991_v43, %v4112_v22  ;;  %v11635_v22 = vld [vmem:[#allocation21_spill] sm:$0xff] }
0x1515   :  { %v8917_v55 = vpop.eup %8916  ;;  %v4355_v58 = vmul.f32 %v8915_v8, %v10906_v63  ;;  %v11263_v8 = vrot.slane %v4596_v60, %v11635_v22 }
0x1516   :  { %v8919_v0 = vpop.eup %8918  ;;  %v4234_v31 = vmul.f32 %v8917_v55, %v10896_v2 }
0x1517   :  { %v8921_v52 = vpop.eup %8920  ;;  %v3993_v47 = vmul.f32 %v8919_v0, %v10958_v12 }
0x1518   :  { %v8923_v1 = vpop.eup %8922  ;;  %v4114_v23 = vmul.f32 %v8921_v52, %v10890_v19  ;;  %v4495_v7 = vsel %vm4488_vm15, %v4486_v26, %v4234_v31 }
0x1519   :  { %v4236_v42 = vmul.f32 %v8923_v1, %v10880_v62  ;;  %v4504_v46 = vsel %vm4497_vm0, %v4495_v7, %v4355_v58  ;;  %v11637_v7 = vld [vmem:[#allocation23_spill] sm:$0xff] }
0x151a   :  { %v4487_v19 = vsel %vm3905_vm10, %v3993_v47, %v4114_v23 }
0x1540   :  { %v4460_v51 = vpop.xlane.xlu0 %4459 }
0x1541   :  { %8924 = vrcp.f32 %v4460_v51  ;;  %v11632_v51 = vld [vmem:[#allocation25_spill] sm:$0xff] }
0x1542   :  { %8926 = vrcp.f32 %v4463_v40  ;;  %v11633_v40 = vld [vmem:[#allocation26_spill] sm:$0xff] }
0x1544   :  { %v4341_v57 = vpop.xlane.xlu0 %4340 }
0x1545   :  { %8928 = vrcp.f32 %v4341_v57  ;;  %v11260_v57 = vrot.slane %v4596_v60, %v11634_v49 }
0x154b   :  { %v8925_v29 = vpop.eup %8924 }
0x154c   :  { %v4477_v32 = vmul.f32 %v8925_v29, %v10933_v16  ;;  %v8927_v37 = vpop.eup %8926  ;;  %v4496_v16 = vsel %vm4488_vm15, %v4487_v19, %v4236_v42  ;;  %v11636_v29 = vld [vmem:[#allocation22_spill] sm:$0xff]  ;;  %v11272_v42 = vrot.slane %v4596_v60, %v11637_v7 }
0x154d   :  { %v4479_v2 = vmul.f32 %v8927_v37, %v10885_v56  ;;  %v11624_v56 = vld [vmem:[#allocation27_spill] sm:$0xff]  ;;  %v11268_v23 = vrot.slane %v4596_v60, %v11636_v29 }
0x154e   :  { %v4513_v63 = vsel %vm4506_vm1, %v4504_v46, %v4477_v32 }
0x154f   :  { %v8929_v11 = vpop.eup %8928  ;;  %v4522_v48 = vsel %vm4515_vm2, %v4513_v63, 0.0  ;;  %6453 = vmatmul.mubr.msk.f32.gmra.mrb[46].mxu0 %vm4515_vm2, %v4513_v63  ;;  %6461 = vmatmul.mubr.msk.f32.gmra.mrb[56].mxu1 %vm4515_vm2, %v4513_v63 }
0x1550   :  { %4530 = vst [vmem:[%s11566_s19 + $0x30] sm:$0xff] %v4522_v48  ;;  %4724 = vmatprep.mubr.f32.mxu0 %v11613_v27  ;;  %4837 = vmatprep.mubr.f32.mxu1 %v11613_v27  ;;  %v4357_v62 = vmul.f32 %v8929_v11, %v10894_v9  ;;  %v11625_v9 = vld [vmem:[#allocation28_spill] sm:$0xff] }
0x1552   :  { %v4505_v12 = vsel %vm4497_vm0, %v4496_v16, %v4357_v62 }
0x1553   :  { %v4514_v45 = vsel %vm4506_vm1, %v4505_v12, %v4479_v2 }
0x1554   :  { %v4523_v21 = vsel %vm4515_vm2, %v4514_v45, 0.0  ;;  %6454 = vmatmul.mubr.msk.f32.gmra.mrb[48].mxu0 %vm4515_vm2, %v4514_v45  ;;  %6462 = vmatmul.mubr.msk.f32.gmra.mrb[58].mxu1 %vm4515_vm2, %v4514_v45 }
0x1555   :  { %4531 = vst [vmem:[%s11566_s19 + $0x38] sm:$0xff] %v4523_v21  ;;  %4972 = vmatprep.mubr.f32.mxu0 %v11613_v27  ;;  %5043 = vmatprep.mubr.f32.mxu1 %v11613_v27 }
0x1558   :  { %4973 = vmatmul.mubr.f32.vlgmr.msra.gmra.mrb[34].mxu0 %v11613_v27  ;;  %5044 = vmatmul.mubr.f32.vlgmr.msra.gmra.mrb[44].mxu1 %v11613_v27 }
0x1559   :  { %7890 = vmatpush1.bf16.msra.mxu0 %v11039_v41  ;;  %7922 = vmatpush1.bf16.msra.mxu1 %v11042_v13 }
0x155a   :  { %7892 = vmatprep.subr.bf16.mxu0 %v11046_v6  ;;  %7924 = vmatprep.subr.bf16.mxu1 %v11048_v34 }
0x155b   :  { %5142 = vmatprep.mubr.f32.mxu0 %v11613_v27  ;;  %5213 = vmatprep.mubr.f32.mxu1 %v11613_v27 }
0x155d   :  { %7894 = vmatpush1.bf16.msra.mxu0 %v11051_v5  ;;  %7926 = vmatpush1.bf16.msra.mxu1 %v11055_v25 }
0x155e   :  { %7896 = vmatprep.subr.bf16.mxu0 %v11057_v10  ;;  %7928 = vmatprep.subr.bf16.mxu1 %v11059_v38 }
0x1561   :  { %7898 = vmatpush1.bf16.msra.mxu0 %v11069_v53  ;;  %7930 = vmatpush1.bf16.msra.mxu1 %v11071_v28 }
0x1562   :  { %7900 = vmatprep.subr.bf16.mxu0 %v11074_v20  ;;  %7932 = vmatprep.subr.bf16.mxu1 %v11077_v61 }
0x1565   :  { %7902 = vmatpush1.bf16.msra.mxu0 %v11080_v14  ;;  %7934 = vmatpush1.bf16.msra.mxu1 %v11083_v3 }
0x1566   :  { %7904 = vmatprep.subr.bf16.mxu0 %v11086_v15  ;;  %7936 = vmatprep.subr.bf16.mxu1 %v11089_v17 }
0x1569   :  { %7906 = vmatpush1.bf16.msra.mxu0 %v11091_v33  ;;  %7938 = vmatpush1.bf16.msra.mxu1 %v11094_v44 }
0x156a   :  { %7908 = vmatprep.subr.bf16.mxu0 %v11624_v56  ;;  %7940 = vmatprep.subr.bf16.mxu1 %v11625_v9 }
0x156d   :  { %7910 = vmatpush1.bf16.msra.mxu0 %v11626_v39  ;;  %7942 = vmatpush1.bf16.msra.mxu1 %v11627_v36 }
0x156e   :  { %7912 = vmatprep.subr.bf16.mxu0 %v11628_v18  ;;  %7944 = vmatprep.subr.bf16.mxu1 %v11113_v35 }
0x1571   :  { %7914 = vmatpush1.bf16.msra.mxu0 %v11629_v24  ;;  %7946 = vmatpush1.bf16.msra.mxu1 %v11118_v4 }
0x1572   :  { %7916 = vmatprep.subr.bf16.mxu0 %v11123_v30  ;;  %7948 = vmatprep.subr.bf16.mxu1 %v11125_v54 }
0x1575   :  { %7918 = vmatpush1.bf16.msra.mxu0 %v11630_v50  ;;  %7950 = vmatpush1.bf16.msra.mxu1 %v11631_v59 }
0x1576   :  { %7952 = vmatprep.subr.bf16.mxu0 %v11632_v51  ;;  %7984 = vmatprep.subr.bf16.mxu1 %v11633_v40 }
0x162b   :  { %v4974_v55 = vpop.f32.mrb[34].mxu0  ;;  %v5045_v43 = vpop.f32.mrb[44].mxu1 }
0x162c   :  { %v8391_v0 = vadd.f32 %v4974_v55, %v11260_v57  ;;  %v4976_v52 = vpop.f32.mrb[35].mxu0  ;;  %v5047_v58 = vpop.f32.mrb[45].mxu1  ;;  %v8407_v37 = vadd.f32 %v5045_v43, %v11272_v42 }
0x162d   :  { %v8392_v26 = vadd.f32 %v4976_v52, %v11263_v8  ;;  %v8408_v32 = vadd.f32 %v5047_v58, %v11268_v23 }
0x162e   :  { %v6463_v1 = vmul.f32 -1.442695, %v8391_v0 }
0x162f   :  { %v6464_v31 = vmul.f32 -1.442695, %v8392_v26  ;;  %v6465_v46 = vmul.f32 -1.442695, %v8408_v32 }
0x1630   :  { %8930 = vpow2.f32 %v6463_v1 }
0x1631   :  { %8932 = vpow2.f32 %v6464_v31 }
0x1632   :  { %8934 = vpow2.f32 %v6465_v46 }
0x1633   :  { %8936 = vtanh.f32 %v8407_v37 }
0x163a   :  { %v8931_v47 = vpop.eup %8930 }
0x163b   :  { %v8933_v63 = vpop.eup %8932  ;;  %v5057_v11 = vadd.f32 1.0, %v8931_v47 }
0x163c   :  { %v5063_v48 = vadd.f32 1.0, %v8933_v63  ;;  %v8935_v62 = vpop.eup %8934 }
0x163d   :  { %8938 = vrcp.f32 %v5057_v11  ;;  %v8937_v19 = vpop.eup %8936  ;;  %v5070_v45 = vadd.f32 1.0, %v8935_v62 }
0x163e   :  { %8940 = vrcp.f32 %v5063_v48 }
0x163f   :  { %8942 = vrcp.f32 %v5070_v45 }
0x1647   :  { %v8939_v2 = vpop.eup %8938 }
0x1648   :  { %v8941_v16 = vpop.eup %8940  ;;  %v5074_v12 = vmul.f32 %v8939_v2, %v8937_v19 }
0x1649   :  { %v5073_v21 = vmul.f32 0.0, %v8941_v16  ;;  %v8943_v49 = vpop.eup %8942 }
0x164b   :  { %v11275_v60 = vadd.f32 %v5074_v12, %v5073_v21 }
0x164d   :  { %8944 = vtanh.f32 %v11275_v60 }
0x1657   :  { %v8945_v22 = vpop.eup %8944 }
0x1658   :  { %v5077_v55 = vmul.f32 %v8945_v22, %v8943_v49 }
0x165a   :  { %5143 = vmatmul.mubr.f32.vlgmr.msra.gmra.mrb[36].mxu0 %v5077_v55  ;;  %5214 = vmatmul.mubr.f32.vlgmr.msra.gmra.mrb[46].mxu1 %v5077_v55 }
0x165b   :  { %7954 = vmatpush1.bf16.msra.mxu0 %v11039_v41  ;;  %7986 = vmatpush1.bf16.msra.mxu1 %v11042_v13 }
0x165c   :  { %7956 = vmatprep.subr.bf16.mxu0 %v11046_v6  ;;  %7988 = vmatprep.subr.bf16.mxu1 %v11048_v34 }
0x165d   :  { %5312 = vmatprep.mubr.f32.mxu0 %v11613_v27  ;;  %5383 = vmatprep.mubr.f32.mxu1 %v11613_v27 }
0x165f   :  { %7958 = vmatpush1.bf16.msra.mxu0 %v11051_v5  ;;  %7990 = vmatpush1.bf16.msra.mxu1 %v11055_v25 }
0x1660   :  { %7960 = vmatprep.subr.bf16.mxu0 %v11057_v10  ;;  %7992 = vmatprep.subr.bf16.mxu1 %v11059_v38 }
0x1663   :  { %7962 = vmatpush1.bf16.msra.mxu0 %v11069_v53  ;;  %7994 = vmatpush1.bf16.msra.mxu1 %v11071_v28 }
0x1664   :  { %7964 = vmatprep.subr.bf16.mxu0 %v11074_v20  ;;  %7996 = vmatprep.subr.bf16.mxu1 %v11077_v61 }
0x1667   :  { %7966 = vmatpush1.bf16.msra.mxu0 %v11080_v14  ;;  %7998 = vmatpush1.bf16.msra.mxu1 %v11083_v3 }
0x1668   :  { %7968 = vmatprep.subr.bf16.mxu0 %v11086_v15  ;;  %8000 = vmatprep.subr.bf16.mxu1 %v11089_v17 }
0x166b   :  { %7970 = vmatpush1.bf16.msra.mxu0 %v11091_v33  ;;  %8002 = vmatpush1.bf16.msra.mxu1 %v11094_v44 }
0x166c   :  { %7972 = vmatprep.subr.bf16.mxu0 %v11624_v56  ;;  %8004 = vmatprep.subr.bf16.mxu1 %v11625_v9 }
0x166f   :  { %7974 = vmatpush1.bf16.msra.mxu0 %v11626_v39  ;;  %8006 = vmatpush1.bf16.msra.mxu1 %v11627_v36 }
0x1670   :  { %7976 = vmatprep.subr.bf16.mxu0 %v11628_v18  ;;  %8008 = vmatprep.subr.bf16.mxu1 %v11113_v35 }
0x1673   :  { %7978 = vmatpush1.bf16.msra.mxu0 %v11629_v24  ;;  %8010 = vmatpush1.bf16.msra.mxu1 %v11118_v4 }
0x1674   :  { %7980 = vmatprep.subr.bf16.mxu0 %v11123_v30  ;;  %8012 = vmatprep.subr.bf16.mxu1 %v11125_v54 }
0x1677   :  { %7982 = vmatpush1.bf16.msra.mxu0 %v11630_v50  ;;  %8014 = vmatpush1.bf16.msra.mxu1 %v11631_v59 }
0x1678   :  { %8016 = vmatprep.subr.bf16.mxu0 %v11632_v51  ;;  %8048 = vmatprep.subr.bf16.mxu1 %v11633_v40 }
0x172d   :  { %v5144_v43 = vpop.f32.mrb[36].mxu0  ;;  %v5215_v0 = vpop.f32.mrb[46].mxu1 }
0x172e   :  { %v8393_v52 = vadd.f32 %v5144_v43, %v11260_v57  ;;  %v5146_v58 = vpop.f32.mrb[37].mxu0  ;;  %v5217_v26 = vpop.f32.mrb[47].mxu1  ;;  %v8409_v46 = vadd.f32 %v5215_v0, %v11272_v42 }
0x172f   :  { %v8394_v1 = vadd.f32 %v5146_v58, %v11263_v8  ;;  %v8410_v32 = vadd.f32 %v5217_v26, %v11268_v23 }
0x1730   :  { %v6466_v31 = vmul.f32 -1.442695, %v8393_v52 }
0x1731   :  { %v6467_v29 = vmul.f32 -1.442695, %v8394_v1  ;;  %v6468_v7 = vmul.f32 -1.442695, %v8410_v32 }
0x1732   :  { %8946 = vpow2.f32 %v6466_v31 }
0x1733   :  { %8948 = vpow2.f32 %v6467_v29 }
0x1734   :  { %8950 = vpow2.f32 %v6468_v7 }
0x1735   :  { %8952 = vtanh.f32 %v8409_v46 }
0x173c   :  { %v8947_v37 = vpop.eup %8946 }
0x173d   :  { %v8949_v47 = vpop.eup %8948  ;;  %v5227_v63 = vadd.f32 1.0, %v8947_v37 }
0x173e   :  { %v5233_v11 = vadd.f32 1.0, %v8949_v47  ;;  %v8951_v48 = vpop.eup %8950 }
0x173f   :  { %8954 = vrcp.f32 %v5227_v63  ;;  %v8953_v62 = vpop.eup %8952  ;;  %v5240_v12 = vadd.f32 1.0, %v8951_v48 }
0x1740   :  { %8956 = vrcp.f32 %v5233_v11 }
0x1741   :  { %8958 = vrcp.f32 %v5240_v12 }
0x1749   :  { %v8955_v19 = vpop.eup %8954 }
0x174a   :  { %v8957_v2 = vpop.eup %8956  ;;  %v5244_v16 = vmul.f32 %v8955_v19, %v8953_v62 }
0x174b   :  { %v5243_v45 = vmul.f32 %v8957_v2, %v11275_v60  ;;  %v8959_v49 = vpop.eup %8958 }
0x174d   :  { %v11317_v21 = vadd.f32 %v5244_v16, %v5243_v45 }
0x174f   :  { %8960 = vtanh.f32 %v11317_v21 }
0x1759   :  { %v8961_v22 = vpop.eup %8960 }
0x175a   :  { %v5247_v55 = vmul.f32 %v8961_v22, %v8959_v49 }
0x175c   :  { %5313 = vmatmul.mubr.f32.vlgmr.msra.gmra.mrb[38].mxu0 %v5247_v55  ;;  %5384 = vmatmul.mubr.f32.vlgmr.msra.gmra.mrb[48].mxu1 %v5247_v55 }
0x175d   :  { %8018 = vmatpush1.bf16.msra.mxu0 %v11039_v41  ;;  %8050 = vmatpush1.bf16.msra.mxu1 %v11042_v13 }
0x175e   :  { %8020 = vmatprep.subr.bf16.mxu0 %v11046_v6  ;;  %8052 = vmatprep.subr.bf16.mxu1 %v11048_v34 }
0x175f   :  { %5482 = vmatprep.mubr.f32.mxu0 %v11613_v27  ;;  %5553 = vmatprep.mubr.f32.mxu1 %v11613_v27 }
0x1761   :  { %8022 = vmatpush1.bf16.msra.mxu0 %v11051_v5  ;;  %8054 = vmatpush1.bf16.msra.mxu1 %v11055_v25 }
0x1762   :  { %8024 = vmatprep.subr.bf16.mxu0 %v11057_v10  ;;  %8056 = vmatprep.subr.bf16.mxu1 %v11059_v38 }
0x1765   :  { %8026 = vmatpush1.bf16.msra.mxu0 %v11069_v53  ;;  %8058 = vmatpush1.bf16.msra.mxu1 %v11071_v28 }
0x1766   :  { %8028 = vmatprep.subr.bf16.mxu0 %v11074_v20  ;;  %8060 = vmatprep.subr.bf16.mxu1 %v11077_v61 }
0x1769   :  { %8030 = vmatpush1.bf16.msra.mxu0 %v11080_v14  ;;  %8062 = vmatpush1.bf16.msra.mxu1 %v11083_v3 }
0x176a   :  { %8032 = vmatprep.subr.bf16.mxu0 %v11086_v15  ;;  %8064 = vmatprep.subr.bf16.mxu1 %v11089_v17 }
0x176d   :  { %8034 = vmatpush1.bf16.msra.mxu0 %v11091_v33  ;;  %8066 = vmatpush1.bf16.msra.mxu1 %v11094_v44 }
0x176e   :  { %8036 = vmatprep.subr.bf16.mxu0 %v11624_v56  ;;  %8068 = vmatprep.subr.bf16.mxu1 %v11625_v9 }
0x1771   :  { %8038 = vmatpush1.bf16.msra.mxu0 %v11626_v39  ;;  %8070 = vmatpush1.bf16.msra.mxu1 %v11627_v36 }
0x1772   :  { %8040 = vmatprep.subr.bf16.mxu0 %v11628_v18  ;;  %8072 = vmatprep.subr.bf16.mxu1 %v11113_v35 }
0x1775   :  { %8042 = vmatpush1.bf16.msra.mxu0 %v11629_v24  ;;  %8074 = vmatpush1.bf16.msra.mxu1 %v11118_v4 }
0x1776   :  { %8044 = vmatprep.subr.bf16.mxu0 %v11123_v30  ;;  %8076 = vmatprep.subr.bf16.mxu1 %v11125_v54 }
0x1779   :  { %8046 = vmatpush1.bf16.msra.mxu0 %v11630_v50  ;;  %8078 = vmatpush1.bf16.msra.mxu1 %v11631_v59 }
0x177a   :  { %8080 = vmatprep.subr.bf16.mxu0 %v11632_v51  ;;  %8112 = vmatprep.subr.bf16.mxu1 %v11633_v40 }
0x182f   :  { %v5314_v60 = vpop.f32.mrb[38].mxu0  ;;  %v5385_v43 = vpop.f32.mrb[48].mxu1 }
0x1830   :  { %v8395_v0 = vadd.f32 %v5314_v60, %v11260_v57  ;;  %v5316_v52 = vpop.f32.mrb[39].mxu0  ;;  %v5387_v58 = vpop.f32.mrb[49].mxu1  ;;  %v8411_v7 = vadd.f32 %v5385_v43, %v11272_v42 }
0x1831   :  { %v8396_v26 = vadd.f32 %v5316_v52, %v11263_v8  ;;  %v8412_v29 = vadd.f32 %v5387_v58, %v11268_v23 }
0x1832   :  { %v6469_v1 = vmul.f32 -1.442695, %v8395_v0 }
0x1833   :  { %v6470_v31 = vmul.f32 -1.442695, %v8396_v26  ;;  %v6471_v32 = vmul.f32 -1.442695, %v8412_v29 }
0x1834   :  { %8962 = vpow2.f32 %v6469_v1 }
0x1835   :  { %8964 = vpow2.f32 %v6470_v31 }
0x1836   :  { %8966 = vpow2.f32 %v6471_v32 }
0x1837   :  { %8968 = vtanh.f32 %v8411_v7 }
0x183e   :  { %v8963_v46 = vpop.eup %8962 }
0x183f   :  { %v8965_v37 = vpop.eup %8964  ;;  %v5397_v47 = vadd.f32 1.0, %v8963_v46 }
0x1840   :  { %v5403_v63 = vadd.f32 1.0, %v8965_v37  ;;  %v8967_v11 = vpop.eup %8966 }
0x1841   :  { %8970 = vrcp.f32 %v5397_v47  ;;  %v8969_v48 = vpop.eup %8968  ;;  %v5410_v16 = vadd.f32 1.0, %v8967_v11 }
0x1842   :  { %8972 = vrcp.f32 %v5403_v63 }
0x1843   :  { %8974 = vrcp.f32 %v5410_v16 }
0x184b   :  { %v8971_v62 = vpop.eup %8970 }
0x184c   :  { %v8973_v19 = vpop.eup %8972  ;;  %v5414_v2 = vmul.f32 %v8971_v62, %v8969_v48 }
0x184d   :  { %v5413_v12 = vmul.f32 %v8973_v19, %v11317_v21  ;;  %v8975_v49 = vpop.eup %8974 }
0x184f   :  { %v11359_v45 = vadd.f32 %v5414_v2, %v5413_v12 }
0x1851   :  { %8976 = vtanh.f32 %v11359_v45 }
0x185b   :  { %v8977_v22 = vpop.eup %8976 }
0x185c   :  { %v5417_v55 = vmul.f32 %v8977_v22, %v8975_v49 }
0x185e   :  { %5483 = vmatmul.mubr.f32.vlgmr.msra.gmra.mrb[40].mxu0 %v5417_v55  ;;  %5554 = vmatmul.mubr.f32.vlgmr.msra.gmra.mrb[50].mxu1 %v5417_v55 }
0x185f   :  { %8082 = vmatpush1.bf16.msra.mxu0 %v11039_v41  ;;  %8114 = vmatpush1.bf16.msra.mxu1 %v11042_v13 }
0x1860   :  { %8084 = vmatprep.subr.bf16.mxu0 %v11046_v6  ;;  %8116 = vmatprep.subr.bf16.mxu1 %v11048_v34 }
0x1861   :  { %5652 = vmatprep.mubr.f32.mxu0 %v11613_v27  ;;  %5723 = vmatprep.mubr.f32.mxu1 %v11613_v27 }
0x1863   :  { %8086 = vmatpush1.bf16.msra.mxu0 %v11051_v5  ;;  %8118 = vmatpush1.bf16.msra.mxu1 %v11055_v25 }
0x1864   :  { %8088 = vmatprep.subr.bf16.mxu0 %v11057_v10  ;;  %8120 = vmatprep.subr.bf16.mxu1 %v11059_v38 }
0x1867   :  { %8090 = vmatpush1.bf16.msra.mxu0 %v11069_v53  ;;  %8122 = vmatpush1.bf16.msra.mxu1 %v11071_v28 }
0x1868   :  { %8092 = vmatprep.subr.bf16.mxu0 %v11074_v20  ;;  %8124 = vmatprep.subr.bf16.mxu1 %v11077_v61 }
0x186b   :  { %8094 = vmatpush1.bf16.msra.mxu0 %v11080_v14  ;;  %8126 = vmatpush1.bf16.msra.mxu1 %v11083_v3 }
0x186c   :  { %8096 = vmatprep.subr.bf16.mxu0 %v11086_v15  ;;  %8128 = vmatprep.subr.bf16.mxu1 %v11089_v17 }
0x186f   :  { %8098 = vmatpush1.bf16.msra.mxu0 %v11091_v33  ;;  %8130 = vmatpush1.bf16.msra.mxu1 %v11094_v44 }
0x1870   :  { %8100 = vmatprep.subr.bf16.mxu0 %v11624_v56  ;;  %8132 = vmatprep.subr.bf16.mxu1 %v11625_v9 }
0x1873   :  { %8102 = vmatpush1.bf16.msra.mxu0 %v11626_v39  ;;  %8134 = vmatpush1.bf16.msra.mxu1 %v11627_v36 }
0x1874   :  { %8104 = vmatprep.subr.bf16.mxu0 %v11628_v18  ;;  %8136 = vmatprep.subr.bf16.mxu1 %v11113_v35 }
0x1877   :  { %8106 = vmatpush1.bf16.msra.mxu0 %v11629_v24  ;;  %8138 = vmatpush1.bf16.msra.mxu1 %v11118_v4 }
0x1878   :  { %8108 = vmatprep.subr.bf16.mxu0 %v11123_v30  ;;  %8140 = vmatprep.subr.bf16.mxu1 %v11125_v54 }
0x187b   :  { %8110 = vmatpush1.bf16.msra.mxu0 %v11630_v50  ;;  %8142 = vmatpush1.bf16.msra.mxu1 %v11631_v59 }
0x187c   :  { %8144 = vmatprep.subr.bf16.mxu0 %v11632_v51  ;;  %8176 = vmatprep.subr.bf16.mxu1 %v11633_v40 }
0x1931   :  { %v5484_v21 = vpop.f32.mrb[40].mxu0  ;;  %v5555_v60 = vpop.f32.mrb[50].mxu1 }
0x1932   :  { %v8397_v43 = vadd.f32 %v5484_v21, %v11260_v57  ;;  %v5486_v0 = vpop.f32.mrb[41].mxu0  ;;  %v5557_v52 = vpop.f32.mrb[51].mxu1  ;;  %v8413_v32 = vadd.f32 %v5555_v60, %v11272_v42 }
0x1933   :  { %v8398_v58 = vadd.f32 %v5486_v0, %v11263_v8  ;;  %v8414_v31 = vadd.f32 %v5557_v52, %v11268_v23 }
0x1934   :  { %v6472_v26 = vmul.f32 -1.442695, %v8397_v43 }
0x1935   :  { %v6473_v1 = vmul.f32 -1.442695, %v8398_v58  ;;  %v6474_v29 = vmul.f32 -1.442695, %v8414_v31 }
0x1936   :  { %8978 = vpow2.f32 %v6472_v26 }
0x1937   :  { %8980 = vpow2.f32 %v6473_v1 }
0x1938   :  { %8982 = vpow2.f32 %v6474_v29 }
0x1939   :  { %8984 = vtanh.f32 %v8413_v32 }
0x1940   :  { %v8979_v7 = vpop.eup %8978 }
0x1941   :  { %v8981_v46 = vpop.eup %8980  ;;  %v5567_v37 = vadd.f32 1.0, %v8979_v7 }
0x1942   :  { %v5573_v47 = vadd.f32 1.0, %v8981_v46  ;;  %v8983_v63 = vpop.eup %8982 }
0x1943   :  { %8986 = vrcp.f32 %v5567_v37  ;;  %v8985_v11 = vpop.eup %8984  ;;  %v5580_v2 = vadd.f32 1.0, %v8983_v63 }
0x1944   :  { %8988 = vrcp.f32 %v5573_v47 }
0x1945   :  { %8990 = vrcp.f32 %v5580_v2 }
0x194d   :  { %v8987_v48 = vpop.eup %8986 }
0x194e   :  { %v8989_v62 = vpop.eup %8988  ;;  %v5584_v19 = vmul.f32 %v8987_v48, %v8985_v11 }
0x194f   :  { %v5583_v16 = vmul.f32 %v8989_v62, %v11359_v45  ;;  %v8991_v49 = vpop.eup %8990 }
0x1951   :  { %v11401_v12 = vadd.f32 %v5584_v19, %v5583_v16 }
0x1953   :  { %8992 = vtanh.f32 %v11401_v12 }
0x195d   :  { %v8993_v22 = vpop.eup %8992 }
0x195e   :  { %v5587_v55 = vmul.f32 %v8993_v22, %v8991_v49 }
0x1960   :  { %5653 = vmatmul.mubr.f32.vlgmr.msra.gmra.mrb[42].mxu0 %v5587_v55  ;;  %5724 = vmatmul.mubr.f32.vlgmr.msra.gmra.mrb[52].mxu1 %v5587_v55 }
0x1961   :  { %8146 = vmatpush1.bf16.msra.mxu0 %v11039_v41  ;;  %8178 = vmatpush1.bf16.msra.mxu1 %v11042_v13 }
0x1962   :  { %8148 = vmatprep.subr.bf16.mxu0 %v11046_v6  ;;  %8180 = vmatprep.subr.bf16.mxu1 %v11048_v34 }
0x1963   :  { %5822 = vmatprep.mubr.f32.mxu0 %v11613_v27  ;;  %5893 = vmatprep.mubr.f32.mxu1 %v11613_v27 }
0x1965   :  { %8150 = vmatpush1.bf16.msra.mxu0 %v11051_v5  ;;  %8182 = vmatpush1.bf16.msra.mxu1 %v11055_v25 }
0x1966   :  { %8152 = vmatprep.subr.bf16.mxu0 %v11057_v10  ;;  %8184 = vmatprep.subr.bf16.mxu1 %v11059_v38 }
0x1969   :  { %8154 = vmatpush1.bf16.msra.mxu0 %v11069_v53  ;;  %8186 = vmatpush1.bf16.msra.mxu1 %v11071_v28 }
0x196a   :  { %8156 = vmatprep.subr.bf16.mxu0 %v11074_v20  ;;  %8188 = vmatprep.subr.bf16.mxu1 %v11077_v61 }
0x196d   :  { %8158 = vmatpush1.bf16.msra.mxu0 %v11080_v14  ;;  %8190 = vmatpush1.bf16.msra.mxu1 %v11083_v3 }
0x196e   :  { %8160 = vmatprep.subr.bf16.mxu0 %v11086_v15  ;;  %8192 = vmatprep.subr.bf16.mxu1 %v11089_v17 }
0x1971   :  { %8162 = vmatpush1.bf16.msra.mxu0 %v11091_v33  ;;  %8194 = vmatpush1.bf16.msra.mxu1 %v11094_v44 }
0x1972   :  { %8164 = vmatprep.subr.bf16.mxu0 %v11624_v56  ;;  %8196 = vmatprep.subr.bf16.mxu1 %v11625_v9 }
0x1975   :  { %8166 = vmatpush1.bf16.msra.mxu0 %v11626_v39  ;;  %8198 = vmatpush1.bf16.msra.mxu1 %v11627_v36 }
0x1976   :  { %8168 = vmatprep.subr.bf16.mxu0 %v11628_v18  ;;  %8200 = vmatprep.subr.bf16.mxu1 %v11113_v35 }
0x1979   :  { %8170 = vmatpush1.bf16.msra.mxu0 %v11629_v24  ;;  %8202 = vmatpush1.bf16.msra.mxu1 %v11118_v4 }
0x197a   :  { %8172 = vmatprep.subr.bf16.mxu0 %v11123_v30  ;;  %8204 = vmatprep.subr.bf16.mxu1 %v11125_v54 }
0x197d   :  { %8174 = vmatpush1.bf16.msra.mxu0 %v11630_v50  ;;  %8206 = vmatpush1.bf16.msra.mxu1 %v11631_v59 }
0x197e   :  { %8208 = vmatprep.subr.bf16.mxu0 %v11632_v51  ;;  %8240 = vmatprep.subr.bf16.mxu1 %v11633_v40 }
0x1a33   :  { %v5654_v45 = vpop.f32.mrb[42].mxu0  ;;  %v5725_v21 = vpop.f32.mrb[52].mxu1 }
0x1a34   :  { %v8399_v60 = vadd.f32 %v5654_v45, %v11260_v57  ;;  %v5656_v43 = vpop.f32.mrb[43].mxu0  ;;  %v5727_v0 = vpop.f32.mrb[53].mxu1  ;;  %v8415_v29 = vadd.f32 %v5725_v21, %v11272_v42 }
0x1a35   :  { %v8400_v52 = vadd.f32 %v5656_v43, %v11263_v8  ;;  %v8416_v1 = vadd.f32 %v5727_v0, %v11268_v23 }
0x1a36   :  { %v6475_v58 = vmul.f32 -1.442695, %v8399_v60 }
0x1a37   :  { %v6476_v26 = vmul.f32 -1.442695, %v8400_v52  ;;  %v6477_v31 = vmul.f32 -1.442695, %v8416_v1 }
0x1a38   :  { %8994 = vpow2.f32 %v6475_v58 }
0x1a39   :  { %8996 = vpow2.f32 %v6476_v26 }
0x1a3a   :  { %8998 = vpow2.f32 %v6477_v31 }
0x1a3b   :  { %9000 = vtanh.f32 %v8415_v29 }
0x1a42   :  { %v8995_v32 = vpop.eup %8994 }
0x1a43   :  { %v8997_v7 = vpop.eup %8996  ;;  %v5737_v46 = vadd.f32 1.0, %v8995_v32 }
0x1a44   :  { %v5743_v37 = vadd.f32 1.0, %v8997_v7  ;;  %v8999_v47 = vpop.eup %8998 }
0x1a45   :  { %9002 = vrcp.f32 %v5737_v46  ;;  %v9001_v63 = vpop.eup %9000  ;;  %v5750_v19 = vadd.f32 1.0, %v8999_v47 }
0x1a46   :  { %9004 = vrcp.f32 %v5743_v37 }
0x1a47   :  { %9006 = vrcp.f32 %v5750_v19 }
0x1a4f   :  { %v9003_v11 = vpop.eup %9002 }
0x1a50   :  { %v9005_v48 = vpop.eup %9004  ;;  %v5754_v62 = vmul.f32 %v9003_v11, %v9001_v63 }
0x1a51   :  { %v5753_v2 = vmul.f32 %v9005_v48, %v11401_v12  ;;  %v9007_v49 = vpop.eup %9006 }
0x1a53   :  { %v11443_v16 = vadd.f32 %v5754_v62, %v5753_v2 }
0x1a55   :  { %9008 = vtanh.f32 %v11443_v16 }
0x1a5f   :  { %v9009_v22 = vpop.eup %9008 }
0x1a60   :  { %v5757_v55 = vmul.f32 %v9009_v22, %v9007_v49  ;;  %v6271_v22 = vld [vmem:[#allocation13 + $0x18] sm:$0xff] }
0x1a62   :  { %5823 = vmatmul.mubr.f32.vlgmr.msra.gmra.mrb[44].mxu0 %v5757_v55  ;;  %5894 = vmatmul.mubr.f32.vlgmr.msra.gmra.mrb[54].mxu1 %v5757_v55 }
0x1a63   :  { %8210 = vmatpush1.bf16.msra.mxu0 %v11039_v41  ;;  %8242 = vmatpush1.bf16.msra.mxu1 %v11042_v13 }
0x1a64   :  { %8212 = vmatprep.subr.bf16.mxu0 %v11046_v6  ;;  %8244 = vmatprep.subr.bf16.mxu1 %v11048_v34 }
0x1a65   :  { %5992 = vmatprep.mubr.f32.mxu0 %v11613_v27  ;;  %6063 = vmatprep.mubr.f32.mxu1 %v11613_v27 }
0x1a67   :  { %8214 = vmatpush1.bf16.msra.mxu0 %v11051_v5  ;;  %8246 = vmatpush1.bf16.msra.mxu1 %v11055_v25 }
0x1a68   :  { %8216 = vmatprep.subr.bf16.mxu0 %v11057_v10  ;;  %8248 = vmatprep.subr.bf16.mxu1 %v11059_v38 }
0x1a6b   :  { %8218 = vmatpush1.bf16.msra.mxu0 %v11069_v53  ;;  %8250 = vmatpush1.bf16.msra.mxu1 %v11071_v28 }
0x1a6c   :  { %8220 = vmatprep.subr.bf16.mxu0 %v11074_v20  ;;  %8252 = vmatprep.subr.bf16.mxu1 %v11077_v61 }
0x1a6f   :  { %8222 = vmatpush1.bf16.msra.mxu0 %v11080_v14  ;;  %8254 = vmatpush1.bf16.msra.mxu1 %v11083_v3 }
0x1a70   :  { %8224 = vmatprep.subr.bf16.mxu0 %v11086_v15  ;;  %8256 = vmatprep.subr.bf16.mxu1 %v11089_v17 }
0x1a73   :  { %8226 = vmatpush1.bf16.msra.mxu0 %v11091_v33  ;;  %8258 = vmatpush1.bf16.msra.mxu1 %v11094_v44 }
0x1a74   :  { %8228 = vmatprep.subr.bf16.mxu0 %v11624_v56  ;;  %8260 = vmatprep.subr.bf16.mxu1 %v11625_v9 }
0x1a77   :  { %8230 = vmatpush1.bf16.msra.mxu0 %v11626_v39  ;;  %8262 = vmatpush1.bf16.msra.mxu1 %v11627_v36 }
0x1a78   :  { %8232 = vmatprep.subr.bf16.mxu0 %v11628_v18  ;;  %8264 = vmatprep.subr.bf16.mxu1 %v11113_v35 }
0x1a7b   :  { %8234 = vmatpush1.bf16.msra.mxu0 %v11629_v24  ;;  %8266 = vmatpush1.bf16.msra.mxu1 %v11118_v4 }
0x1a7c   :  { %8236 = vmatprep.subr.bf16.mxu0 %v11123_v30  ;;  %8268 = vmatprep.subr.bf16.mxu1 %v11125_v54 }
0x1a7f   :  { %8238 = vmatpush1.bf16.msra.mxu0 %v11630_v50  ;;  %8270 = vmatpush1.bf16.msra.mxu1 %v11631_v59 }
0x1a80   :  { %8272 = vmatprep.subr.bf16.mxu0 %v11632_v51  ;;  %8304 = vmatprep.subr.bf16.mxu1 %v11633_v40 }
0x1b35   :  { %v5824_v12 = vpop.f32.mrb[44].mxu0  ;;  %v5895_v45 = vpop.f32.mrb[54].mxu1 }
0x1b36   :  { %v8401_v21 = vadd.f32 %v5824_v12, %v11260_v57  ;;  %v5826_v60 = vpop.f32.mrb[45].mxu0  ;;  %v5897_v43 = vpop.f32.mrb[55].mxu1  ;;  %v8417_v31 = vadd.f32 %v5895_v45, %v11272_v42  ;;  %v6272_v12 = vld [vmem:[#allocation13 + $0x20] sm:$0xff]  ;;  %v6273_v45 = vld [vmem:[#allocation13 + $0x28] sm:$0xff] }
0x1b37   :  { %v8402_v0 = vadd.f32 %v5826_v60, %v11263_v8  ;;  %v8418_v26 = vadd.f32 %v5897_v43, %v11268_v23  ;;  %v6274_v60 = vld [vmem:[#allocation13 + $0x30] sm:$0xff] }
0x1b38   :  { %v6478_v52 = vmul.f32 -1.442695, %v8401_v21  ;;  %v8342_v21 = vpack.c.bf16 %v6273_v45, %v6272_v12 }
0x1b39   :  { %v6479_v58 = vmul.f32 -1.442695, %v8402_v0  ;;  %v6480_v1 = vmul.f32 -1.442695, %v8418_v26  ;;  %v6276_v0 = vld [vmem:[#allocation13 + $0x40] sm:$0xff]  ;;  %v6278_v26 = vld [vmem:[#allocation13 + $0x50] sm:$0xff] }
0x1b3a   :  { %9010 = vpow2.f32 %v6478_v52  ;;  %v6277_v52 = vld [vmem:[#allocation13 + $0x48] sm:$0xff] }
0x1b3b   :  { %9012 = vpow2.f32 %v6479_v58  ;;  %v8348_v58 = vpack.c.bf16 %v6277_v52, %v6276_v0 }
0x1b3c   :  { %9014 = vpow2.f32 %v6480_v1  ;;  %v6279_v1 = vld [vmem:[#allocation13 + $0x58] sm:$0xff] }
0x1b3d   :  { %9016 = vtanh.f32 %v8417_v31  ;;  %v6280_v31 = vld [vmem:[#allocation13 + $0x60] sm:$0xff] }
0x1b44   :  { %v9011_v51 = vpop.eup %9010 }
0x1b45   :  { %v9013_v29 = vpop.eup %9012  ;;  %v5907_v40 = vadd.f32 1.0, %v9011_v51  ;;  %v8351_v51 = vpack.c.bf16 %v6279_v1, %v6278_v26 }
0x1b46   :  { %v5913_v32 = vadd.f32 1.0, %v9013_v29  ;;  %v9015_v7 = vpop.eup %9014  ;;  %v6281_v29 = vld [vmem:[#allocation13 + $0x68] sm:$0xff] }
0x1b47   :  { %9018 = vrcp.f32 %v5907_v40  ;;  %v9017_v46 = vpop.eup %9016  ;;  %v5920_v11 = vadd.f32 1.0, %v9015_v7  ;;  %v8354_v40 = vpack.c.bf16 %v6281_v29, %v6280_v31  ;;  %v6283_v7 = vld [vmem:[#allocation13 + $0x78] sm:$0xff] }
0x1b48   :  { %9020 = vrcp.f32 %v5913_v32  ;;  %v6282_v32 = vld [vmem:[#allocation13 + $0x70] sm:$0xff] }
0x1b49   :  { %9022 = vrcp.f32 %v5920_v11 }
0x1b51   :  { %v9019_v37 = vpop.eup %9018 }
0x1b52   :  { %v9021_v47 = vpop.eup %9020  ;;  %v5924_v63 = vmul.f32 %v9019_v37, %v9017_v46  ;;  %v8357_v46 = vpack.c.bf16 %v6283_v7, %v6282_v32 }
0x1b53   :  { %v5923_v48 = vmul.f32 %v9021_v47, %v11443_v16  ;;  %v9023_v19 = vpop.eup %9022  ;;  %v6270_v16 = vld [vmem:[#allocation13 + $0x10] sm:$0xff] }
0x1b54   :  { %v8339_v55 = vpack.c.bf16 %v6271_v22, %v6270_v16 }
0x1b55   :  { %v11485_v62 = vadd.f32 %v5924_v63, %v5923_v48 }
0x1b57   :  { %9024 = vtanh.f32 %v11485_v62 }
0x1b61   :  { %v9025_v2 = vpop.eup %9024 }
0x1b62   :  { %v5927_v49 = vmul.f32 %v9025_v2, %v9023_v19 }
0x1b64   :  { %5993 = vmatmul.mubr.f32.vlgmr.msra.gmra.mrb[46].mxu0 %v5927_v49  ;;  %6064 = vmatmul.mubr.f32.vlgmr.msra.gmra.mrb[56].mxu1 %v5927_v49 }
0x1b65   :  { %8274 = vmatpush1.bf16.msra.mxu0 %v11039_v41  ;;  %8306 = vmatpush1.bf16.msra.mxu1 %v11042_v13  ;;  %v11638_v41 = vmov 0.0|0.0  }
0x1b66   :  { %8276 = vmatprep.subr.bf16.mxu0 %v11046_v6  ;;  %8308 = vmatprep.subr.bf16.mxu1 %v11048_v34 }
0x1b67   :  { %6162 = vmatprep.mubr.f32.mxu0 %v11613_v27  ;;  %6233 = vmatprep.mubr.f32.mxu1 %v11613_v27 }
0x1b69   :  { %8278 = vmatpush1.bf16.msra.mxu0 %v11051_v5  ;;  %8310 = vmatpush1.bf16.msra.mxu1 %v11055_v25 }
0x1b6a   :  { %8280 = vmatprep.subr.bf16.mxu0 %v11057_v10  ;;  %8312 = vmatprep.subr.bf16.mxu1 %v11059_v38 }
0x1b6d   :  { %8282 = vmatpush1.bf16.msra.mxu0 %v11069_v53  ;;  %8314 = vmatpush1.bf16.msra.mxu1 %v11071_v28 }
0x1b6e   :  { %8284 = vmatprep.subr.bf16.mxu0 %v11074_v20  ;;  %8316 = vmatprep.subr.bf16.mxu1 %v11077_v61 }
0x1b71   :  { %8286 = vmatpush1.bf16.msra.mxu0 %v11080_v14  ;;  %8318 = vmatpush1.bf16.msra.mxu1 %v11083_v3 }
0x1b72   :  { %8288 = vmatprep.subr.bf16.mxu0 %v11086_v15  ;;  %8320 = vmatprep.subr.bf16.mxu1 %v11089_v17 }
0x1b75   :  { %8290 = vmatpush1.bf16.msra.mxu0 %v11091_v33  ;;  %8322 = vmatpush1.bf16.msra.mxu1 %v11094_v44 }
0x1b76   :  { %8292 = vmatprep.subr.bf16.mxu0 %v11624_v56  ;;  %8324 = vmatprep.subr.bf16.mxu1 %v11625_v9 }
0x1b79   :  { %8294 = vmatpush1.bf16.msra.mxu0 %v11626_v39  ;;  %8326 = vmatpush1.bf16.msra.mxu1 %v11627_v36 }
0x1b7a   :  { %8296 = vmatprep.subr.bf16.mxu0 %v11628_v18  ;;  %8328 = vmatprep.subr.bf16.mxu1 %v11113_v35 }
0x1b7d   :  { %8298 = vmatpush1.bf16.msra.mxu0 %v11629_v24  ;;  %8330 = vmatpush1.bf16.msra.mxu1 %v11118_v4  ;;  %v6268_v24 = vld [vmem:[#allocation13] sm:$0xff] }
0x1b7e   :  { %8300 = vmatprep.subr.bf16.mxu0 %v11123_v30  ;;  %8332 = vmatprep.subr.bf16.mxu1 %v11125_v54 }
0x1b81   :  { %8302 = vmatpush1.bf16.msra.mxu0 %v11630_v50  ;;  %8334 = vmatpush1.bf16.msra.mxu1 %v11631_v59  ;;  %v6269_v50 = vld [vmem:[#allocation13 + $0x8] sm:$0xff] }
0x1b82   :  { %8335 = vmatprep.subr.bf16.mxu0 %v11638_v41  ;;  %v8336_v59 = vpack.c.bf16 %v6269_v50, %v6268_v24 }
0x1c37   :  { %v5994_v13 = vpop.f32.mrb[46].mxu0  ;;  %v6065_v6 = vpop.f32.mrb[56].mxu1 }
0x1c38   :  { %v8403_v34 = vadd.f32 %v5994_v13, %v11260_v57  ;;  %v5996_v5 = vpop.f32.mrb[47].mxu0  ;;  %v6067_v25 = vpop.f32.mrb[57].mxu1  ;;  %v8419_v61 = vadd.f32 %v6065_v6, %v11272_v42 }
0x1c39   :  { %v8404_v10 = vadd.f32 %v5996_v5, %v11263_v8  ;;  %v8420_v28 = vadd.f32 %v6067_v25, %v11268_v23 }
0x1c3a   :  { %v6481_v38 = vmul.f32 -1.442695, %v8403_v34 }
0x1c3b   :  { %v6482_v53 = vmul.f32 -1.442695, %v8404_v10  ;;  %v6483_v20 = vmul.f32 -1.442695, %v8420_v28 }
0x1c3c   :  { %9026 = vpow2.f32 %v6481_v38 }
0x1c3d   :  { %9028 = vpow2.f32 %v6482_v53 }
0x1c3e   :  { %9030 = vpow2.f32 %v6483_v20 }
0x1c3f   :  { %9032 = vtanh.f32 %v8419_v61 }
0x1c46   :  { %v9027_v14 = vpop.eup %9026 }
0x1c47   :  { %v9029_v3 = vpop.eup %9028  ;;  %v6077_v15 = vadd.f32 1.0, %v9027_v14 }
0x1c48   :  { %v6083_v17 = vadd.f32 1.0, %v9029_v3  ;;  %v9031_v33 = vpop.eup %9030 }
0x1c49   :  { %9034 = vrcp.f32 %v6077_v15  ;;  %v9033_v44 = vpop.eup %9032  ;;  %v6090_v54 = vadd.f32 1.0, %v9031_v33  ;;  %v11639_v15 = vld [vmem:[#allocation24_spill] sm:$0xff] }
0x1c4a   :  { %9036 = vrcp.f32 %v6083_v17 }
0x1c4b   :  { %9038 = vrcp.f32 %v6090_v54 }
0x1c53   :  { %v9035_v30 = vpop.eup %9034 }
0x1c54   :  { %v9037_v4 = vpop.eup %9036  ;;  %v6094_v35 = vmul.f32 %v9035_v30, %v9033_v44 }
0x1c55   :  { %v6093_v56 = vmul.f32 %v9037_v4, %v11485_v62  ;;  %v9039_v39 = vpop.eup %9038 }
0x1c57   :  { %v11526_v9 = vadd.f32 %v6094_v35, %v6093_v56 }
0x1c59   :  { %9040 = vtanh.f32 %v11526_v9 }
0x1c63   :  { %v9041_v36 = vpop.eup %9040 }
0x1c64   :  { %v6097_v18 = vmul.f32 %v9041_v36, %v9039_v39 }
0x1c66   :  { %6163 = vmatmul.mubr.f32.vlgmr.msra.gmra.mrb[48].mxu0 %v6097_v18  ;;  %6234 = vmatmul.mubr.f32.vlgmr.msra.gmra.mrb[58].mxu1 %v6097_v18 }
0x1c67   :  { %6656 = vmatprep.mubr.msk.f32.mxu0 %vm9259_vm4, %v11613_v27  ;;  %8337 = vmatpush3.bf16.msra.mxu0 %v8336_v59  ;;  %v6275_v27 = vld [vmem:[#allocation13 + $0x38] sm:$0xff] }
0x1c68   :  { %8338 = vmatprep.subr.bf16.mxu0 %v11638_v41  ;;  %v8345_v43 = vpack.c.bf16 %v6275_v27, %v6274_v60 }
0x1c6b   :  { %8340 = vmatpush3.bf16.msra.mxu0 %v8339_v55 }
0x1c6c   :  { %8341 = vmatprep.subr.bf16.mxu0 %v11638_v41 }
0x1c6f   :  { %8343 = vmatpush3.bf16.msra.mxu0 %v8342_v21 }
0x1c70   :  { %8344 = vmatprep.subr.bf16.mxu0 %v11638_v41 }
0x1c73   :  { %8346 = vmatpush3.bf16.msra.mxu0 %v8345_v43 }
0x1c74   :  { %8347 = vmatprep.subr.bf16.mxu0 %v11638_v41 }
0x1c77   :  { %8349 = vmatpush3.bf16.msra.mxu0 %v8348_v58 }
0x1c78   :  { %8350 = vmatprep.subr.bf16.mxu0 %v11638_v41 }
0x1c7b   :  { %8352 = vmatpush3.bf16.msra.mxu0 %v8351_v51 }
0x1c7c   :  { %8353 = vmatprep.subr.bf16.mxu0 %v11638_v41 }
0x1c7f   :  { %8355 = vmatpush3.bf16.msra.mxu0 %v8354_v40 }
0x1c80   :  { %8356 = vmatprep.subr.bf16.mxu0 %v11638_v41 }
0x1c83   :  { %8358 = vmatpush3.bf16.msra.mxu0 %v8357_v46 }
0x1d39   :  { %v6164_v37 = vpop.f32.mrb[48].mxu0  ;;  %v6235_v47 = vpop.f32.mrb[58].mxu1 }
0x1d3a   :  { %v8405_v63 = vadd.f32 %v6164_v37, %v11260_v57  ;;  %v6166_v11 = vpop.f32.mrb[49].mxu0  ;;  %v6237_v48 = vpop.f32.mrb[59].mxu1  ;;  %v8421_v6 = vadd.f32 %v6235_v47, %v11272_v42 }
0x1d3b   :  { %v8406_v62 = vadd.f32 %v6166_v11, %v11263_v8  ;;  %v8422_v49 = vadd.f32 %v6237_v48, %v11268_v23 }
0x1d3c   :  { %v6484_v19 = vmul.f32 -1.442695, %v8405_v63 }
0x1d3d   :  { %v6485_v2 = vmul.f32 -1.442695, %v8406_v62  ;;  %v6486_v13 = vmul.f32 -1.442695, %v8422_v49 }
0x1d3e   :  { %9042 = vpow2.f32 %v6484_v19 }
0x1d3f   :  { %9044 = vpow2.f32 %v6485_v2 }
0x1d40   :  { %9046 = vpow2.f32 %v6486_v13 }
0x1d41   :  { %9048 = vtanh.f32 %v8421_v6 }
0x1d48   :  { %v9043_v34 = vpop.eup %9042 }
0x1d49   :  { %v9045_v41 = vpop.eup %9044  ;;  %v6247_v5 = vadd.f32 1.0, %v9043_v34 }
0x1d4a   :  { %v6253_v25 = vadd.f32 1.0, %v9045_v41  ;;  %v9047_v57 = vpop.eup %9046 }
0x1d4b   :  { %9050 = vrcp.f32 %v6247_v5  ;;  %v9049_v10 = vpop.eup %9048  ;;  %v6260_v28 = vadd.f32 1.0, %v9047_v57 }
0x1d4c   :  { %9052 = vrcp.f32 %v6253_v25 }
0x1d4d   :  { %9054 = vrcp.f32 %v6260_v28 }
0x1d55   :  { %v9051_v8 = vpop.eup %9050 }
0x1d56   :  { %v9053_v38 = vpop.eup %9052  ;;  %v6264_v53 = vmul.f32 %v9051_v8, %v9049_v10 }
0x1d57   :  { %v6263_v20 = vmul.f32 %v9053_v38, %v11526_v9  ;;  %v9055_v42 = vpop.eup %9054 }
0x1d59   :  { %v6265_v23 = vadd.f32 %v6264_v53, %v6263_v20 }
0x1d5b   :  { %9056 = vtanh.f32 %v6265_v23 }
0x1d65   :  { %v9057_v61 = vpop.eup %9056 }
0x1d66   :  { %v6267_v14 = vmul.f32 %v9057_v61, %v9055_v42 }
0x1d68   :  { %6657 = vmatmul.mubr.f32.vlgmr.msra.gmra.mrb[50].mxu0 %v6267_v14 }
0x1e3b   :  { %v6350_v3 = vpop.f32.mrb[50].mxu0 }
0x1e3c   :  { %v6354_v17 = vadd.f32 %v6350_v3, %v11639_v15  ;;  %v6658_v33 = vpop.f32.mrb[51].mxu0 }
0x1e3e   :  { %6355 = vst [vmem:[%s11565_s18] sm:$0xff] %v6354_v17 }
0x1e3f   :  { %6364 = vsyncpa [#allocation3], 1 }
0x1e40   :  { %6365 = vsyncpa [#allocation5], 1 }
0x1e41   :  { %6366 = vsyncpa [#allocation8], 1 }
0x1e42   :  { %6367 = vsyncpa [#allocation11], 1 }
0x1e43   :  { %6368 = vsyncpa [#allocation14], 1 }

</bundles_post_ra>
